<compile_context>
chip_gen: v6e
topology: v6e:2x2x1
jax: 0.10.0
libtpu: 0.0.40
codegen_flags: <defaults>
</compile_context>

<pallas_src>
import functools

import jax
import jax.numpy as jnp
from jax import lax
from jax.experimental import pallas as pl
from jax.experimental.pallas import tpu as pltpu

_BN_EPS = 1e-5
_SELU_ALPHA = 1.6732632423543772
_SELU_SCALE = 1.0507009873554805


# ----------------------------------------------------------------------------
# Fused ConvLayer kernel (one batch image per grid step)
# ----------------------------------------------------------------------------
def _conv_layer_kernel(x_ref, w_ref, scale_ref, shift_ref, alpha_ref, o_ref,
                       xpad_ref, patch_ref, *,
                       ksize, stride, upsample, pad, hout, wout, relu_type):
    """x_ref:     (1, Hin, Win, Cin)    bf16 NHWC image
       w_ref:     (Cout, k*k*Cin)       bf16 weights, tap-major / channel-minor
       scale_ref: (Cout, 1)             f32 folded BN scale (or ones)
       shift_ref: (Cout, 1)             f32 folded BN shift (or conv bias)
       alpha_ref: (Cout, 1)             f32 PReLU slope (only read for 'prelu')
       o_ref:     (1, Cout, Hout*Wout)  f32 lane-dense output
       xpad_ref:  (Hu+2p, Wu+2p, Cin)   bf16 VMEM scratch (padded image)
       patch_ref: (Hout*Wout, k*k*Cin)  bf16 VMEM scratch (im2col matrix)
    """
    x = x_ref[0]                                              # (Hin, Win, Cin)

    if upsample:  # F.interpolate(scale_factor=2, mode='nearest'), in-kernel
        h, w, c = x.shape
        x = jnp.broadcast_to(x[:, :, None, :], (h, w, 2, c)).reshape(h, 2 * w, c)
        x = jnp.broadcast_to(x[:, None, :, :], (h, 2, 2 * w, c)).reshape(2 * h, 2 * w, c)

    hu, wu, cin = x.shape

    # --- reflection pad (nn.ReflectionPad2d(k//2)) built directly in VMEM ---
    xpad_ref[pad:pad + hu, pad:pad + wu, :] = x
    for i in range(1, pad + 1):                               # top / bottom rows
        xpad_ref[pad - i:pad - i + 1, pad:pad + wu, :] = x[i:i + 1]
        xpad_ref[pad + hu - 1 + i:pad + hu + i, pad:pad + wu, :] = x[hu - 1 - i:hu - i]
    for j in range(1, pad + 1):                               # left / right cols
        xpad_ref[:, pad - j:pad - j + 1, :] = xpad_ref[:, pad + j:pad + j + 1, :]
        xpad_ref[:, pad + wu - 1 + j:pad + wu + j, :] = \
            xpad_ref[:, pad + wu - 1 - j:pad + wu - j, :]

    # --- im2col: (M, K = k*k*Cin) patch matrix, stride handled in-kernel ---
    m = hout * wout
    for ki in range(ksize):
        for kj in range(ksize):
            if stride == 1:
                t = xpad_ref[ki:ki + hout, kj:kj + wout, :]
            else:  # stride 2: strided read over W, even rows via a leading split
                t = xpad_ref[ki:ki + 2 * hout, pl.ds(kj, wout, 2), :]
                t = t.reshape(hout, 2, wout, cin)[:, 0]
            col = (ki * ksize + kj) * cin
            patch_ref[:, col:col + cin] = t.reshape(m, cin)

    # --- ONE MXU matmul, (Cout, K) x (M, K)^T -> (Cout, M): lane-dense output ---
    acc = lax.dot_general(w_ref[...], patch_ref[...],
                          dimension_numbers=(((1,), (1,)), ((), ())),
                          preferred_element_type=jnp.float32)

    # --- folded BatchNorm(eval)/bias + activation epilogue, fp32 ---
    y = acc * scale_ref[...] + shift_ref[...]
    if relu_type == 'relu':
        y = jnp.maximum(y, 0.0)
    elif relu_type == 'leakyrelu':
        y = jnp.maximum(y, 0.0) + 0.2 * jnp.minimum(y, 0.0)
    elif relu_type == 'prelu':
        y = jnp.maximum(y, 0.0) + alpha_ref[...] * jnp.minimum(y, 0.0)
    elif relu_type == 'selu':
        y = _SELU_SCALE * (jnp.maximum(y, 0.0)
                           + _SELU_ALPHA * (jnp.exp(jnp.minimum(y, 0.0)) - 1.0))
    # relu_type == 'none': identity (no wasted VPU work)

    o_ref[0] = y.astype(o_ref.dtype)


# ----------------------------------------------------------------------------
# Wrapper: one pallas_call, NCHW in -> NCHW out (matches the PyTorch module)
# ----------------------------------------------------------------------------
def conv_layer_forward(x_nchw, params, *, kernel_size=3, scale='none',
                       relu_type='none', use_pad=True):
    n, cin, h, w = x_nchw.shape
    cout = params['w'].shape[0]
    assert kernel_size % 2 == 1
    upsample = (scale == 'up')
    stride = 2 if scale == 'down' else 1
    pad = kernel_size // 2 if use_pad else 0

    hu, wu = (2 * h, 2 * w) if upsample else (h, w)
    if stride == 2:
        assert hu % 2 == 0 and wu % 2 == 0, "stride-2 path assumes even spatial dims"
    hp, wp = hu + 2 * pad, wu + 2 * pad
    hout = (hp - kernel_size) // stride + 1
    wout = (wp - kernel_size) // stride + 1
    m = hout * wout
    kdim = kernel_size * kernel_size * cin

    # Single layout conversion in XLA: NCHW -> NHWC + bf16 cast for the MXU.
    x = jnp.transpose(x_nchw, (0, 2, 3, 1)).astype(jnp.bfloat16)

    kern = functools.partial(
        _conv_layer_kernel, ksize=kernel_size, stride=stride, upsample=upsample,
        pad=pad, hout=hout, wout=wout, relu_type=relu_type.lower())

    out = pl.pallas_call(
        kern,
        out_shape=jax.ShapeDtypeStruct((n, cout, m), jnp.float32),
        grid=(n,),
        in_specs=[
            pl.BlockSpec((1, h, w, cin), lambda i: (i, 0, 0, 0)),
            pl.BlockSpec((cout, kdim), lambda i: (0, 0)),
            pl.BlockSpec((cout, 1), lambda i: (0, 0)),
            pl.BlockSpec((cout, 1), lambda i: (0, 0)),
            pl.BlockSpec((cout, 1), lambda i: (0, 0)),
        ],
        out_specs=pl.BlockSpec((1, cout, m), lambda i: (i, 0, 0)),
        scratch_shapes=[
            pltpu.VMEM((hp, wp, cin), jnp.bfloat16),   # padded (maybe upsampled) image
            pltpu.VMEM((m, kdim), jnp.bfloat16),       # im2col patch matrix
        ],
        compiler_params=pltpu.CompilerParams(
            dimension_semantics=("parallel",)),        # batch images independent (v7x)
    )(x, params['w'], params['scale'], params['shift'], params['alpha'])

    # (N, Cout, Hout*Wout) -> NCHW: row-major-compatible reshape, no transpose.
    return out.reshape(n, cout, hout, wout)


# ----------------------------------------------------------------------------
# Deterministic synthetic parameters (BN folded in eval mode / conv bias)
# ----------------------------------------------------------------------------
def init_conv_layer_params(key, in_channels, out_channels, kernel_size=3,
                           norm_type='none', relu_type='none'):
    k = jax.random.split(key, 6)
    w_oihw = 0.2 * jax.random.normal(
        k[0], (out_channels, in_channels, kernel_size, kernel_size), jnp.float32)
    # tap-major / channel-minor flattening matching the kernel's im2col layout
    w2 = jnp.transpose(w_oihw, (0, 2, 3, 1)).reshape(
        out_channels, kernel_size * kernel_size * in_channels)

    if norm_type == 'bn':        # bias=False; BatchNorm2d folded with running stats
        gamma = jax.random.uniform(k[1], (out_channels,), minval=0.5, maxval=1.5)
        beta = 0.1 * jax.random.normal(k[2], (out_channels,), jnp.float32)
        r_mean = 0.1 * jax.random.normal(k[3], (out_channels,), jnp.float32)
        r_var = jax.random.uniform(k[4], (out_channels,), minval=0.5, maxval=1.5)
        bn_scale = gamma * jax.lax.rsqrt(r_var + _BN_EPS)
        scale, shift = bn_scale, beta - r_mean * bn_scale
    elif norm_type == 'none':    # bias=True, no norm
        scale = jnp.ones((out_channels,), jnp.float32)
        shift = 0.1 * jax.random.normal(k[1], (out_channels,), jnp.float32)
    else:
        # TODO(synk): 'in'/'gn'/'pixel'/'layer' norms are not folded into this kernel.
        raise NotImplementedError(f"norm_type={norm_type}")

    if relu_type == 'prelu':
        alpha = jax.random.uniform(k[5], (out_channels,), minval=0.1, maxval=0.3)
    else:
        alpha = jnp.zeros((out_channels,), jnp.float32)

    return dict(w=w2.astype(jnp.bfloat16),
                scale=scale.reshape(out_channels, 1).astype(jnp.float32),
                shift=shift.reshape(out_channels, 1).astype(jnp.float32),
                alpha=alpha.reshape(out_channels, 1).astype(jnp.float32))


# ----------------------------------------------------------------------------
# Pure-JAX (XLA) reference mirroring the PyTorch ConvLayer, for validation
# ----------------------------------------------------------------------------
def conv_layer_reference(x_nchw, params, *, kernel_size=3, scale='none',
                         relu_type='none', use_pad=True):
    x = x_nchw.astype(jnp.bfloat16).astype(jnp.float32)   # same bf16 rounding as kernel
    if scale == 'up':
        x = jnp.repeat(jnp.repeat(x, 2, axis=2), 2, axis=3)
    pad = kernel_size // 2 if use_pad else 0
    if pad:
        x = jnp.pad(x, ((0, 0), (0, 0), (pad, pad), (pad, pad)), mode='reflect')
    stride = 2 if scale == 'down' else 1
    cout = params['w'].shape[0]
    cin = x.shape[1]
    wmat = params['w'].astype(jnp.float32).reshape(cout, kernel_size, kernel_size, cin)
    wmat = jnp.transpose(wmat, (0, 3, 1, 2))               # (Cout, Cin, kh, kw)
    y = jax.lax.conv_general_dilated(
        x, wmat, (stride, stride), 'VALID',
        dimension_numbers=('NCHW', 'OIHW', 'NCHW'),
        precision=jax.lax.Precision.HIGHEST)
    y = y * params['scale'].reshape(1, cout, 1, 1) + params['shift'].reshape(1, cout, 1, 1)
    rt = relu_type.lower()
    if rt == 'relu':
        y = jnp.maximum(y, 0.0)
    elif rt == 'leakyrelu':
        y = jnp.maximum(y, 0.0) + 0.2 * jnp.minimum(y, 0.0)
    elif rt == 'prelu':
        y = jnp.maximum(y, 0.0) + params['alpha'].reshape(1, cout, 1, 1) * jnp.minimum(y, 0.0)
    elif rt == 'selu':
        y = _SELU_SCALE * (jnp.maximum(y, 0.0)
                           + _SELU_ALPHA * (jnp.exp(jnp.minimum(y, 0.0)) - 1.0))
    return y


# ----------------------------------------------------------------------------
if __name__ == "__main__":
    key = jax.random.PRNGKey(0)
    kx, k1, k2, k3, k4 = jax.random.split(key, 5)

    N, C, H, W = 2, 4, 16, 16
    x = jax.random.normal(kx, (N, C, H, W), jnp.float32)

    fwd = jax.jit(conv_layer_forward,
                  static_argnames=('kernel_size', 'scale', 'relu_type', 'use_pad'))

    #            (scale,  norm,   relu,        Cout)
    configs = [('none', 'bn',   'prelu',     C),   # ConvLayer(4,4, norm='bn', relu='prelu')
               ('none', 'none', 'none',      C),   # ConvLayer defaults
               ('down', 'bn',   'prelu',     8),   # stride-2 conv, in-kernel
               ('up',   'none', 'leakyrelu', C)]   # nearest-x2 upsample, in-kernel
    keys = [k1, k2, k3, k4]

    for (sc, nt, rt, cout), kk in zip(configs, keys):
        p = init_conv_layer_params(kk, C, cout, norm_type=nt, relu_type=rt)
        y = jax.block_until_ready(fwd(x, p, scale=sc, relu_type=rt))
        y_ref = conv_layer_reference(x, p, scale=sc, relu_type=rt)
        sf = {'none': 1.0, 'down': 0.5, 'up': 2.0}[sc]
        assert y.shape == (N, cout, int(H * sf), int(W * sf)), (y.shape, sc)
        assert y.dtype == jnp.float32
        assert bool(jnp.all(jnp.isfinite(y)))
        assert bool(jnp.allclose(y, y_ref, atol=2e-2, rtol=2e-2)), (
            sc, nt, rt, float(jnp.max(jnp.abs(y - y_ref))))

    print("KERNEL_OK")
</pallas_src>

<mosaic_0001>
module attributes {stable_mosaic.version = 11 : i64} {
  func.func @_conv_layer_kernel(%arg0: i32, %arg1: memref<1x16x16x4xbf16, #tpu.memory_space<vmem>>, %arg2: memref<4x36xbf16, #tpu.memory_space<vmem>>, %arg3: memref<4x1xf32, #tpu.memory_space<vmem>>, %arg4: memref<4x1xf32, #tpu.memory_space<vmem>>, %arg5: memref<4x1xf32, #tpu.memory_space<vmem>>, %arg6: memref<1x4x256xf32, #tpu.memory_space<vmem>>, %arg7: memref<18x18x4xbf16, #tpu.memory_space<vmem>>, %arg8: memref<256x36xbf16, #tpu.memory_space<vmem>>) attributes {dimension_semantics = [#tpu.dimension_semantics<parallel>], iteration_bounds = array<i64: 2>, scalar_prefetch = 0 : i64, scratch_operands = 2 : i64, tpu.core_type = #tpu.core_type<tc>, window_params = [{transform_indices = @transform_0, window_bounds = array<i64: 1, 16, 16, 4>}, {pipeline_mode = #tpu.pipeline_mode<synchronous>, transform_indices = @transform_1, window_bounds = array<i64: 4, 36>}, {pipeline_mode = #tpu.pipeline_mode<synchronous>, transform_indices = @transform_2, window_bounds = array<i64: 4, 1>}, {pipeline_mode = #tpu.pipeline_mode<synchronous>, transform_indices = @transform_3, window_bounds = array<i64: 4, 1>}, {pipeline_mode = #tpu.pipeline_mode<synchronous>, transform_indices = @transform_4, window_bounds = array<i64: 4, 1>}, {transform_indices = @transform_5, window_bounds = array<i64: 1, 4, 256>}]} {
    %c0 = arith.constant 0 : index
    %c0_0 = arith.constant 0 : index
    %c0_1 = arith.constant 0 : index
    %c0_2 = arith.constant 0 : index
    %0 = vector.load %arg1[%c0, %c0_0, %c0_1, %c0_2] : memref<1x16x16x4xbf16, #tpu.memory_space<vmem>>, vector<1x16x16x4xbf16>
    %1 = vector.shape_cast %0 : vector<1x16x16x4xbf16> to vector<16x16x4xbf16>
    %c1 = arith.constant 1 : index
    %c1_3 = arith.constant 1 : index
    %c0_4 = arith.constant 0 : index
    %2 = vector.load %arg7[%c1, %c1_3, %c0_4] : memref<18x18x4xbf16, #tpu.memory_space<vmem>>, vector<16x16x4xbf16>
    tpu.vector_store %arg7[%c1, %c1_3, %c0_4], %1 {strides = array<i32>} : memref<18x18x4xbf16, #tpu.memory_space<vmem>>, vector<16x16x4xbf16>,
    %3 = vector.extract_strided_slice %1 {offsets = [1, 0, 0], sizes = [1, 16, 4], strides = [1, 1, 1]} : vector<16x16x4xbf16> to vector<1x16x4xbf16>
    %c0_5 = arith.constant 0 : index
    %c1_6 = arith.constant 1 : index
    %c0_7 = arith.constant 0 : index
    %4 = vector.load %arg7[%c0_5, %c1_6, %c0_7] : memref<18x18x4xbf16, #tpu.memory_space<vmem>>, vector<1x16x4xbf16>
    tpu.vector_store %arg7[%c0_5, %c1_6, %c0_7], %3 {strides = array<i32>} : memref<18x18x4xbf16, #tpu.memory_space<vmem>>, vector<1x16x4xbf16>,
    %5 = vector.extract_strided_slice %1 {offsets = [14, 0, 0], sizes = [1, 16, 4], strides = [1, 1, 1]} : vector<16x16x4xbf16> to vector<1x16x4xbf16>
    %c17 = arith.constant 17 : index
    %c1_8 = arith.constant 1 : index
    %c0_9 = arith.constant 0 : index
    %6 = vector.load %arg7[%c17, %c1_8, %c0_9] : memref<18x18x4xbf16, #tpu.memory_space<vmem>>, vector<1x16x4xbf16>
    tpu.vector_store %arg7[%c17, %c1_8, %c0_9], %5 {strides = array<i32>} : memref<18x18x4xbf16, #tpu.memory_space<vmem>>, vector<1x16x4xbf16>,
    %c0_10 = arith.constant 0 : index
    %c2 = arith.constant 2 : index
    %c0_11 = arith.constant 0 : index
    %7 = vector.load %arg7[%c0_10, %c2, %c0_11] : memref<18x18x4xbf16, #tpu.memory_space<vmem>>, vector<18x1x4xbf16>
    %c0_12 = arith.constant 0 : index
    %c0_13 = arith.constant 0 : index
    %c0_14 = arith.constant 0 : index
    %8 = vector.load %arg7[%c0_12, %c0_13, %c0_14] : memref<18x18x4xbf16, #tpu.memory_space<vmem>>, vector<18x1x4xbf16>
    tpu.vector_store %arg7[%c0_12, %c0_13, %c0_14], %7 {strides = array<i32>} : memref<18x18x4xbf16, #tpu.memory_space<vmem>>, vector<18x1x4xbf16>,
    %c0_15 = arith.constant 0 : index
    %c15 = arith.constant 15 : index
    %c0_16 = arith.constant 0 : index
    %9 = vector.load %arg7[%c0_15, %c15, %c0_16] : memref<18x18x4xbf16, #tpu.memory_space<vmem>>, vector<18x1x4xbf16>
    %c0_17 = arith.constant 0 : index
    %c17_18 = arith.constant 17 : index
    %c0_19 = arith.constant 0 : index
    %10 = vector.load %arg7[%c0_17, %c17_18, %c0_19] : memref<18x18x4xbf16, #tpu.memory_space<vmem>>, vector<18x1x4xbf16>
    tpu.vector_store %arg7[%c0_17, %c17_18, %c0_19], %9 {strides = array<i32>} : memref<18x18x4xbf16, #tpu.memory_space<vmem>>, vector<18x1x4xbf16>,
    %c0_20 = arith.constant 0 : index
    %c0_21 = arith.constant 0 : index
    %c0_22 = arith.constant 0 : index
    %11 = vector.load %arg7[%c0_20, %c0_21, %c0_22] : memref<18x18x4xbf16, #tpu.memory_space<vmem>>, vector<16x16x4xbf16>
    %12 = vector.shape_cast %11 : vector<16x16x4xbf16> to vector<256x4xbf16>
    %c0_23 = arith.constant 0 : index
    %c0_24 = arith.constant 0 : index
    %13 = vector.load %arg8[%c0_23, %c0_24] : memref<256x36xbf16, #tpu.memory_space<vmem>>, vector<256x4xbf16>
    tpu.vector_store %arg8[%c0_23, %c0_24], %12 {strides = array<i32>} : memref<256x36xbf16, #tpu.memory_space<vmem>>, vector<256x4xbf16>,
    %c0_25 = arith.constant 0 : index
    %c1_26 = arith.constant 1 : index
    %c0_27 = arith.constant 0 : index
    %14 = vector.load %arg7[%c0_25, %c1_26, %c0_27] : memref<18x18x4xbf16, #tpu.memory_space<vmem>>, vector<16x16x4xbf16>
    %15 = vector.shape_cast %14 : vector<16x16x4xbf16> to vector<256x4xbf16>
    %c0_28 = arith.constant 0 : index
    %c4 = arith.constant 4 : index
    %16 = vector.load %arg8[%c0_28, %c4] : memref<256x36xbf16, #tpu.memory_space<vmem>>, vector<256x4xbf16>
    tpu.vector_store %arg8[%c0_28, %c4], %15 {strides = array<i32>} : memref<256x36xbf16, #tpu.memory_space<vmem>>, vector<256x4xbf16>,
    %c0_29 = arith.constant 0 : index
    %c2_30 = arith.constant 2 : index
    %c0_31 = arith.constant 0 : index
    %17 = vector.load %arg7[%c0_29, %c2_30, %c0_31] : memref<18x18x4xbf16, #tpu.memory_space<vmem>>, vector<16x16x4xbf16>
    %18 = vector.shape_cast %17 : vector<16x16x4xbf16> to vector<256x4xbf16>
    %c0_32 = arith.constant 0 : index
    %c8 = arith.constant 8 : index
    %19 = vector.load %arg8[%c0_32, %c8] : memref<256x36xbf16, #tpu.memory_space<vmem>>, vector<256x4xbf16>
    tpu.vector_store %arg8[%c0_32, %c8], %18 {strides = array<i32>} : memref<256x36xbf16, #tpu.memory_space<vmem>>, vector<256x4xbf16>,
    %c1_33 = arith.constant 1 : index
    %c0_34 = arith.constant 0 : index
    %c0_35 = arith.constant 0 : index
    %20 = vector.load %arg7[%c1_33, %c0_34, %c0_35] : memref<18x18x4xbf16, #tpu.memory_space<vmem>>, vector<16x16x4xbf16>
    %21 = vector.shape_cast %20 : vector<16x16x4xbf16> to vector<256x4xbf16>
    %c0_36 = arith.constant 0 : index
    %c12 = arith.constant 12 : index
    %22 = vector.load %arg8[%c0_36, %c12] : memref<256x36xbf16, #tpu.memory_space<vmem>>, vector<256x4xbf16>
    tpu.vector_store %arg8[%c0_36, %c12], %21 {strides = array<i32>} : memref<256x36xbf16, #tpu.memory_space<vmem>>, vector<256x4xbf16>,
    %c1_37 = arith.constant 1 : index
    %c1_38 = arith.constant 1 : index
    %c0_39 = arith.constant 0 : index
    %23 = vector.load %arg7[%c1_37, %c1_38, %c0_39] : memref<18x18x4xbf16, #tpu.memory_space<vmem>>, vector<16x16x4xbf16>
    %24 = vector.shape_cast %23 : vector<16x16x4xbf16> to vector<256x4xbf16>
    %c0_40 = arith.constant 0 : index
    %c16 = arith.constant 16 : index
    %25 = vector.load %arg8[%c0_40, %c16] : memref<256x36xbf16, #tpu.memory_space<vmem>>, vector<256x4xbf16>
    tpu.vector_store %arg8[%c0_40, %c16], %24 {strides = array<i32>} : memref<256x36xbf16, #tpu.memory_space<vmem>>, vector<256x4xbf16>,
    %c1_41 = arith.constant 1 : index
    %c2_42 = arith.constant 2 : index
    %c0_43 = arith.constant 0 : index
    %26 = vector.load %arg7[%c1_41, %c2_42, %c0_43] : memref<18x18x4xbf16, #tpu.memory_space<vmem>>, vector<16x16x4xbf16>
    %27 = vector.shape_cast %26 : vector<16x16x4xbf16> to vector<256x4xbf16>
    %c0_44 = arith.constant 0 : index
    %c20 = arith.constant 20 : index
    %28 = vector.load %arg8[%c0_44, %c20] : memref<256x36xbf16, #tpu.memory_space<vmem>>, vector<256x4xbf16>
    tpu.vector_store %arg8[%c0_44, %c20], %27 {strides = array<i32>} : memref<256x36xbf16, #tpu.memory_space<vmem>>, vector<256x4xbf16>,
    %c2_45 = arith.constant 2 : index
    %c0_46 = arith.constant 0 : index
    %c0_47 = arith.constant 0 : index
    %29 = vector.load %arg7[%c2_45, %c0_46, %c0_47] : memref<18x18x4xbf16, #tpu.memory_space<vmem>>, vector<16x16x4xbf16>
    %30 = vector.shape_cast %29 : vector<16x16x4xbf16> to vector<256x4xbf16>
    %c0_48 = arith.constant 0 : index
    %c24 = arith.constant 24 : index
    %31 = vector.load %arg8[%c0_48, %c24] : memref<256x36xbf16, #tpu.memory_space<vmem>>, vector<256x4xbf16>
    tpu.vector_store %arg8[%c0_48, %c24], %30 {strides = array<i32>} : memref<256x36xbf16, #tpu.memory_space<vmem>>, vector<256x4xbf16>,
    %c2_49 = arith.constant 2 : index
    %c1_50 = arith.constant 1 : index
    %c0_51 = arith.constant 0 : index
    %32 = vector.load %arg7[%c2_49, %c1_50, %c0_51] : memref<18x18x4xbf16, #tpu.memory_space<vmem>>, vector<16x16x4xbf16>
    %33 = vector.shape_cast %32 : vector<16x16x4xbf16> to vector<256x4xbf16>
    %c0_52 = arith.constant 0 : index
    %c28 = arith.constant 28 : index
    %34 = vector.load %arg8[%c0_52, %c28] : memref<256x36xbf16, #tpu.memory_space<vmem>>, vector<256x4xbf16>
    tpu.vector_store %arg8[%c0_52, %c28], %33 {strides = array<i32>} : memref<256x36xbf16, #tpu.memory_space<vmem>>, vector<256x4xbf16>,
    %c2_53 = arith.constant 2 : index
    %c2_54 = arith.constant 2 : index
    %c0_55 = arith.constant 0 : index
    %35 = vector.load %arg7[%c2_53, %c2_54, %c0_55] : memref<18x18x4xbf16, #tpu.memory_space<vmem>>, vector<16x16x4xbf16>
    %36 = vector.shape_cast %35 : vector<16x16x4xbf16> to vector<256x4xbf16>
    %c0_56 = arith.constant 0 : index
    %c32 = arith.constant 32 : index
    %37 = vector.load %arg8[%c0_56, %c32] : memref<256x36xbf16, #tpu.memory_space<vmem>>, vector<256x4xbf16>
    tpu.vector_store %arg8[%c0_56, %c32], %36 {strides = array<i32>} : memref<256x36xbf16, #tpu.memory_space<vmem>>, vector<256x4xbf16>,
    %c0_57 = arith.constant 0 : index
    %c0_58 = arith.constant 0 : index
    %38 = vector.load %arg2[%c0_57, %c0_58] : memref<4x36xbf16, #tpu.memory_space<vmem>>, vector<4x36xbf16>
    %c0_59 = arith.constant 0 : index
    %c0_60 = arith.constant 0 : index
    %39 = vector.load %arg8[%c0_59, %c0_60] : memref<256x36xbf16, #tpu.memory_space<vmem>>, vector<256x36xbf16>
    %cst = arith.constant dense<0.000000e+00> : vector<4x256xf32>
    %40 = tpu.matmul %38, %39, %cst {dimension_numbers = #tpu.dot_dimension_numbers<[1], [1], [0], [0], [0, 0, 1, 0], [], []>} : vector<4x36xbf16>, vector<256x36xbf16>, vector<4x256xf32> -> vector<4x256xf32>
    %c0_61 = arith.constant 0 : index
    %c0_62 = arith.constant 0 : index
    %41 = vector.load %arg3[%c0_61, %c0_62] : memref<4x1xf32, #tpu.memory_space<vmem>>, vector<4x1xf32>
    %42 = vector.broadcast %41 : vector<4x1xf32> to vector<4x256xf32>
    %43 = arith.mulf %40, %42 : vector<4x256xf32>
    %c0_63 = arith.constant 0 : index
    %c0_64 = arith.constant 0 : index
    %44 = vector.load %arg4[%c0_63, %c0_64] : memref<4x1xf32, #tpu.memory_space<vmem>>, vector<4x1xf32>
    %45 = vector.broadcast %44 : vector<4x1xf32> to vector<4x256xf32>
    %46 = arith.addf %43, %45 : vector<4x256xf32>
    %cst_65 = arith.constant 0.000000e+00 : f32
    %47 = vector.broadcast %cst_65 : f32 to vector<4x256xf32>
    %48 = arith.maximumf %46, %47 : vector<4x256xf32>
    %c0_66 = arith.constant 0 : index
    %c0_67 = arith.constant 0 : index
    %49 = vector.load %arg5[%c0_66, %c0_67] : memref<4x1xf32, #tpu.memory_space<vmem>>, vector<4x1xf32>
    %cst_68 = arith.constant 0.000000e+00 : f32
    %50 = vector.broadcast %cst_68 : f32 to vector<4x256xf32>
    %51 = arith.minimumf %46, %50 : vector<4x256xf32>
    %52 = vector.broadcast %49 : vector<4x1xf32> to vector<4x256xf32>
    %53 = arith.mulf %52, %51 : vector<4x256xf32>
    %54 = arith.addf %48, %53 : vector<4x256xf32>
    %c0_69 = arith.constant 0 : index
    %c0_70 = arith.constant 0 : index
    %c0_71 = arith.constant 0 : index
    %55 = vector.load %arg6[%c0_69, %c0_70, %c0_71] : memref<1x4x256xf32, #tpu.memory_space<vmem>>, vector<1x4x256xf32>
    %56 = vector.shape_cast %55 : vector<1x4x256xf32> to vector<4x256xf32>
    %57 = vector.shape_cast %54 : vector<4x256xf32> to vector<1x4x256xf32>
    tpu.vector_store %arg6[%c0_69, %c0_70, %c0_71], %57 {strides = array<i32>} : memref<1x4x256xf32, #tpu.memory_space<vmem>>, vector<1x4x256xf32>,
    return
  }
  func.func @transform_0(%arg0: i32) -> (i32, i32, i32, i32) {
    %c0_i32 = arith.constant 0 : i32
    %c0_i32_0 = arith.constant 0 : i32
    %c0_i32_1 = arith.constant 0 : i32
    %c0_i32_2 = arith.constant 0 : i32
    return %arg0, %c0_i32, %c0_i32_0, %c0_i32_1 : i32, i32, i32, i32
  }
  func.func @transform_1(%arg0: i32) -> (i32, i32) {
    %c0_i32 = arith.constant 0 : i32
    %c0_i32_0 = arith.constant 0 : i32
    %c0_i32_1 = arith.constant 0 : i32
    return %c0_i32, %c0_i32_0 : i32, i32
  }
  func.func @transform_2(%arg0: i32) -> (i32, i32) {
    %c0_i32 = arith.constant 0 : i32
    %c0_i32_0 = arith.constant 0 : i32
    %c0_i32_1 = arith.constant 0 : i32
    return %c0_i32, %c0_i32_0 : i32, i32
  }
  func.func @transform_3(%arg0: i32) -> (i32, i32) {
    %c0_i32 = arith.constant 0 : i32
    %c0_i32_0 = arith.constant 0 : i32
    %c0_i32_1 = arith.constant 0 : i32
    return %c0_i32, %c0_i32_0 : i32, i32
  }
  func.func @transform_4(%arg0: i32) -> (i32, i32) {
    %c0_i32 = arith.constant 0 : i32
    %c0_i32_0 = arith.constant 0 : i32
    %c0_i32_1 = arith.constant 0 : i32
    return %c0_i32, %c0_i32_0 : i32, i32
  }
  func.func @transform_5(%arg0: i32) -> (i32, i32, i32) {
    %c0_i32 = arith.constant 0 : i32
    %c0_i32_0 = arith.constant 0 : i32
    %c0_i32_1 = arith.constant 0 : i32
    return %arg0, %c0_i32, %c0_i32_0 : i32, i32, i32
  }
}

</mosaic_0001>

<bundles_post_ra>
// kernel: conv_layer_forward.1
= control target key start
LH: loop header
LB: loop body
LE: loop exit
PB: predicated region body
PF: predicated region fallthrough
CT: control target
= control target key end

     0   :  { %s4673_s18 = smov 0   ;;  %s6113_s0 = inlined_call_operand.vmem [shape: bf16[2,16,16,4], index: 0, kind: input, shape index: {}]   ;;  %s6114_s1 = inlined_call_operand.vmem [shape: bf16[4,36], index: 1, kind: input, shape index: {}]   ;;  %s6115_s2 = inlined_call_operand.vmem [shape: f32[4,1], index: 2, kind: input, shape index: {}]   ;;  %s6116_s3 = inlined_call_operand.vmem [shape: f32[4,1], index: 3, kind: input, shape index: {}]   ;;  %s6117_s4 = inlined_call_operand.vmem [shape: f32[4,1], index: 4, kind: input, shape index: {}]   ;;  %s6118_s5 = inlined_call_operand.vmem [shape: f32[2,4,256], index: 5, kind: output, shape index: {}]  }
   0x1 LB: > { %s4451_s19 = sadd.s32 4294967295, %s4632_s18   ;;  %p4455_p0 = scmp.ge.s32.totalorder %s4632_s18, 1  ;;  %s4632_s18 = sphi %s4673_s18, %s15_s18  }
   0x2   : > { %p187_p1 = scmp.lt.s32.totalorder %s4632_s18, 3 }
   0x4   : > { %p188_p2 = pnand %p4455_p0, %p187_p1 }
   0x5   : > { %p215_p3 = scmp.lt.s32.totalorder (!%p188_p2), %s4451_s19, 1  ;;  %s4634_s24 = smov (!%p188_p2), 4  }
   0x6   : > { %191 = sbr.rel (%p188_p2) target bundleno = 965 (0x3c5), region = 40  ;;  %s4635_s25 = smov (!%p188_p2), 8  }
   0x7   : > { %s4636_s26 = smov (!%p188_p2), 12   ;;  %s4637_s27 = smov (!%p188_p2), 16  }
   0x8   : > { %s4638_s28 = smov (!%p188_p2), 20   ;;  %s4639_s29 = smov (!%p188_p2), 24  }
   0x9   : > { %s4640_s30 = smov (!%p188_p2), 28   ;;  %s4641_s6 = smov (!%p188_p2), 32  }
   0xb   : > { %s6132_s19 = smov (!%p215_p3, %s4451_s19), 1  ;;  %vm258_vm0 = vsmask.f32 256  ;;  %vm259_vm1 = vsmask.f32 4368  ;;  %vm582_vm2 = vcmask 27648  }
   0xc   : > { %s4563_s20 = sshll.u32 %s6132_s19, 7  ;;  %vm583_vm3 = vsmask.f32 7938  ;;  %vm590_vm4 = vcmask 24576   ;;  %v704_v8 = vld [vmem:[#allocation2 + $0x8] sm:$0x1]  ;;  %vm4700_vm5 = vmor %vm258_vm0, %vm259_vm1 }
   0xd   : > { %s4687_s23 = scalar_lea.vmem %s6113_s0, %s4563_s20  ;;  %v592_v18 = vld [vmem:[#allocation2 + $0x14] sm:$0x1]  ;;  %v700_v19 = vld [vmem:[#allocation2] sm:$0xf]  ;;  %vm4709_vm6 = vmand %vm590_vm4, %vm258_vm0  ;;  %vm1116_vm9 = vsmask.f32 3328 }
   0xe   : > { %v228_v0 = vld [vmem:[%s4687_s23 + $0x8] sm:$0xf]  ;;  %v229_v1 = vld [vmem:[%s4687_s23 + $0xc] sm:$0xf]  ;;  %v4692_v2 = vld [vmem:[%s4687_s23] sm:$0xf] }
   0xf   : > { %v279_v3 = vshrl.u32 %v228_v0, 16  ;;  %v287_v4 = vshrl.u32 %v229_v1, 16  ;;  %v290_v5 = vshll.u32 %v229_v1, 16  ;;  %v227_v6 = vld [vmem:[%s4687_s23 + $0x4] sm:$0xf]  ;;  %v262_v7 = vshrl.u32 %v4692_v2, 16  ;;  %vm4716_vm7 = vmand %vm582_vm2, %vm583_vm3 }
  0x10   : > { %v270_v9 = vshrl.u32 %v227_v6, 16  ;;  %v273_v10 = vshll.u32 %v227_v6, 16  ;;  %v282_v11 = vshll.u32 %v228_v0, 16  ;;  %v230_v12 = vld [vmem:[%s4687_s23 + $0x10] sm:$0xf]  ;;  %v265_v13 = vshll.u32 %v4692_v2, 16  ;;  %vm4764_vm8 = vmand %vm590_vm4, %vm583_vm3 }
  0x11   : > { %v281_v15 = vrot.slane %v279_v3, 7  ;;  %v289_v16 = vrot.slane %v287_v4, 7  ;;  %v4704_v17 = vrot.slane %v262_v7, 7  ;;  %v231_v20 = vld [vmem:[%s4687_s23 + $0x14] sm:$0xf]  ;;  %v296_v21 = vshrl.u32 %v230_v12, 16 }
  0x12   : > { %v272_v23 = vrot.slane %v270_v9, 7  ;;  %v599_v24 = vld [vmem:[#allocation2 + $0x20] sm:$0x1]  ;;  %v304_v25 = vshrl.u32 %v231_v20, 16  ;;  %v307_v26 = vshll.u32 %v231_v20, 16  ;;  %v299_v27 = vshll.u32 %v230_v12, 16 }
  0x13   : > { %v285_v28 = vrot.slane %v281_v15, 4  ;;  %v292_v29 = vor.u32 %v290_v5, %v289_v16  ;;  %v294_v30 = vrot.slane %v289_v16, 4  ;;  %v268_v31 = vrot.slane %v4704_v17, 4  ;;  %v595_v33 = vld [vmem:[#allocation2 + $0x18] sm:$0xf]  ;;  %s4564_s15 = sshll.u32 %s6132_s19, 3 }
  0x14   : > { %v275_v34 = vor.u32 %v273_v10, %v272_v23  ;;  %v277_v35 = vrot.slane %v272_v23, 4  ;;  %v284_v36 = vor.u32 %v282_v11, %v281_v15  ;;  %v298_v37 = vrot.slane %v296_v21, 7  ;;  %v232_v42 = vld [vmem:[%s4687_s23 + $0x18] sm:$0xf]  ;;  %v233_v43 = vld [vmem:[%s4687_s23 + $0x1c] sm:$0xf]  ;;  %s224_s20 = scalar_lea.vmem %s6118_s5, %s4564_s15 }
  0x15   : > { %v293_v38 = vsel %vm4700_vm5, %v285_v28, %v292_v29  ;;  %v705_v39 = vsel %vm4709_vm6, %v294_v30, %v704_v8  ;;  %v600_v40 = vsel %vm4709_vm6, %v294_v30, %v599_v24  ;;  %v306_v41 = vrot.slane %v304_v25, 7  ;;  %v606_v48 = vld [vmem:[#allocation2 + $0x2c] sm:$0x1]  ;;  %v602_v49 = vld [vmem:[#allocation2 + $0x24] sm:$0xf] }
  0x16   : > { %703 = vst.msk [vmem:[#allocation2 + $0x4] sm:$0xf] %vm582_vm2, %v293_v38  ;;  %706 = vst [vmem:[#allocation2 + $0x8] sm:$0x1] %v705_v39  ;;  %v276_v44 = vsel %vm4700_vm5, %v268_v31, %v275_v34  ;;  %v593_v45 = vsel %vm4709_vm6, %v277_v35, %v592_v18  ;;  %v701_v46 = vsel %vm4716_vm7, %v284_v36, %v700_v19  ;;  %v234_v50 = vld [vmem:[%s4687_s23 + $0x20] sm:$0xf] }
  0x17   : > { %598 = vst.msk [vmem:[#allocation2 + $0x1c] sm:$0xf] %vm582_vm2, %v293_v38  ;;  %601 = vst [vmem:[#allocation2 + $0x20] sm:$0x1] %v600_v40  ;;  %v596_v47 = vsel %vm4716_vm7, %v284_v36, %v595_v33  ;;  %v302_v51 = vrot.slane %v298_v37, 4  ;;  %v309_v52 = vor.u32 %v307_v26, %v306_v41  ;;  %v311_v53 = vrot.slane %v306_v41, 4 }
  0x18   : > { %589 = vst.msk [vmem:[#allocation2 + $0x10] sm:$0xf] %vm582_vm2, %v276_v44  ;;  %594 = vst [vmem:[#allocation2 + $0x14] sm:$0x1] %v593_v45  ;;  %v301_v54 = vor.u32 %v299_v27, %v298_v37  ;;  %v4741_v55 = vld [vmem:[%s4687_s23 + $0x24] sm:$0xf] }
  0x19   : > { %702 = vst [vmem:[#allocation2] sm:$0xf] %v701_v46  ;;  %597 = vst [vmem:[#allocation2 + $0x18] sm:$0xf] %v596_v47  ;;  %v4744_v56 = vld [vmem:[%s4687_s23 + $0x28] sm:$0xf]  ;;  %v310_v62 = vsel %vm4700_vm5, %v302_v51, %v309_v52  ;;  %v607_v63 = vsel %vm4709_vm6, %v311_v53, %v606_v48 }
  0x1a   : > { %v313_v57 = vshrl.u32 %v232_v42, 16  ;;  %v321_v58 = vshrl.u32 %v233_v43, 16  ;;  %v324_v59 = vshll.u32 %v233_v43, 16  ;;  %v316_v60 = vshll.u32 %v232_v42, 16  ;;  %v4747_v61 = vld [vmem:[%s4687_s23 + $0x2c] sm:$0xf] }
  0x1b   : > { %v603_v0 = vsel %vm4716_vm7, %v301_v54, %v602_v49  ;;  %v330_v1 = vshrl.u32 %v234_v50, 16  ;;  %605 = vst.msk [vmem:[#allocation2 + $0x28] sm:$0xf] %vm582_vm2, %v310_v62  ;;  %608 = vst [vmem:[#allocation2 + $0x2c] sm:$0x1] %v607_v63  ;;  %v338_v5 = vshrl.u32 %v4741_v55, 16 }
  0x1c   : > { %604 = vst [vmem:[#allocation2 + $0x24] sm:$0xf] %v603_v0  ;;  %v315_v3 = vrot.slane %v313_v57, 7  ;;  %v323_v4 = vrot.slane %v321_v58, 7  ;;  %v341_v6 = vshll.u32 %v4741_v55, 16  ;;  %v333_v9 = vshll.u32 %v234_v50, 16 }
  0x1d   : > { %v613_v7 = vld [vmem:[#allocation2 + $0x38] sm:$0x1]  ;;  %v4758_v8 = vrot.slane %v330_v1, 7  ;;  %v347_v10 = vshrl.u32 %v4744_v56, 16  ;;  %v355_v11 = vshrl.u32 %v4747_v61, 16  ;;  %vm1728_vm12 = vcmask 1042432  }
  0x1e   : > { %v319_v15 = vrot.slane %v315_v3, 4  ;;  %v326_v16 = vor.u32 %v324_v59, %v323_v4  ;;  %v328_v18 = vrot.slane %v323_v4, 4  ;;  %v318_v19 = vor.u32 %v316_v60, %v315_v3  ;;  %v609_v20 = vld [vmem:[#allocation2 + $0x30] sm:$0xf]  ;;  %v616_v21 = vld [vmem:[#allocation2 + $0x3c] sm:$0xf] }
  0x1f   : > { %v859_v23 = vld [vmem:[#allocation2 + $0x4] sm:$0x8]  ;;  %v950_v24 = vld [vmem:[#allocation2 + $0x8] sm:$0x1]  ;;  %v335_v26 = vor.u32 %v333_v9, %v4758_v8  ;;  %v860_v30 = vld [vmem:[#allocation2 + $0x10] sm:$0x8] }
  0x20   : > { %v1069_v25 = vld [vmem:[#allocation2 + $0x4] sm:$0xf]  ;;  %v4478_v27 = vrot.slane %v859_v23, 11  ;;  %v327_v31 = vsel %vm4700_vm5, %v319_v15, %v326_v16  ;;  %vm1117_vm10 = vsmask.f32 7440  ;;  %v4479_v33 = vrot.slane %v860_v30, 11 }
  0x21   : > { %v1129_v28 = vshll.u32 %v1069_v25, 16  ;;  %v1133_v29 = vshrl.u32 %v1069_v25, 16  ;;  %v953_v34 = vld [vmem:[#allocation2 + $0x14] sm:$0x1]  ;;  %v1072_v35 = vld [vmem:[#allocation2 + $0x10] sm:$0xf]  ;;  %v614_v36 = vsel %vm4709_vm6, %v328_v18, %v613_v7  ;;  %v610_v37 = vsel %vm4716_vm7, %v318_v19, %v609_v20  ;;  %vm4812_vm11 = vmor %vm1116_vm9, %vm1117_vm10 }
  0x22   : > { %612 = vst.msk [vmem:[#allocation2 + $0x34] sm:$0xf] %vm582_vm2, %v327_v31  ;;  %v336_v38 = vrot.slane %v4758_v8, 4  ;;  %v951_v39 = vsel %vm4764_vm8, %v4478_v27, %v950_v24  ;;  %v1153_v42 = vshll.u32 %v1072_v35, 16  ;;  %v715_v43 = vld [vmem:[#allocation2] sm:$0x2]  ;;  %v954_v44 = vsel %vm4764_vm8, %v4479_v33, %v953_v34 }
  0x23   : > { %v4779_v40 = vrot.slane %v1129_v28, 5  ;;  %v1135_v41 = vrot.slane %v1133_v29, 4  ;;  %615 = vst [vmem:[#allocation2 + $0x38] sm:$0x1] %v614_v36  ;;  %611 = vst [vmem:[#allocation2 + $0x30] sm:$0xf] %v610_v37  ;;  %v617_v49 = vsel %vm4716_vm7, %v335_v26, %v616_v21 }
  0x24   : > { %952 = vst [vmem:[#allocation2 + $0x8] sm:$0x1] %v951_v39  ;;  %v1157_v45 = vshrl.u32 %v1072_v35, 16  ;;  %v4460_v46 = vrot.slane %v715_v43, 9  ;;  %v805_v47 = vld [vmem:[#allocation2] sm:$0x1] }
  0x25   : > { %v861_v48 = vld [vmem:[#allocation2 + $0x1c] sm:$0x8]  ;;  %v1136_v50 = vor.u32 %v1135_v41, %v4779_v40  ;;  %955 = vst [vmem:[#allocation2 + $0x14] sm:$0x1] %v954_v44  ;;  %v4786_v51 = vrot.slane %v1153_v42, 5  ;;  %v4802_v35 = vrot.slane %v338_v5, 7 }
  0x26   : > { %v4480_v52 = vrot.slane %v861_v48, 11  ;;  %v956_v53 = vld [vmem:[#allocation2 + $0x20] sm:$0x1]  ;;  %v1075_v54 = vld [vmem:[#allocation2 + $0x1c] sm:$0xf]  ;;  %v1159_v57 = vrot.slane %v1157_v45, 4  ;;  %v806_v58 = vsel %vm4709_vm6, %v4460_v46, %v805_v47 }
  0x27   : > { %618 = vst [vmem:[#allocation2 + $0x3c] sm:$0xf] %v617_v49  ;;  %v1177_v59 = vshll.u32 %v1075_v54, 16  ;;  %v1181_v60 = vshrl.u32 %v1075_v54, 16  ;;  %v717_v62 = vld [vmem:[#allocation2 + $0x18] sm:$0x2] }
  0x28   : > { %v1137_v63 = vrot.slane %v1136_v50, 4  ;;  %807 = vst [vmem:[#allocation2] sm:$0x1] %v806_v58  ;;  %v957_v0 = vsel %vm4764_vm8, %v4480_v52, %v956_v53  ;;  %v4462_v1 = vrot.slane %v717_v62, 9  ;;  %v811_v3 = vld [vmem:[#allocation2 + $0x18] sm:$0x1]  ;;  %v1160_v7 = vor.u32 %v1159_v57, %v4786_v51 }
  0x29   : > { %v862_v4 = vld [vmem:[#allocation2 + $0x28] sm:$0x8]  ;;  %958 = vst [vmem:[#allocation2 + $0x20] sm:$0x1] %v957_v0  ;;  %v4793_v9 = vrot.slane %v1177_v59, 5  ;;  %v1183_v15 = vrot.slane %v1181_v60, 4 }
  0x2a   : > { %v4481_v16 = vrot.slane %v862_v4, 11  ;;  %v959_v18 = vld [vmem:[#allocation2 + $0x2c] sm:$0x1]  ;;  %v812_v19 = vsel %vm4709_vm6, %v4462_v1, %v811_v3  ;;  %v1078_v20 = vld [vmem:[#allocation2 + $0x28] sm:$0xf]  ;;  %v1161_v24 = vrot.slane %v1160_v7, 4 }
  0x2b   : > { %v718_v21 = vld [vmem:[#allocation2 + $0x24] sm:$0x2]  ;;  %v814_v23 = vld [vmem:[#allocation2 + $0x24] sm:$0x1]  ;;  %v1184_v25 = vor.u32 %v1183_v15, %v4793_v9  ;;  %813 = vst [vmem:[#allocation2 + $0x18] sm:$0x1] %v812_v19 }
  0x2c   : > { %v960_v26 = vsel %vm4764_vm8, %v4481_v16, %v959_v18  ;;  %v1201_v27 = vshll.u32 %v1078_v20, 16  ;;  %v863_v28 = vld [vmem:[#allocation2 + $0x34] sm:$0x8]  ;;  %v962_v29 = vld [vmem:[#allocation2 + $0x38] sm:$0x1]  ;;  %v1205_v31 = vshrl.u32 %v1078_v20, 16 }
  0x2d   : > { %v1070_v30 = vld [vmem:[#allocation2 + $0x8] sm:$0x1]  ;;  %961 = vst [vmem:[#allocation2 + $0x2c] sm:$0x1] %v960_v26  ;;  %v4463_v33 = vrot.slane %v718_v21, 9  ;;  %v4482_v34 = vrot.slane %v863_v28, 11 }
  0x2e   : > { %v1139_v36 = vshll.u32 %v1070_v30, 16  ;;  %v1073_v37 = vld [vmem:[#allocation2 + $0x14] sm:$0x1]  ;;  %v1185_v39 = vrot.slane %v1184_v25, 4  ;;  %v4804_v41 = vrot.slane %v1201_v27, 5  ;;  %v4808_v42 = vrot.slane %v347_v10, 7 }
  0x2f   : > { %v1163_v44 = vshll.u32 %v1073_v37, 16  ;;  %v1207_v45 = vrot.slane %v1205_v31, 4  ;;  %v815_v5 = vsel %vm4709_vm6, %v4463_v33, %v814_v23  ;;  %v963_v46 = vsel %vm4764_vm8, %v4482_v34, %v962_v29  ;;  %v1081_v47 = vld [vmem:[#allocation2 + $0x34] sm:$0xf]  ;;  %v719_v48 = vld [vmem:[#allocation2 + $0x30] sm:$0x2] }
  0x30   : > { %v1141_v49 = vrot.slane %v1139_v36, 5  ;;  %v1068_v50 = vld [vmem:[#allocation2] sm:$0xf]  ;;  %816 = vst [vmem:[#allocation2 + $0x24] sm:$0x1] %v815_v5  ;;  %v1225_v10 = vshll.u32 %v1081_v47, 16 }
  0x31   : > { %964 = vst [vmem:[#allocation2 + $0x38] sm:$0x1] %v963_v46  ;;  %v1229_v52 = vshrl.u32 %v1081_v47, 16  ;;  %v4464_v53 = vrot.slane %v719_v48, 9  ;;  %v1165_v54 = vrot.slane %v1163_v44, 5  ;;  %v1120_v57 = vshrl.u32 %v1068_v50, 16 }
  0x32   : > { %v1123_v58 = vshll.u32 %v1068_v50, 16  ;;  %v1076_v59 = vld [vmem:[#allocation2 + $0x20] sm:$0x1]  ;;  %v1208_v60 = vor.u32 %v1207_v45, %v4804_v41  ;;  %v1142_v62 = vsel %vm4812_vm11, %v1137_v63, %v1141_v49  ;;  %v4823_v1 = vrot.slane %v1225_v10, 5  ;;  %v817_v4 = vld [vmem:[#allocation2 + $0x30] sm:$0x1] }
  0x33   : > { %v1187_v0 = vshll.u32 %v1076_v59, 16  ;;  %v1231_v3 = vrot.slane %v1229_v52, 4  ;;  %1505 = vrot.lane.b32.xlu0 %v1142_v62, %s4634_s24  ;;  %v1166_v7 = vsel %vm4812_vm11, %v1161_v24, %v1165_v54  ;;  %v1122_v15 = vrot.slane %v1120_v57, 4  ;;  %v1074_v18 = vld [vmem:[#allocation2 + $0x18] sm:$0xf] }
  0x34   : > { %v1125_v16 = vrot.slane %v1123_v58, 5  ;;  %v1209_v19 = vrot.slane %v1208_v60, 4  ;;  %1509 = vrot.lane.b32.xlu1 %v1166_v7, %s4634_s24  ;;  %v1168_v21 = vshrl.u32 %v1074_v18, 16  ;;  %v1171_v63 = vshll.u32 %v1074_v18, 16  ;;  %v1079_v23 = vld [vmem:[#allocation2 + $0x2c] sm:$0x1] }
  0x35   : > { %v1189_v20 = vrot.slane %v1187_v0, 5  ;;  %v1232_v25 = vor.u32 %v1231_v3, %v4823_v1  ;;  %v1211_v27 = vshll.u32 %v1079_v23, 16  ;;  %v818_v28 = vsel %vm4709_vm6, %v4464_v53, %v817_v4  ;;  %v620_v34 = vld [vmem:[#allocation2 + $0x44] sm:$0x1]  ;;  %v720_v36 = vld [vmem:[#allocation2 + $0x3c] sm:$0x2] }
  0x36   : > { %v1126_v26 = vor.u32 %v1125_v16, %v1122_v15  ;;  %v343_v24 = vor.u32 %v341_v6, %v4802_v35  ;;  %v1170_v30 = vrot.slane %v1168_v21, 4  ;;  %v1173_v31 = vrot.slane %v1171_v63, 5  ;;  %819 = vst [vmem:[#allocation2 + $0x30] sm:$0x1] %v818_v28  ;;  %v820_v49 = vld [vmem:[#allocation2 + $0x3c] sm:$0x1] }
  0x37   : > { %v1190_v29 = vsel %vm4812_vm11, %v1185_v39, %v1189_v20  ;;  %v1233_v33 = vrot.slane %v1232_v25, 4  ;;  %v1213_v44 = vrot.slane %v1211_v27, 5  ;;  %v1077_v45 = vld [vmem:[#allocation2 + $0x24] sm:$0xf]  ;;  %v4844_v6 = vor.u32 %v265_v13, %v4704_v17  ;;  %v4855_v17 = vld [vmem:[%s4687_s23 + $0x30] sm:$0xf] }
  0x38   : > { %v1127_v37 = vrot.slane %v1126_v26, 4  ;;  %v1082_v5 = vld [vmem:[#allocation2 + $0x38] sm:$0x1]  ;;  %v344_v55 = vsel %vm4700_vm5, %v336_v38, %v343_v24  ;;  %1513 = vrot.lane.b32.xlu1 %v1190_v29, %s4634_s24  ;;  %v1174_v39 = vor.u32 %v1173_v31, %v1170_v30  ;;  %v1192_v46 = vshrl.u32 %v1077_v45, 16  ;;  %v4859_v54 = vld [vmem:[%s4687_s23 + $0x34] sm:$0xf] }
  0x39   : > { %v1195_v47 = vshll.u32 %v1077_v45, 16  ;;  %v1235_v48 = vshll.u32 %v1082_v5, 16  ;;  %619 = vst.msk [vmem:[#allocation2 + $0x40] sm:$0xf] %vm582_vm2, %v344_v55  ;;  %v1214_v38 = vsel %vm4812_vm11, %v1209_v19, %v1213_v44  ;;  %v345_v2 = vrot.slane %v4802_v35, 4 }
  0x3a   : > { %v1132_v8 = vsel %vm4812_vm11, %v1127_v37, %v4779_v40  ;;  %v4465_v13 = vrot.slane %v720_v36, 9  ;;  %v1175_v50 = vrot.slane %v1174_v39, 4  ;;  %v1194_v10 = vrot.slane %v1192_v46, 4  ;;  %v627_v3 = vld [vmem:[#allocation2 + $0x50] sm:$0x1] }
  0x3b   : > { %1503 = vrot.lane.b32.xlu0 %v1132_v8, %s4634_s24  ;;  %v1197_v52 = vrot.slane %v1195_v47, 5  ;;  %v1237_v53 = vrot.slane %v1235_v48, 5  ;;  %v621_v57 = vsel %vm4709_vm6, %v345_v2, %v620_v34  ;;  %v353_v58 = vrot.slane %v4808_v42, 4  ;;  %v623_v21 = vld [vmem:[#allocation2 + $0x48] sm:$0xf] }
  0x3c   : > { %v821_v40 = vsel %vm4709_vm6, %v4465_v13, %v820_v49  ;;  %v357_v35 = vrot.slane %v355_v11, 7  ;;  %v1180_v59 = vsel %vm4812_vm11, %v1175_v50, %v4793_v9  ;;  %1517 = vrot.lane.b32.xlu1 %v1214_v38, %s4634_s24  ;;  %622 = vst [vmem:[#allocation2 + $0x44] sm:$0x1] %v621_v57  ;;  %v358_v0 = vshll.u32 %v4747_v61, 16  ;;  %v585_v30 = vld [vmem:[#allocation2 + $0xc] sm:$0xf] }
  0x3d   : > { %v1198_v60 = vor.u32 %v1197_v52, %v1194_v10  ;;  %v1238_v62 = vsel %vm4812_vm11, %v1233_v33, %v1237_v53  ;;  %822 = vst [vmem:[#allocation2 + $0x3c] sm:$0x1] %v821_v40  ;;  %v1080_v4 = vld [vmem:[#allocation2 + $0x30] sm:$0xf]  ;;  %v350_v15 = vshll.u32 %v4744_v56, 16  ;;  %v364_v11 = vshrl.u32 %v4855_v17, 16 }
  0x3e   : > { %v362_v7 = vrot.slane %v357_v35, 4  ;;  %v372_v16 = vshrl.u32 %v4859_v54, 16  ;;  %v1216_v18 = vshrl.u32 %v1080_v4, 16  ;;  %v1219_v19 = vshll.u32 %v1080_v4, 16  ;;  %v634_v36 = vld [vmem:[#allocation2 + $0x5c] sm:$0x1] }
  0x3f   : > { %1511 = vrot.lane.b32.xlu0 %v1180_v59, %s4634_s24  ;;  %v1199_v9 = vrot.slane %v1198_v60, 4  ;;  %v360_v20 = vor.u32 %v358_v0, %v357_v35  ;;  %v352_v25 = vor.u32 %v350_v15, %v4808_v42  ;;  %v366_v26 = vrot.slane %v364_v11, 7  ;;  %v240_v5 = vld [vmem:[%s4687_s23 + $0x38] sm:$0xf]  ;;  %v241_v13 = vld [vmem:[%s4687_s23 + $0x3c] sm:$0xf] }
  0x40   : > { %v864_v63 = vld [vmem:[#allocation2 + $0x40] sm:$0x8]  ;;  %v628_v61 = vsel %vm4709_vm6, %v362_v7, %v627_v3  ;;  %v374_v56 = vrot.slane %v372_v16, 7  ;;  %1521 = vrot.lane.b32.xlu1 %v1238_v62, %s4634_s24  ;;  %v1218_v28 = vrot.slane %v1216_v18, 4  ;;  %v1221_v24 = vrot.slane %v1219_v19, 5 }
  0x41   : > { %v1084_v23 = vld [vmem:[#allocation2 + $0x40] sm:$0xf]  ;;  %v1204_v27 = vsel %vm4812_vm11, %v1199_v9, %v4804_v41  ;;  %v4483_v29 = vrot.slane %v864_v63, 11  ;;  %629 = vst [vmem:[#allocation2 + $0x50] sm:$0x1] %v628_v61  ;;  %v361_v34 = vsel %vm4700_vm5, %v353_v58, %v360_v20  ;;  %v624_v42 = vsel %vm4716_vm7, %v352_v25, %v623_v21 }
  0x42   : > { %v1249_v31 = vshll.u32 %v1084_v23, 16  ;;  %v1253_v33 = vshrl.u32 %v1084_v23, 16  ;;  %v1222_v41 = vor.u32 %v1221_v24, %v1218_v28  ;;  %626 = vst.msk [vmem:[#allocation2 + $0x4c] sm:$0xf] %vm582_vm2, %v361_v34  ;;  %625 = vst [vmem:[#allocation2 + $0x48] sm:$0xf] %v624_v42  ;;  %v586_v48 = vsel %vm4716_vm7, %v4844_v6, %v585_v30 }
  0x43   : > { %1515 = vrot.lane.b32.xlu0 %v1204_v27, %s4634_s24  ;;  %v370_v37 = vrot.slane %v366_v26, 4  ;;  %v375_v44 = vshll.u32 %v4859_v54, 16  ;;  %v379_v45 = vrot.slane %v374_v56, 4  ;;  %v965_v55 = vld [vmem:[#allocation2 + $0x44] sm:$0x1]  ;;  %v367_v53 = vshll.u32 %v4855_v17, 16 }
  0x44   : > { %v1251_v39 = vrot.slane %v1249_v31, 5  ;;  %v1255_v46 = vrot.slane %v1253_v33, 4  ;;  %v1083_v47 = vld [vmem:[#allocation2 + $0x3c] sm:$0xf]  ;;  %v1223_v49 = vrot.slane %v1222_v41, 4  ;;  %v966_v8 = vsel %vm4764_vm8, %v4483_v29, %v965_v55 }
  0x45   : > { %v1240_v38 = vshrl.u32 %v1083_v47, 16  ;;  %v1243_v2 = vshll.u32 %v1083_v47, 16  ;;  %587 = vst [vmem:[#allocation2 + $0xc] sm:$0xf] %v586_v48  ;;  %967 = vst [vmem:[#allocation2 + $0x44] sm:$0x1] %v966_v8  ;;  %v377_v10 = vor.u32 %v375_v44, %v374_v56  ;;  %v635_v52 = vsel %vm4709_vm6, %v379_v45, %v634_v36 }
  0x46   : > { %v1256_v50 = vor.u32 %v1255_v46, %v1251_v39  ;;  %v1228_v6 = vsel %vm4812_vm11, %v1223_v49, %v4823_v1  ;;  %636 = vst [vmem:[#allocation2 + $0x5c] sm:$0x1] %v635_v52  ;;  %v630_v40 = vld [vmem:[#allocation2 + $0x54] sm:$0xf]  ;;  %v381_v58 = vshrl.u32 %v240_v5, 16  ;;  %v369_v60 = vor.u32 %v367_v53, %v366_v26 }
  0x47   : > { %v1242_v54 = vrot.slane %v1240_v38, 4  ;;  %v1245_v57 = vrot.slane %v1243_v2, 5  ;;  %1519 = vrot.lane.b32.xlu0 %v1228_v6, %s4634_s24  ;;  %v378_v59 = vsel %vm4700_vm5, %v370_v37, %v377_v10  ;;  %v389_v62 = vshrl.u32 %v241_v13, 16  ;;  %v637_v9 = vld [vmem:[#allocation2 + $0x60] sm:$0xf] }
  0x48   : > { %v4907_v35 = vrot.slane %v1256_v50, 4  ;;  %v968_v0 = vld [vmem:[#allocation2 + $0x50] sm:$0x1]  ;;  %633 = vst.msk [vmem:[#allocation2 + $0x58] sm:$0xf] %vm582_vm2, %v378_v59  ;;  %v383_v1 = vrot.slane %v381_v58, 7  ;;  %v631_v16 = vsel %vm4716_vm7, %v369_v60, %v630_v40 }
  0x49   : > { %v1246_v17 = vor.u32 %v1245_v57, %v1242_v54  ;;  %v392_v3 = vshll.u32 %v241_v13, 16  ;;  %v384_v4 = vshll.u32 %v240_v5, 16  ;;  %v865_v7 = vld [vmem:[#allocation2 + $0x4c] sm:$0x8]  ;;  %v721_v11 = vld [vmem:[#allocation2 + $0x48] sm:$0x2] }
  0x4a   : > { %v1087_v15 = vld [vmem:[#allocation2 + $0x4c] sm:$0xf]  ;;  %v4915_v18 = vld [vmem:[%s4687_s23 + $0x40] sm:$0xf]  ;;  %v4484_v20 = vrot.slane %v865_v7, 11  ;;  %v4466_v61 = vrot.slane %v721_v11, 9 }
  0x4b   : > { %v1247_v19 = vrot.slane %v1246_v17, 4  ;;  %v1273_v21 = vshll.u32 %v1087_v15, 16  ;;  %v1277_v63 = vshrl.u32 %v1087_v15, 16  ;;  %v823_v23 = vld [vmem:[#allocation2 + $0x48] sm:$0x1]  ;;  %v387_v25 = vrot.slane %v383_v1, 4 }
  0x4c   : > { %632 = vst [vmem:[#allocation2 + $0x54] sm:$0xf] %v631_v16  ;;  %v391_v26 = vrot.slane %v389_v62, 7  ;;  %v386_v56 = vor.u32 %v384_v4, %v383_v1  ;;  %v243_v27 = vld [vmem:[%s4687_s23 + $0x44] sm:$0xf]  ;;  %v969_v29 = vsel %vm4764_vm8, %v4484_v20, %v968_v0  ;;  %v824_v42 = vsel %vm4709_vm6, %v4466_v61, %v823_v23 }
  0x4d   : > { %v1085_v28 = vld [vmem:[#allocation2 + $0x44] sm:$0x1]  ;;  %v1252_v24 = vsel %vm4812_vm11, %v1247_v19, %v1251_v39  ;;  %v4922_v30 = vrot.slane %v1273_v21, 5  ;;  %v1279_v31 = vrot.slane %v1277_v63, 4  ;;  %v641_v33 = vld [vmem:[#allocation2 + $0x68] sm:$0x1] }
  0x4e   : > { %v1259_v34 = vshll.u32 %v1085_v28, 16  ;;  %1523 = vrot.lane.b32.xlu0 %v1252_v24, %s4634_s24  ;;  %970 = vst [vmem:[#allocation2 + $0x50] sm:$0x1] %v969_v29  ;;  %v394_v36 = vor.u32 %v392_v3, %v391_v26  ;;  %v396_v41 = vrot.slane %v391_v26, 4  ;;  %825 = vst [vmem:[#allocation2 + $0x48] sm:$0x1] %v824_v42  ;;  %v638_v45 = vsel %vm4716_vm7, %v386_v56, %v637_v9 }
  0x4f   : > { %v1280_v37 = vor.u32 %v1279_v31, %v4922_v30  ;;  %v971_v44 = vld [vmem:[#allocation2 + $0x5c] sm:$0x1]  ;;  %v398_v5 = vshrl.u32 %v4915_v18, 16  ;;  %v406_v55 = vshrl.u32 %v243_v27, 16  ;;  %v866_v46 = vld [vmem:[#allocation2 + $0x58] sm:$0x8] }
  0x50   : > { %v1261_v39 = vrot.slane %v1259_v34, 5  ;;  %v1090_v47 = vld [vmem:[#allocation2 + $0x58] sm:$0xf]  ;;  %v395_v48 = vsel %vm4700_vm5, %v387_v25, %v394_v36  ;;  %v642_v49 = vsel %vm4709_vm6, %v396_v41, %v641_v33  ;;  %639 = vst [vmem:[#allocation2 + $0x60] sm:$0xf] %v638_v45  ;;  %v409_v8 = vshll.u32 %v243_v27, 16 }
  0x51   : > { %v4936_v38 = vld [vmem:[%s4687_s23 + $0x48] sm:$0xf]  ;;  %v1281_v2 = vrot.slane %v1280_v37, 4  ;;  %v4485_v13 = vrot.slane %v866_v46, 11  ;;  %v1297_v50 = vshll.u32 %v1090_v47, 16  ;;  %v1301_v10 = vshrl.u32 %v1090_v47, 16 }
  0x52   : > { %640 = vst.msk [vmem:[#allocation2 + $0x64] sm:$0xf] %vm582_vm2, %v395_v48  ;;  %643 = vst [vmem:[#allocation2 + $0x68] sm:$0x1] %v642_v49  ;;  %v4940_v52 = vld [vmem:[%s4687_s23 + $0x4c] sm:$0xf]  ;;  %v1262_v53 = vsel %vm4812_vm11, %v4907_v35, %v1261_v39 }
  0x53   : > { %v722_v6 = vld [vmem:[#allocation2 + $0x54] sm:$0x2]  ;;  %v826_v54 = vld [vmem:[#allocation2 + $0x54] sm:$0x1]  ;;  %v400_v57 = vrot.slane %v398_v5, 7  ;;  %v408_v40 = vrot.slane %v406_v55, 7  ;;  %1525 = vrot.lane.b32.xlu1 %v1262_v53, %s4634_s24  ;;  %v972_v58 = vsel %vm4764_vm8, %v4485_v13, %v971_v44 }
  0x54   : > { %v4948_v59 = vrot.slane %v1297_v50, 5  ;;  %v1303_v60 = vrot.slane %v1301_v10, 4  ;;  %v4467_v62 = vrot.slane %v722_v6, 9  ;;  %v648_v17 = vld [vmem:[#allocation2 + $0x74] sm:$0x1]  ;;  %v401_v35 = vshll.u32 %v4915_v18, 16 }
  0x55   : > { %973 = vst [vmem:[#allocation2 + $0x5c] sm:$0x1] %v972_v58  ;;  %v404_v0 = vrot.slane %v400_v57, 4  ;;  %v411_v1 = vor.u32 %v409_v8, %v408_v40  ;;  %v413_v3 = vrot.slane %v408_v40, 4  ;;  %v1088_v4 = vld [vmem:[#allocation2 + $0x50] sm:$0x1] }
  0x56   : > { %v1304_v7 = vor.u32 %v1303_v60, %v4948_v59  ;;  %v827_v15 = vsel %vm4709_vm6, %v4467_v62, %v826_v54  ;;  %v644_v11 = vld [vmem:[#allocation2 + $0x6c] sm:$0xf]  ;;  %v415_v16 = vshrl.u32 %v4936_v38, 16  ;;  %v423_v9 = vshrl.u32 %v4940_v52, 16  ;;  %v1086_v20 = vld [vmem:[#allocation2 + $0x48] sm:$0xf] }
  0x57   : > { %v1283_v19 = vshll.u32 %v1088_v4, 16  ;;  %828 = vst [vmem:[#allocation2 + $0x54] sm:$0x1] %v827_v15  ;;  %v412_v21 = vsel %vm4700_vm5, %v404_v0, %v411_v1  ;;  %v649_v18 = vsel %vm4709_vm6, %v413_v3, %v648_v17  ;;  %v403_v63 = vor.u32 %v401_v35, %v400_v57  ;;  %v723_v26 = vld [vmem:[#allocation2 + $0x60] sm:$0x2] }
  0x58   : > { %v1264_v23 = vshrl.u32 %v1086_v20, 16  ;;  %v1267_v61 = vshll.u32 %v1086_v20, 16  ;;  %v1305_v25 = vrot.slane %v1304_v7, 4  ;;  %647 = vst.msk [vmem:[#allocation2 + $0x70] sm:$0xf] %vm582_vm2, %v412_v21  ;;  %v4961_v56 = vrot.slane %v415_v16, 7 }
  0x59   : > { %650 = vst [vmem:[#allocation2 + $0x74] sm:$0x1] %v649_v18  ;;  %v1285_v27 = vrot.slane %v1283_v19, 5  ;;  %v867_v28 = vld [vmem:[#allocation2 + $0x64] sm:$0x8]  ;;  %v4468_v29 = vrot.slane %v723_v26, 9  ;;  %v645_v31 = vsel %vm4716_vm7, %v403_v63, %v644_v11 }
  0x5a   : > { %v974_v24 = vld [vmem:[#allocation2 + $0x68] sm:$0x1]  ;;  %v4965_v33 = vld [vmem:[#allocation2 + $0xc] sm:$0x2]  ;;  %v1266_v34 = vrot.slane %v1264_v23, 4  ;;  %v1269_v42 = vrot.slane %v1267_v61, 5 }
  0x5b   : > { %v4486_v36 = vrot.slane %v867_v28, 11  ;;  %v1093_v41 = vld [vmem:[#allocation2 + $0x64] sm:$0xf]  ;;  %646 = vst [vmem:[#allocation2 + $0x6c] sm:$0xf] %v645_v31  ;;  %v421_v37 = vrot.slane %v4961_v56, 4  ;;  %v1286_v44 = vsel %vm4812_vm11, %v1281_v2, %v1285_v27 }
  0x5c   : > { %v1321_v45 = vshll.u32 %v1093_v41, 16  ;;  %v1325_v5 = vshrl.u32 %v1093_v41, 16  ;;  %v829_v55 = vld [vmem:[#allocation2 + $0x60] sm:$0x1]  ;;  %v425_v39 = vrot.slane %v423_v9, 7  ;;  %1529 = vrot.lane.b32.xlu1 %v1286_v44, %s4634_s24  ;;  %v1270_v46 = vor.u32 %v1269_v42, %v1266_v34 }
  0x5d   : > { %v1091_v47 = vld [vmem:[#allocation2 + $0x5c] sm:$0x1]  ;;  %v975_v48 = vsel %vm4764_vm8, %v4486_v36, %v974_v24  ;;  %v830_v49 = vsel %vm4709_vm6, %v4468_v29, %v829_v55  ;;  %v426_v8 = vshll.u32 %v4940_v52, 16  ;;  %v655_v53 = vld [vmem:[#allocation2 + $0x80] sm:$0x1]  ;;  %v418_v40 = vshll.u32 %v4936_v38, 16 }
  0x5e   : > { %v1307_v13 = vshll.u32 %v1091_v47, 16  ;;  %976 = vst [vmem:[#allocation2 + $0x68] sm:$0x1] %v975_v48  ;;  %v4976_v2 = vrot.slane %v1321_v45, 5  ;;  %v1327_v50 = vrot.slane %v1325_v5, 4  ;;  %v430_v10 = vrot.slane %v425_v39, 4 }
  0x5f   : > { %831 = vst [vmem:[#allocation2 + $0x60] sm:$0x1] %v830_v49  ;;  %v1271_v6 = vrot.slane %v1270_v46, 4  ;;  %v1089_v54 = vld [vmem:[#allocation2 + $0x54] sm:$0xf]  ;;  %v428_v57 = vor.u32 %v426_v8, %v425_v39  ;;  %v4461_v58 = vrot.slane %v4965_v33, 9 }
  0x60   : > { %v808_v60 = vld [vmem:[#allocation2 + $0xc] sm:$0x1]  ;;  %v246_v62 = vld [vmem:[%s4687_s23 + $0x50] sm:$0xf]  ;;  %v1309_v17 = vrot.slane %v1307_v13, 5  ;;  %v1288_v0 = vshrl.u32 %v1089_v54, 16  ;;  %v1328_v1 = vor.u32 %v1327_v50, %v4976_v2  ;;  %v656_v11 = vsel %vm4709_vm6, %v430_v10, %v655_v53 }
  0x61   : > { %v1291_v52 = vshll.u32 %v1089_v54, 16  ;;  %v868_v3 = vld [vmem:[#allocation2 + $0x70] sm:$0x8]  ;;  %v1276_v35 = vsel %vm4812_vm11, %v1271_v6, %v4922_v30  ;;  %v977_v7 = vld [vmem:[#allocation2 + $0x74] sm:$0x1]  ;;  %v429_v38 = vsel %vm4700_vm5, %v421_v37, %v428_v57  ;;  %v809_v28 = vsel %vm4709_vm6, %v4461_v58, %v808_v60 }
  0x62   : > { %v4487_v4 = vrot.slane %v868_v3, 11  ;;  %v1096_v15 = vld [vmem:[#allocation2 + $0x70] sm:$0xf]  ;;  %1527 = vrot.lane.b32.xlu0 %v1276_v35, %s4634_s24  ;;  %v1310_v16 = vsel %vm4812_vm11, %v1305_v25, %v1309_v17  ;;  %v1290_v9 = vrot.slane %v1288_v0, 4  ;;  %v1329_v20 = vrot.slane %v1328_v1, 4 }
  0x63   : > { %v1293_v19 = vrot.slane %v1291_v52, 5  ;;  %v724_v21 = vld [vmem:[#allocation2 + $0x6c] sm:$0x2]  ;;  %654 = vst.msk [vmem:[#allocation2 + $0x7c] sm:$0xf] %vm582_vm2, %v429_v38  ;;  %1533 = vrot.lane.b32.xlu1 %v1310_v16, %s4634_s24  ;;  %v1345_v18 = vshll.u32 %v1096_v15, 16  ;;  %v420_v25 = vor.u32 %v418_v40, %v4961_v56 }
  0x64   : > { %657 = vst [vmem:[#allocation2 + $0x80] sm:$0x1] %v656_v11  ;;  %v978_v30 = vsel %vm4764_vm8, %v4487_v4, %v977_v7  ;;  %v1349_v63 = vshrl.u32 %v1096_v15, 16  ;;  %v4469_v23 = vrot.slane %v724_v21, 9  ;;  %v832_v61 = vld [vmem:[#allocation2 + $0x6c] sm:$0x1] }
  0x65   : > { %v1294_v26 = vor.u32 %v1293_v19, %v1290_v9  ;;  %979 = vst [vmem:[#allocation2 + $0x74] sm:$0x1] %v978_v30  ;;  %v651_v27 = vld [vmem:[#allocation2 + $0x78] sm:$0xf]  ;;  %v432_v24 = vshrl.u32 %v246_v62, 16  ;;  %v4999_v33 = vrot.slane %v1345_v18, 5 }
  0x66   : > { %v1094_v29 = vld [vmem:[#allocation2 + $0x68] sm:$0x1]  ;;  %v1092_v31 = vld [vmem:[#allocation2 + $0x60] sm:$0xf]  ;;  %v1351_v34 = vrot.slane %v1349_v63, 4  ;;  %v833_v42 = vsel %vm4709_vm6, %v4469_v23, %v832_v61  ;;  %v652_v45 = vsel %vm4716_vm7, %v420_v25, %v651_v27  ;;  %v435_v39 = vshll.u32 %v246_v62, 16 }
  0x67   : > { %810 = vst [vmem:[#allocation2 + $0xc] sm:$0x1] %v809_v28  ;;  %v1295_v36 = vrot.slane %v1294_v26, 4  ;;  %v1331_v41 = vshll.u32 %v1094_v29, 16  ;;  %v1312_v37 = vshrl.u32 %v1092_v31, 16  ;;  %v1315_v44 = vshll.u32 %v1092_v31, 16 }
  0x68   : > { %834 = vst [vmem:[#allocation2 + $0x6c] sm:$0x1] %v833_v42  ;;  %v1352_v56 = vor.u32 %v1351_v34, %v4999_v33  ;;  %v247_v5 = vld [vmem:[%s4687_s23 + $0x54] sm:$0xf]  ;;  %v434_v55 = vrot.slane %v432_v24, 7  ;;  %vm1729_vm13 = vcmask 1046532  }
  0x69   : > { %v1300_v46 = vsel %vm4812_vm11, %v1295_v36, %v4948_v59  ;;  %v1333_v47 = vrot.slane %v1331_v41, 5  ;;  %v1314_v48 = vrot.slane %v1312_v37, 4  ;;  %v1317_v49 = vrot.slane %v1315_v44, 5  ;;  %653 = vst [vmem:[#allocation2 + $0x78] sm:$0xf] %v652_v45  ;;  %vm5169_vm14 = vmor %vm1728_vm12, %vm1729_vm13 }
  0x6a   : > { %v658_v8 = vld [vmem:[#allocation2 + $0x84] sm:$0xf]  ;;  %1531 = vrot.lane.b32.xlu0 %v1300_v46, %s4634_s24  ;;  %v1353_v13 = vrot.slane %v1352_v56, 4  ;;  %v869_v50 = vld [vmem:[#allocation2 + $0x7c] sm:$0x8]  ;;  %v437_v53 = vor.u32 %v435_v39, %v434_v55  ;;  %v438_v6 = vrot.slane %v434_v55, 4 }
  0x6b   : > { %v980_v10 = vld [vmem:[#allocation2 + $0x80] sm:$0x1]  ;;  %v1334_v54 = vsel %vm4812_vm11, %v1329_v20, %v1333_v47  ;;  %v1318_v57 = vor.u32 %v1317_v49, %v1314_v48  ;;  %v4488_v40 = vrot.slane %v869_v50, 11  ;;  %v1099_v58 = vld [vmem:[#allocation2 + $0x7c] sm:$0xf]  ;;  %v440_v60 = vshrl.u32 %v247_v5, 16 }
  0x6c   : > { %1537 = vrot.lane.b32.xlu1 %v1334_v54, %s4634_s24  ;;  %v1097_v59 = vld [vmem:[#allocation2 + $0x74] sm:$0x1]  ;;  %v1369_v62 = vshll.u32 %v1099_v58, 16  ;;  %v1373_v17 = vshrl.u32 %v1099_v58, 16  ;;  %v443_v0 = vshll.u32 %v247_v5, 16  ;;  %v659_v52 = vsel %vm4716_vm7, %v437_v53, %v658_v8 }
  0x6d   : > { %v1319_v1 = vrot.slane %v1318_v57, 4  ;;  %v1355_v3 = vshll.u32 %v1097_v59, 16  ;;  %v981_v35 = vsel %vm4764_vm8, %v4488_v40, %v980_v10  ;;  %v442_v7 = vrot.slane %v440_v60, 7  ;;  %660 = vst [vmem:[#allocation2 + $0x84] sm:$0xf] %v659_v52 }
  0x6e   : > { %v1071_v4 = vld [vmem:[#allocation2 + $0xc] sm:$0xf]  ;;  %982 = vst [vmem:[#allocation2 + $0x80] sm:$0x1] %v981_v35  ;;  %v5018_v38 = vrot.slane %v1369_v62, 5  ;;  %v1375_v11 = vrot.slane %v1373_v17, 4 }
  0x6f   : > { %v1095_v15 = vld [vmem:[#allocation2 + $0x6c] sm:$0xf]  ;;  %v1144_v16 = vshrl.u32 %v1071_v4, 16  ;;  %v1147_v9 = vshll.u32 %v1071_v4, 16  ;;  %v1324_v19 = vsel %vm4812_vm11, %v1319_v1, %v4976_v2  ;;  %v1357_v20 = vrot.slane %v1355_v3, 5 }
  0x70   : > { %v1336_v21 = vshrl.u32 %v1095_v15, 16  ;;  %v1339_v30 = vshll.u32 %v1095_v15, 16  ;;  %v662_v18 = vld [vmem:[#allocation2 + $0x8c] sm:$0x1]  ;;  %v248_v63 = vld [vmem:[%s4687_s23 + $0x58] sm:$0xf]  ;;  %1535 = vrot.lane.b32.xlu0 %v1324_v19, %s4634_s24  ;;  %v1376_v23 = vor.u32 %v1375_v11, %v5018_v38  ;;  %v445_v28 = vor.u32 %v443_v0, %v442_v7 }
  0x71   : > { %v725_v61 = vld [vmem:[#allocation2 + $0x78] sm:$0x2]  ;;  %v835_v26 = vld [vmem:[#allocation2 + $0x78] sm:$0x1]  ;;  %v1146_v25 = vrot.slane %v1144_v16, 4  ;;  %v1149_v27 = vrot.slane %v1147_v9, 5  ;;  %v1358_v24 = vsel %vm4812_vm11, %v1353_v13, %v1357_v20 }
  0x72   : > { %v1338_v2 = vrot.slane %v1336_v21, 4  ;;  %v1341_v29 = vrot.slane %v1339_v30, 5  ;;  %v4470_v31 = vrot.slane %v725_v61, 9  ;;  %v249_v34 = vld [vmem:[%s4687_s23 + $0x5c] sm:$0xf]  ;;  %1541 = vrot.lane.b32.xlu1 %v1358_v24, %s4634_s24  ;;  %v1377_v42 = vrot.slane %v1376_v23, 4 }
  0x73   : > { %v1150_v36 = vor.u32 %v1149_v27, %v1146_v25  ;;  %v446_v41 = vsel %vm4700_vm5, %v438_v6, %v445_v28  ;;  %v447_v37 = vrot.slane %v442_v7, 4  ;;  %v449_v45 = vshrl.u32 %v248_v63, 16  ;;  %v250_v55 = vld [vmem:[%s4687_s23 + $0x60] sm:$0xf]  ;;  %v665_v8 = vld [vmem:[#allocation2 + $0x90] sm:$0xf] }
  0x74   : > { %v1342_v44 = vor.u32 %v1341_v29, %v1338_v2  ;;  %v836_v56 = vsel %vm4709_vm6, %v4470_v31, %v835_v26  ;;  %661 = vst.msk [vmem:[#allocation2 + $0x88] sm:$0xf] %vm582_vm2, %v446_v41  ;;  %v452_v5 = vshll.u32 %v248_v63, 16  ;;  %v726_v46 = vld [vmem:[#allocation2 + $0x84] sm:$0x2]  ;;  %v457_v49 = vshrl.u32 %v249_v34, 16 }
  0x75   : > { %837 = vst [vmem:[#allocation2 + $0x78] sm:$0x1] %v836_v56  ;;  %v5036_v39 = vrot.slane %v1150_v36, 4  ;;  %v838_v47 = vld [vmem:[#allocation2 + $0x84] sm:$0x1]  ;;  %v663_v48 = vsel %vm4709_vm6, %v447_v37, %v662_v18  ;;  %v4471_v10 = vrot.slane %v726_v46, 9 }
  0x76   : > { %v1343_v13 = vrot.slane %v1342_v44, 4  ;;  %v1100_v50 = vld [vmem:[#allocation2 + $0x80] sm:$0x1]  ;;  %664 = vst [vmem:[#allocation2 + $0x8c] sm:$0x1] %v663_v48  ;;  %v451_v53 = vrot.slane %v449_v45, 7 }
  0x77   : > { %v460_v6 = vshll.u32 %v249_v34, 16  ;;  %v1379_v54 = vshll.u32 %v1100_v50, 16  ;;  %v1156_v57 = vsel %vm4812_vm11, %v5036_v39, %v4786_v51  ;;  %v459_v40 = vrot.slane %v457_v49, 7  ;;  %v251_v58 = vld [vmem:[%s4687_s23 + $0x64] sm:$0xf] }
  0x78   : > { %v466_v60 = vshrl.u32 %v250_v55, 16  ;;  %v1348_v59 = vsel %vm4812_vm11, %v1343_v13, %v4999_v33  ;;  %v839_v62 = vsel %vm4709_vm6, %v4471_v10, %v838_v47  ;;  %v454_v17 = vor.u32 %v452_v5, %v451_v53  ;;  %v669_v52 = vld [vmem:[#allocation2 + $0x98] sm:$0x1]  ;;  %v672_v4 = vld [vmem:[#allocation2 + $0x9c] sm:$0xf] }
  0x79   : > { %v455_v0 = vrot.slane %v451_v53, 4  ;;  %1539 = vrot.lane.b32.xlu0 %v1348_v59, %s4634_s24  ;;  %v1381_v1 = vrot.slane %v1379_v54, 5  ;;  %840 = vst [vmem:[#allocation2 + $0x84] sm:$0x1] %v839_v62  ;;  %v462_v3 = vor.u32 %v460_v6, %v459_v40  ;;  %v464_v51 = vrot.slane %v459_v40, 4 }
  0x7a   : > { %v468_v35 = vrot.slane %v466_v60, 7  ;;  %v666_v7 = vsel %vm4716_vm7, %v454_v17, %v665_v8  ;;  %v469_v15 = vshll.u32 %v250_v55, 16  ;;  %v474_v33 = vshrl.u32 %v251_v58, 16  ;;  %v252_v16 = vld [vmem:[%s4687_s23 + $0x68] sm:$0xf] }
  0x7b   : > { %v477_v11 = vshll.u32 %v251_v58, 16  ;;  %v1382_v9 = vsel %vm4812_vm11, %v1377_v42, %v1381_v1  ;;  %v1102_v19 = vld [vmem:[#allocation2 + $0x88] sm:$0xf]  ;;  %v463_v21 = vsel %vm4700_vm5, %v455_v0, %v462_v3  ;;  %667 = vst [vmem:[#allocation2 + $0x90] sm:$0xf] %v666_v7  ;;  %v670_v30 = vsel %vm4709_vm6, %v464_v51, %v669_v52 }
  0x7c   : > { %v870_v20 = vld [vmem:[#allocation2 + $0x88] sm:$0x8]  ;;  %v472_v18 = vrot.slane %v468_v35, 4  ;;  %1545 = vrot.lane.b32.xlu1 %v1382_v9, %s4634_s24  ;;  %v1098_v63 = vld [vmem:[#allocation2 + $0x78] sm:$0xf]  ;;  %v1393_v23 = vshll.u32 %v1102_v19, 16  ;;  %v471_v25 = vor.u32 %v469_v15, %v468_v35 }
  0x7d   : > { %v1397_v61 = vshrl.u32 %v1102_v19, 16  ;;  %v4489_v26 = vrot.slane %v870_v20, 11  ;;  %668 = vst.msk [vmem:[#allocation2 + $0x94] sm:$0xf] %vm582_vm2, %v463_v21  ;;  %671 = vst [vmem:[#allocation2 + $0x98] sm:$0x1] %v670_v30 }
  0x7e   : > { %v1360_v27 = vshrl.u32 %v1098_v63, 16  ;;  %v1363_v28 = vshll.u32 %v1098_v63, 16  ;;  %v983_v24 = vld [vmem:[#allocation2 + $0x8c] sm:$0x1]  ;;  %v476_v2 = vrot.slane %v474_v33, 7  ;;  %v483_v29 = vshrl.u32 %v252_v16, 16 }
  0x7f   : > { %v5062_v31 = vrot.slane %v1393_v23, 5  ;;  %v984_v34 = vsel %vm4764_vm8, %v4489_v26, %v983_v24  ;;  %v1399_v42 = vrot.slane %v1397_v61, 4  ;;  %v673_v36 = vsel %vm4716_vm7, %v471_v25, %v672_v4  ;;  %v676_v41 = vld [vmem:[#allocation2 + $0xa4] sm:$0x1]  ;;  %v5069_v5 = vld [vmem:[%s4687_s23 + $0x6c] sm:$0xf] }
  0x80   : > { %v1362_v37 = vrot.slane %v1360_v27, 4  ;;  %v1365_v44 = vrot.slane %v1363_v28, 5  ;;  %985 = vst [vmem:[#allocation2 + $0x8c] sm:$0x1] %v984_v34  ;;  %v479_v56 = vor.u32 %v477_v11, %v476_v2  ;;  %674 = vst [vmem:[#allocation2 + $0x9c] sm:$0xf] %v673_v36  ;;  %1507 = vrot.lane.b32.xlu1 %v1156_v57, %s4634_s24 }
  0x81   : > { %v481_v45 = vrot.slane %v476_v2, 4  ;;  %v1101_v55 = vld [vmem:[#allocation2 + $0x84] sm:$0xf]  ;;  %v1400_v39 = vor.u32 %v1399_v42, %v5062_v31  ;;  %v5073_v46 = vrot.slane %v483_v29, 7  ;;  %v486_v47 = vshll.u32 %v252_v16, 16 }
  0x82   : > { %v1366_v48 = vor.u32 %v1365_v44, %v1362_v37  ;;  %v1384_v49 = vshrl.u32 %v1101_v55, 16  ;;  %v1387_v8 = vshll.u32 %v1101_v55, 16  ;;  %v480_v13 = vsel %vm4700_vm5, %v472_v18, %v479_v56  ;;  %v679_v50 = vld [vmem:[#allocation2 + $0xa8] sm:$0xf]  ;;  %v727_v53 = vld [vmem:[#allocation2 + $0x90] sm:$0x2] }
  0x83   : > { %v1401_v10 = vrot.slane %v1400_v39, 4  ;;  %v841_v6 = vld [vmem:[#allocation2 + $0x90] sm:$0x1]  ;;  %675 = vst.msk [vmem:[#allocation2 + $0xa0] sm:$0xf] %vm582_vm2, %v480_v13  ;;  %v677_v54 = vsel %vm4709_vm6, %v481_v45, %v676_v41  ;;  %v488_v57 = vor.u32 %v486_v47, %v5073_v46  ;;  %v491_v40 = vshrl.u32 %v5069_v5, 16 }
  0x84   : > { %v1367_v58 = vrot.slane %v1366_v48, 4  ;;  %v1386_v60 = vrot.slane %v1384_v49, 4  ;;  %v1389_v59 = vrot.slane %v1387_v8, 5  ;;  %v4472_v62 = vrot.slane %v727_v53, 9  ;;  %v1105_v17 = vld [vmem:[#allocation2 + $0x94] sm:$0xf] }
  0x85   : > { %678 = vst [vmem:[#allocation2 + $0xa4] sm:$0x1] %v677_v54  ;;  %v1417_v0 = vshll.u32 %v1105_v17, 16  ;;  %v1421_v52 = vshrl.u32 %v1105_v17, 16  ;;  %v871_v1 = vld [vmem:[#allocation2 + $0x94] sm:$0x8]  ;;  %v680_v51 = vsel %vm4716_vm7, %v488_v57, %v679_v50 }
  0x86   : > { %v986_v3 = vld [vmem:[#allocation2 + $0x98] sm:$0x1]  ;;  %v1372_v35 = vsel %vm4812_vm11, %v1367_v58, %v5018_v38  ;;  %v1390_v4 = vor.u32 %v1389_v59, %v1386_v60  ;;  %v842_v7 = vsel %vm4709_vm6, %v4472_v62, %v841_v6  ;;  %v4490_v15 = vrot.slane %v871_v1, 11  ;;  %681 = vst [vmem:[#allocation2 + $0xa8] sm:$0xf] %v680_v51 }
  0x87   : > { %v254_v33 = vld [vmem:[%s4687_s23 + $0x70] sm:$0xf]  ;;  %1543 = vrot.lane.b32.xlu0 %v1372_v35, %s4634_s24  ;;  %v1103_v11 = vld [vmem:[#allocation2 + $0x8c] sm:$0x1]  ;;  %843 = vst [vmem:[#allocation2 + $0x90] sm:$0x1] %v842_v7 }
  0x88   : > { %v5091_v16 = vrot.slane %v1417_v0, 5  ;;  %v728_v9 = vld [vmem:[#allocation2 + $0x9c] sm:$0x2]  ;;  %v489_v19 = vrot.slane %v5073_v46, 4  ;;  %v1391_v20 = vrot.slane %v1390_v4, 4  ;;  %v1403_v21 = vshll.u32 %v1103_v11, 16 }
  0x89   : > { %v987_v38 = vsel %vm4764_vm8, %v4490_v15, %v986_v3  ;;  %v4473_v30 = vrot.slane %v728_v9, 9  ;;  %v844_v18 = vld [vmem:[#allocation2 + $0x9c] sm:$0x1]  ;;  %v1423_v63 = vrot.slane %v1421_v52, 4  ;;  %v493_v23 = vrot.slane %v491_v40, 7 }
  0x8a   : > { %988 = vst [vmem:[#allocation2 + $0x98] sm:$0x1] %v987_v38  ;;  %v494_v61 = vshll.u32 %v5069_v5, 16  ;;  %v683_v26 = vld [vmem:[#allocation2 + $0xb0] sm:$0x1]  ;;  %v500_v25 = vshrl.u32 %v254_v33, 16  ;;  %v1396_v27 = vsel %vm4812_vm11, %v1391_v20, %v5062_v31 }
  0x8b   : > { %v1405_v28 = vrot.slane %v1403_v21, 5  ;;  %v845_v24 = vsel %vm4709_vm6, %v4473_v30, %v844_v18  ;;  %v1108_v2 = vld [vmem:[#allocation2 + $0xa0] sm:$0xf]  ;;  %v503_v34 = vshll.u32 %v254_v33, 16  ;;  %1547 = vrot.lane.b32.xlu0 %v1396_v27, %s4634_s24  ;;  %v498_v45 = vrot.slane %v493_v23, 4 }
  0x8c   : > { %v872_v29 = vld [vmem:[#allocation2 + $0xa0] sm:$0x8]  ;;  %846 = vst [vmem:[#allocation2 + $0x9c] sm:$0x1] %v845_v24  ;;  %v1441_v42 = vshll.u32 %v1108_v2, 16  ;;  %v1445_v36 = vshrl.u32 %v1108_v2, 16  ;;  %v496_v56 = vor.u32 %v494_v61, %v493_v23  ;;  %v1424_v39 = vor.u32 %v1423_v63, %v5091_v16 }
  0x8d   : > { %v4491_v41 = vrot.slane %v872_v29, 11  ;;  %v989_v37 = vld [vmem:[#allocation2 + $0xa4] sm:$0x1]  ;;  %v1406_v44 = vsel %vm4812_vm11, %v1401_v10, %v1405_v28  ;;  %v255_v31 = vld [vmem:[%s4687_s23 + $0x74] sm:$0xf]  ;;  %v502_v5 = vrot.slane %v500_v25, 7  ;;  %v684_v53 = vsel %vm4709_vm6, %v498_v45, %v683_v26 }
  0x8e   : > { %v686_v55 = vld [vmem:[#allocation2 + $0xb4] sm:$0xf]  ;;  %1549 = vrot.lane.b32.xlu1 %v1406_v44, %s4634_s24  ;;  %v5108_v46 = vrot.slane %v1441_v42, 5  ;;  %v1447_v48 = vrot.slane %v1445_v36, 4  ;;  %v729_v49 = vld [vmem:[#allocation2 + $0xa8] sm:$0x2]  ;;  %v497_v50 = vsel %vm4700_vm5, %v489_v19, %v496_v56 }
  0x8f   : > { %v990_v47 = vsel %vm4764_vm8, %v4491_v41, %v989_v37  ;;  %v847_v8 = vld [vmem:[#allocation2 + $0xa8] sm:$0x1]  ;;  %v1104_v13 = vld [vmem:[#allocation2 + $0x90] sm:$0xf]  ;;  %v4474_v10 = vrot.slane %v729_v49, 9  ;;  %v5116_v6 = vor.u32 %v503_v34, %v502_v5  ;;  %v508_v60 = vshrl.u32 %v255_v31, 16 }
  0x90   : > { %991 = vst [vmem:[#allocation2 + $0xa4] sm:$0x1] %v990_v47  ;;  %v1408_v54 = vshrl.u32 %v1104_v13, 16  ;;  %v1411_v57 = vshll.u32 %v1104_v13, 16  ;;  %682 = vst.msk [vmem:[#allocation2 + $0xac] sm:$0xf] %vm582_vm2, %v497_v50  ;;  %v1448_v51 = vor.u32 %v1447_v48, %v5108_v46 }
  0x91   : > { %685 = vst [vmem:[#allocation2 + $0xb0] sm:$0x1] %v684_v53  ;;  %v1106_v40 = vld [vmem:[#allocation2 + $0x98] sm:$0x1]  ;;  %v848_v58 = vsel %vm4709_vm6, %v4474_v10, %v847_v8  ;;  %v511_v59 = vshll.u32 %v255_v31, 16  ;;  %v687_v62 = vsel %vm4716_vm7, %v5116_v6, %v686_v55  ;;  %v1425_v52 = vrot.slane %v1424_v39, 4 }
  0x92   : > { %v1410_v17 = vrot.slane %v1408_v54, 4  ;;  %v1413_v0 = vrot.slane %v1411_v57, 5  ;;  %v1427_v1 = vshll.u32 %v1106_v40, 16  ;;  %849 = vst [vmem:[#allocation2 + $0xa8] sm:$0x1] %v848_v58  ;;  %v506_v35 = vrot.slane %v502_v5, 4 }
  0x93   : > { %688 = vst [vmem:[#allocation2 + $0xb4] sm:$0xf] %v687_v62  ;;  %v1107_v3 = vld [vmem:[#allocation2 + $0x9c] sm:$0xf]  ;;  %v5125_v4 = vrot.slane %v508_v60, 7  ;;  %v1449_v23 = vrot.slane %v1448_v51, 4 }
  0x94   : > { %v1414_v7 = vor.u32 %v1413_v0, %v1410_v17  ;;  %v1429_v15 = vrot.slane %v1427_v1, 5  ;;  %v1432_v33 = vshrl.u32 %v1107_v3, 16  ;;  %v1435_v11 = vshll.u32 %v1107_v3, 16  ;;  %v690_v9 = vld [vmem:[#allocation2 + $0xbc] sm:$0x1] }
  0x95   : > { %v513_v19 = vor.u32 %v511_v59, %v5125_v4  ;;  %v515_v20 = vrot.slane %v5125_v4, 4  ;;  %v1005_v53 = vld [vmem:[#allocation2 + $0x4] sm:$0xf]  ;;  %v1007_v54 = vld [vmem:[#allocation2 + $0x10] sm:$0xf]  ;;  %vm1599_vm15 = vcmask 60448  }
  0x96   : > { %v1415_v21 = vrot.slane %v1414_v7, 4  ;;  %v1430_v38 = vsel %vm4812_vm11, %v1425_v52, %v1429_v15  ;;  %v1434_v30 = vrot.slane %v1432_v33, 4  ;;  %v1437_v18 = vrot.slane %v1435_v11, 5  ;;  %1037 = vst.msk [vmem:[#allocation3 + $0x4] sm:$0xf] %vm582_vm2, %v1005_v53 }
  0x97   : > { %v1109_v63 = vld [vmem:[#allocation2 + $0xa4] sm:$0x1]  ;;  %1553 = vrot.lane.b32.xlu1 %v1430_v38, %s4634_s24  ;;  %v1111_v26 = vld [vmem:[#allocation2 + $0xac] sm:$0xf]  ;;  %v514_v27 = vsel %vm4700_vm5, %v506_v35, %v513_v19  ;;  %v691_v28 = vsel %vm4709_vm6, %v515_v20, %v690_v9  ;;  %1039 = vst.msk [vmem:[#allocation3 + $0xc] sm:$0xf] %vm582_vm2, %v1007_v54 }
  0x98   : > { %v1451_v61 = vshll.u32 %v1109_v63, 16  ;;  %v873_v25 = vld [vmem:[#allocation2 + $0xac] sm:$0x8]  ;;  %v1420_v24 = vsel %vm4812_vm11, %v1415_v21, %v5091_v16  ;;  %v1438_v2 = vor.u32 %v1437_v18, %v1434_v30  ;;  %v1465_v29 = vshll.u32 %v1111_v26, 16  ;;  %v992_v42 = vld [vmem:[#allocation2 + $0xb0] sm:$0x1] }
  0x99   : > { %v1469_v34 = vshrl.u32 %v1111_v26, 16  ;;  %689 = vst.msk [vmem:[#allocation2 + $0xb8] sm:$0xf] %vm582_vm2, %v514_v27  ;;  %711 = vst.msk [vmem:[#allocation2 + $0xd0] sm:$0xf] %vm582_vm2, %v514_v27  ;;  %1551 = vrot.lane.b32.xlu0 %v1420_v24, %s4634_s24  ;;  %v4492_v37 = vrot.slane %v873_v25, 11 }
  0x9a   : > { %692 = vst [vmem:[#allocation2 + $0xbc] sm:$0x1] %v691_v28  ;;  %v1453_v36 = vrot.slane %v1451_v61, 5  ;;  %v1110_v41 = vld [vmem:[#allocation2 + $0xa8] sm:$0xf]  ;;  %v1439_v56 = vrot.slane %v1438_v2, 4 }
  0x9b   : > { %v730_v44 = vld [vmem:[#allocation2 + $0xb4] sm:$0x2]  ;;  %v1456_v45 = vshrl.u32 %v1110_v41, 16  ;;  %v1459_v31 = vshll.u32 %v1110_v41, 16  ;;  %v1467_v5 = vrot.slane %v1465_v29, 5  ;;  %v993_v39 = vsel %vm4764_vm8, %v4492_v37, %v992_v42 }
  0x9c   : > { %v850_v16 = vld [vmem:[#allocation2 + $0xb4] sm:$0x1]  ;;  %v1454_v55 = vsel %vm4812_vm11, %v1449_v23, %v1453_v36  ;;  %v1471_v47 = vrot.slane %v1469_v34, 4  ;;  %v4475_v48 = vrot.slane %v730_v44, 9  ;;  %v1444_v49 = vsel %vm4812_vm11, %v1439_v56, %v5108_v46  ;;  %994 = vst [vmem:[#allocation2 + $0xb0] sm:$0x1] %v993_v39 }
  0x9d   : > { %1557 = vrot.lane.b32.xlu1 %v1454_v55, %s4634_s24  ;;  %v1458_v8 = vrot.slane %v1456_v45, 4  ;;  %v1461_v13 = vrot.slane %v1459_v31, 5  ;;  %1555 = vrot.lane.b32.xlu0 %v1444_v49, %s4634_s24  ;;  %v1004_v15 = vld [vmem:[#allocation2] sm:$0xf]  ;;  %v1009_v11 = vld [vmem:[#allocation2 + $0x1c] sm:$0xf] }
  0x9e   : > { %v851_v50 = vsel %vm4709_vm6, %v4475_v48, %v850_v16  ;;  %v1472_v57 = vor.u32 %v1471_v47, %v1467_v5  ;;  %1036 = vst.msk [vmem:[#allocation3] sm:$0xf] %vm582_vm2, %v1004_v15  ;;  %v1633_v38 = vld [vmem:[#allocation2 + $0x4] sm:$0xf]  ;;  %1041 = vst.msk [vmem:[#allocation3 + $0x14] sm:$0xf] %vm582_vm2, %v1009_v11 }
  0x9f   : > { %v1462_v10 = vor.u32 %v1461_v13, %v1458_v8  ;;  %852 = vst [vmem:[#allocation2 + $0xb4] sm:$0x1] %v851_v50  ;;  %v1632_v61 = vld [vmem:[#allocation2] sm:$0xe]  ;;  %v1008_v26 = vld [vmem:[#allocation2 + $0x18] sm:$0xf] }
  0xa0   : > { %v1114_v40 = vld [vmem:[#allocation2 + $0xb8] sm:$0xf]  ;;  %v1473_v35 = vrot.slane %v1472_v57, 4  ;;  %v1733_v25 = vrot.slane %v1633_v38, 5  ;;  %v1636_v27 = vld [vmem:[#allocation2 + $0x10] sm:$0xf] }
  0xa1   : > { %v874_v58 = vld [vmem:[#allocation2 + $0xb8] sm:$0x8]  ;;  %v1463_v46 = vrot.slane %v1462_v10, 4  ;;  %v1489_v60 = vshll.u32 %v1114_v40, 16  ;;  %v1493_v59 = vshrl.u32 %v1114_v40, 16  ;;  %v4496_v37 = vrot.slane %v1632_v61, 9 }
  0xa2   : > { %v4493_v62 = vrot.slane %v874_v58, 11  ;;  %v995_v17 = vld [vmem:[#allocation2 + $0xbc] sm:$0x1]  ;;  %1040 = vst.msk [vmem:[#allocation3 + $0x10] sm:$0xf] %vm582_vm2, %v1008_v26  ;;  %v1740_v44 = vrot.slane %v1636_v27, 5 }
  0xa3   : > { %v1468_v0 = vsel %vm4812_vm11, %v1463_v46, %v1467_v5  ;;  %v1112_v1 = vld [vmem:[#allocation2 + $0xb0] sm:$0x1]  ;;  %v1491_v3 = vrot.slane %v1489_v60, 5  ;;  %v1495_v51 = vrot.slane %v1493_v59, 4  ;;  %v1011_v28 = vld [vmem:[#allocation2 + $0x28] sm:$0xf]  ;;  %v1734_v10 = vsel %vm5169_vm14, %v4496_v37, %v1733_v25 }
  0xa4   : > { %v996_v52 = vsel %vm4764_vm8, %v4493_v62, %v995_v17  ;;  %1559 = vrot.lane.b32.xlu0 %v1468_v0, %s4634_s24  ;;  %v1475_v7 = vshll.u32 %v1112_v1, 16  ;;  %v1634_v29 = vld [vmem:[#allocation2 + $0x8] sm:$0x1]  ;;  %1043 = vst.msk [vmem:[#allocation3 + $0x1c] sm:$0xf] %vm582_vm2, %v1011_v28  ;;  %v1735_v5 = vrot.slane %v1733_v25, 4 }
  0xa5   : > { %997 = vst [vmem:[#allocation2 + $0xbc] sm:$0x1] %v996_v52  ;;  %v1496_v30 = vor.u32 %v1495_v51, %v1491_v3  ;;  %v1635_v36 = vld [vmem:[#allocation2 + $0xc] sm:$0xe]  ;;  %v1637_v56 = vld [vmem:[#allocation2 + $0x14] sm:$0x1]  ;;  %v1506_v55 = vpop.permute.xlu0 %1505 }
  0xa6   : > { %v1113_v33 = vld [vmem:[#allocation2 + $0xb4] sm:$0xf]  ;;  %v1477_v9 = vrot.slane %v1475_v7, 5  ;;  %v1736_v16 = vrot.slane %v1634_v29, 5  ;;  %v1510_v39 = vpop.permute.xlu1 %1509  ;;  %v1010_v47 = vld [vmem:[#allocation2 + $0x24] sm:$0xf] }
  0xa7   : > { %v1480_v19 = vshrl.u32 %v1113_v33, 16  ;;  %v1483_v21 = vshll.u32 %v1113_v33, 16  ;;  %v1497_v34 = vrot.slane %v1496_v30, 4  ;;  %v1639_v49 = vld [vmem:[#allocation2 + $0x1c] sm:$0xf]  ;;  %v4497_v53 = vrot.slane %v1635_v36, 9 }
  0xa8   : > { %v1478_v18 = vsel %vm4812_vm11, %v1473_v35, %v1477_v9  ;;  %1042 = vst.msk [vmem:[#allocation3 + $0x18] sm:$0xf] %vm582_vm2, %v1010_v47  ;;  %v1013_v8 = vld [vmem:[#allocation2 + $0x34] sm:$0xf]  ;;  %v1012_v50 = vld [vmem:[#allocation2 + $0x30] sm:$0xf]  ;;  %v1737_v58 = vsel %vm5169_vm14, %v1735_v5, %v1736_v16 }
  0xa9   : > { %v1482_v63 = vrot.slane %v1480_v19, 4  ;;  %v1485_v23 = vrot.slane %v1483_v21, 5  ;;  %1561 = vrot.lane.b32.xlu1 %v1478_v18, %s4634_s24  ;;  %1045 = vst.msk [vmem:[#allocation3 + $0x24] sm:$0xf] %vm582_vm2, %v1013_v8  ;;  %v1742_v54 = vrot.slane %v1740_v44, 4  ;;  %v1743_v57 = vrot.slane %v1637_v56, 5 }
  0xaa   : > { %1044 = vst.msk [vmem:[#allocation3 + $0x20] sm:$0xf] %vm582_vm2, %v1012_v50  ;;  %v1015_v40 = vld [vmem:[#allocation2 + $0x40] sm:$0xf]  ;;  %v1638_v46 = vld [vmem:[#allocation2 + $0x18] sm:$0xe]  ;;  %v1514_v59 = vpop.permute.xlu1 %1513 }
  0xab   : > { %v1486_v24 = vor.u32 %v1485_v23, %v1482_v63  ;;  %v1747_v60 = vrot.slane %v1639_v49, 5  ;;  %1047 = vst.msk [vmem:[#allocation3 + $0x2c] sm:$0xf] %vm582_vm2, %v1015_v40  ;;  %v1640_v62 = vld [vmem:[#allocation2 + $0x20] sm:$0x1]  ;;  %v1744_v51 = vsel %vm5169_vm14, %v1742_v54, %v1743_v57  ;;  %v4498_v35 = vrot.slane %v1638_v46, 9 }
  0xac   : > { %v1115_v2 = vld [vmem:[#allocation2 + $0xbc] sm:$0x1]  ;;  %v1642_v17 = vld [vmem:[#allocation2 + $0x28] sm:$0xf]  ;;  %v1641_v0 = vld [vmem:[#allocation2 + $0x24] sm:$0xe] }
  0xad   : > { %v1499_v42 = vshll.u32 %v1115_v2, 16  ;;  %v1487_v41 = vrot.slane %v1486_v24, 4  ;;  %v1504_v52 = vpop.permute.xlu0 %1503  ;;  %v1014_v1 = vld [vmem:[#allocation2 + $0x3c] sm:$0xf]  ;;  %v1643_v7 = vld [vmem:[#allocation2 + $0x2c] sm:$0x1]  ;;  %v1748_v63 = vsel %vm5169_vm14, %v4498_v35, %v1747_v60 }
  0xae   : > { %1046 = vst.msk [vmem:[#allocation3 + $0x28] sm:$0xf] %vm582_vm2, %v1014_v1  ;;  %v1017_v15 = vld [vmem:[#allocation2 + $0x4c] sm:$0xf]  ;;  %v1749_v33 = vrot.slane %v1747_v60, 4  ;;  %v1750_v11 = vrot.slane %v1640_v62, 5  ;;  %v1518_v19 = vpop.permute.xlu1 %1517 }
  0xaf   : > { %v1501_v45 = vrot.slane %v1499_v42, 5  ;;  %v1492_v48 = vsel %vm4812_vm11, %v1487_v41, %v1491_v3  ;;  %v1741_v3 = vsel %vm5169_vm14, %v4497_v53, %v1740_v44  ;;  %v1754_v9 = vrot.slane %v1642_v17, 5  ;;  %1049 = vst.msk [vmem:[#allocation3 + $0x34] sm:$0xf] %vm582_vm2, %v1017_v15  ;;  %v1016_v21 = vld [vmem:[#allocation2 + $0x48] sm:$0xf] }
  0xb0   : > { %1563 = vrot.lane.b32.xlu0 %v1492_v48, %s4634_s24  ;;  %v1645_v38 = vld [vmem:[#allocation2 + $0x34] sm:$0xf]  ;;  %1601 = vst.msk [vmem:[#allocation3 + $0x4] sm:$0xf] %vm1599_vm15, %v1506_v55  ;;  %1603 = vst.msk [vmem:[#allocation3 + $0xc] sm:$0xf] %vm1599_vm15, %v1510_v39  ;;  %v1751_v25 = vsel %vm5169_vm14, %v1749_v33, %v1750_v11 }
  0xb1   : > { %v1502_v13 = vsel %vm4812_vm11, %v1497_v34, %v1501_v45  ;;  %1600 = vst.msk [vmem:[#allocation3] sm:$0xf] %vm1599_vm15, %v1504_v52  ;;  %1605 = vst.msk [vmem:[#allocation3 + $0x14] sm:$0xf] %vm1599_vm15, %v1514_v59  ;;  %v1019_v30 = vld [vmem:[#allocation2 + $0x58] sm:$0xf]  ;;  %v1512_v18 = vpop.permute.xlu0 %1511 }
  0xb2   : > { %1565 = vrot.lane.b32.xlu1 %v1502_v13, %s4634_s24  ;;  %1607 = vst.msk [vmem:[#allocation3 + $0x1c] sm:$0xf] %vm1599_vm15, %v1518_v19  ;;  %v4499_v23 = vrot.slane %v1641_v0, 9  ;;  %v1757_v61 = vrot.slane %v1643_v7, 5  ;;  %v1644_v26 = vld [vmem:[#allocation2 + $0x30] sm:$0xe]  ;;  %v1522_v24 = vpop.permute.xlu1 %1521 }
  0xb3   : > { %1048 = vst.msk [vmem:[#allocation3 + $0x30] sm:$0xf] %vm582_vm2, %v1016_v21  ;;  %1051 = vst.msk [vmem:[#allocation3 + $0x3c] sm:$0xf] %vm582_vm2, %v1019_v30  ;;  %v1756_v27 = vrot.slane %v1754_v9, 4  ;;  %v1761_v28 = vrot.slane %v1645_v38, 5 }
  0xb4   : > { %1843 = vrot.lane.b32.xlu0 %v1734_v10, %s4635_s25  ;;  %1604 = vst.msk [vmem:[#allocation3 + $0x10] sm:$0xf] %vm1599_vm15, %v1512_v18  ;;  %v1018_v2 = vld [vmem:[#allocation2 + $0x54] sm:$0xf]  ;;  %v1021_v29 = vld [vmem:[#allocation2 + $0x64] sm:$0xf]  ;;  %v1755_v56 = vsel %vm5169_vm14, %v4499_v23, %v1754_v9 }
  0xb5   : > { %v1646_v34 = vld [vmem:[#allocation2 + $0x38] sm:$0x1]  ;;  %v1648_v42 = vld [vmem:[#allocation2 + $0x40] sm:$0xf]  ;;  %1609 = vst.msk [vmem:[#allocation3 + $0x24] sm:$0xf] %vm1599_vm15, %v1522_v24  ;;  %v1516_v41 = vpop.permute.xlu0 %1515  ;;  %v1758_v55 = vsel %vm5169_vm14, %v1756_v27, %v1757_v61 }
  0xb6   : > { %1845 = vrot.lane.b32.xlu1 %v1737_v58, %s4635_s25  ;;  %1050 = vst.msk [vmem:[#allocation3 + $0x38] sm:$0xf] %vm582_vm2, %v1018_v2  ;;  %1053 = vst.msk [vmem:[#allocation3 + $0x44] sm:$0xf] %vm582_vm2, %v1021_v29  ;;  %v1647_v36 = vld [vmem:[#allocation2 + $0x3c] sm:$0xe] }
  0xb7   : > { %v1020_v37 = vld [vmem:[#allocation2 + $0x60] sm:$0xf]  ;;  %v1023_v44 = vld [vmem:[#allocation2 + $0x70] sm:$0xf]  ;;  %v4500_v45 = vrot.slane %v1644_v26, 9  ;;  %v1763_v39 = vrot.slane %v1761_v28, 4 }
  0xb8   : > { %1847 = vrot.lane.b32.xlu0 %v1741_v3, %s4635_s25  ;;  %1606 = vst.msk [vmem:[#allocation3 + $0x18] sm:$0xf] %vm1599_vm15, %v1516_v41  ;;  %v1022_v5 = vld [vmem:[#allocation2 + $0x6c] sm:$0xf]  ;;  %v1025_v16 = vld [vmem:[#allocation2 + $0x7c] sm:$0xf] }
  0xb9   : > { %1052 = vst.msk [vmem:[#allocation3 + $0x40] sm:$0xf] %vm582_vm2, %v1020_v37  ;;  %1055 = vst.msk [vmem:[#allocation3 + $0x4c] sm:$0xf] %vm582_vm2, %v1023_v44  ;;  %v1764_v47 = vrot.slane %v1646_v34, 5  ;;  %v1768_v48 = vrot.slane %v1648_v42, 5  ;;  %v1762_v57 = vsel %vm5169_vm14, %v4500_v45, %v1761_v28  ;;  %v1520_v58 = vpop.permute.xlu0 %1519 }
  0xba   : > { %1849 = vrot.lane.b32.xlu1 %v1744_v51, %s4635_s25  ;;  %1054 = vst.msk [vmem:[#allocation3 + $0x48] sm:$0xf] %vm582_vm2, %v1022_v5  ;;  %1057 = vst.msk [vmem:[#allocation3 + $0x54] sm:$0xf] %vm582_vm2, %v1025_v16  ;;  %v1024_v49 = vld [vmem:[#allocation2 + $0x78] sm:$0xf] }
  0xbb   : > { %v1649_v8 = vld [vmem:[#allocation2 + $0x44] sm:$0x1]  ;;  %v1651_v13 = vld [vmem:[#allocation2 + $0x4c] sm:$0xf]  ;;  %1056 = vst.msk [vmem:[#allocation3 + $0x50] sm:$0xf] %vm582_vm2, %v1024_v49  ;;  %v1765_v59 = vsel %vm5169_vm14, %v1763_v39, %v1764_v47 }
  0xbc   : > { %1851 = vrot.lane.b32.xlu0 %v1748_v63, %s4635_s25  ;;  %v1006_v50 = vld [vmem:[#allocation2 + $0xc] sm:$0xf]  ;;  %v1650_v10 = vld [vmem:[#allocation2 + $0x48] sm:$0xe]  ;;  %v1026_v53 = vld [vmem:[#allocation2 + $0x84] sm:$0xf] }
  0xbd   : > { %1038 = vst.msk [vmem:[#allocation3 + $0x8] sm:$0xf] %vm582_vm2, %v1006_v50  ;;  %v1027_v54 = vld [vmem:[#allocation2 + $0x88] sm:$0xf]  ;;  %v4501_v40 = vrot.slane %v1647_v36, 9  ;;  %v1770_v62 = vrot.slane %v1768_v48, 4 }
  0xbe   : > { %1853 = vrot.lane.b32.xlu1 %v1751_v25, %s4635_s25  ;;  %1058 = vst.msk [vmem:[#allocation3 + $0x58] sm:$0xf] %vm582_vm2, %v1026_v53  ;;  %1059 = vst.msk [vmem:[#allocation3 + $0x5c] sm:$0xf] %vm582_vm2, %v1027_v54  ;;  %v1028_v46 = vld [vmem:[#allocation2 + $0x90] sm:$0xf] }
  0xbf   : > { %v1029_v60 = vld [vmem:[#allocation2 + $0x94] sm:$0xf]  ;;  %v1771_v17 = vrot.slane %v1649_v8, 5  ;;  %v1775_v0 = vrot.slane %v1651_v13, 5  ;;  %1608 = vst.msk [vmem:[#allocation3 + $0x20] sm:$0xf] %vm1599_vm15, %v1520_v58  ;;  %v1769_v11 = vsel %vm5169_vm14, %v4501_v40, %v1768_v48 }
  0xc0   : > { %1855 = vrot.lane.b32.xlu0 %v1755_v56, %s4635_s25  ;;  %1060 = vst.msk [vmem:[#allocation3 + $0x60] sm:$0xf] %vm582_vm2, %v1028_v46  ;;  %1061 = vst.msk [vmem:[#allocation3 + $0x64] sm:$0xf] %vm582_vm2, %v1029_v60  ;;  %v1030_v52 = vld [vmem:[#allocation2 + $0x9c] sm:$0xf]  ;;  %v1524_v26 = vpop.permute.xlu0 %1523 }
  0xc1   : > { %v1652_v1 = vld [vmem:[#allocation2 + $0x50] sm:$0x1]  ;;  %v1654_v3 = vld [vmem:[#allocation2 + $0x58] sm:$0xf]  ;;  %1062 = vst.msk [vmem:[#allocation3 + $0x68] sm:$0xf] %vm582_vm2, %v1030_v52  ;;  %v1772_v38 = vsel %vm5169_vm14, %v1770_v62, %v1771_v17 }
  0xc2   : > { %1857 = vrot.lane.b32.xlu1 %v1758_v55, %s4635_s25  ;;  %v1031_v51 = vld [vmem:[#allocation2 + $0xa0] sm:$0xf]  ;;  %v1653_v35 = vld [vmem:[#allocation2 + $0x54] sm:$0xe]  ;;  %v5238_v7 = vld [vmem:[#allocation2 + $0x64] sm:$0xf] }
  0xc3   : > { %1063 = vst.msk [vmem:[#allocation3 + $0x6c] sm:$0xf] %vm582_vm2, %v1031_v51  ;;  %v1032_v15 = vld [vmem:[#allocation2 + $0xa8] sm:$0xf]  ;;  %v1033_v33 = vld [vmem:[#allocation2 + $0xac] sm:$0xf] }
  0xc4   : > { %1859 = vrot.lane.b32.xlu0 %v1762_v57, %s4635_s25  ;;  %v4502_v9 = vrot.slane %v1650_v10, 9  ;;  %1064 = vst.msk [vmem:[#allocation3 + $0x70] sm:$0xf] %vm582_vm2, %v1032_v15  ;;  %1065 = vst.msk [vmem:[#allocation3 + $0x74] sm:$0xf] %vm582_vm2, %v1033_v33  ;;  %v1777_v30 = vrot.slane %v1775_v0, 4 }
  0xc5   : > { %v1034_v19 = vld [vmem:[#allocation2 + $0xb4] sm:$0xf]  ;;  %v1035_v21 = vld [vmem:[#allocation2 + $0xb8] sm:$0xf]  ;;  %v1778_v18 = vrot.slane %v1652_v1, 5  ;;  %v1782_v63 = vrot.slane %v1654_v3, 5  ;;  %v1526_v8 = vpop.permute.xlu1 %1525 }
  0xc6   : > { %1861 = vrot.lane.b32.xlu1 %v1765_v59, %s4635_s25  ;;  %1066 = vst.msk [vmem:[#allocation3 + $0x78] sm:$0xf] %vm582_vm2, %v1034_v19  ;;  %1067 = vst.msk [vmem:[#allocation3 + $0x7c] sm:$0xf] %vm582_vm2, %v1035_v21  ;;  %v256_v23 = vld [vmem:[%s4687_s23 + $0x78] sm:$0xf]  ;;  %v1776_v34 = vsel %vm5169_vm14, %v4502_v9, %v1775_v0 }
  0xc7   : > { %v1655_v61 = vld [vmem:[#allocation2 + $0x5c] sm:$0x1]  ;;  %v517_v25 = vshrl.u32 %v256_v23, 16  ;;  %v520_v27 = vshll.u32 %v256_v23, 16  ;;  %v1656_v24 = vld [vmem:[#allocation2 + $0x60] sm:$0xe]  ;;  %v1779_v44 = vsel %vm5169_vm14, %v1777_v30, %v1778_v18 }
  0xc8   : > { %v257_v28 = vld [vmem:[%s4687_s23 + $0x7c] sm:$0xf]  ;;  %1863 = vrot.lane.b32.xlu0 %v1769_v11, %s4635_s25  ;;  %1610 = vst.msk [vmem:[#allocation3 + $0x28] sm:$0xf] %vm1599_vm15, %v1524_v26  ;;  %v4503_v42 = vrot.slane %v1653_v35, 9  ;;  %v1789_v36 = vrot.slane %v5238_v7, 5 }
  0xc9   : > { %v525_v2 = vshrl.u32 %v257_v28, 16  ;;  %v528_v29 = vshll.u32 %v257_v28, 16  ;;  %v1658_v41 = vld [vmem:[#allocation2 + $0x68] sm:$0x1]  ;;  %v519_v37 = vrot.slane %v517_v25, 7  ;;  %v1784_v56 = vrot.slane %v1782_v63, 4 }
  0xca   : > { %1865 = vrot.lane.b32.xlu1 %v1772_v38, %s4635_s25  ;;  %v1785_v45 = vrot.slane %v1655_v61, 5  ;;  %v693_v5 = vld [vmem:[#allocation2 + $0xc0] sm:$0xf]  ;;  %v1660_v55 = vld [vmem:[#allocation2 + $0x70] sm:$0xf]  ;;  %v4504_v49 = vrot.slane %v1656_v24, 9  ;;  %v1783_v10 = vsel %vm5169_vm14, %v4503_v42, %v1782_v63 }
  0xcb   : > { %v527_v16 = vrot.slane %v525_v2, 7  ;;  %v522_v39 = vor.u32 %v520_v27, %v519_v37  ;;  %v523_v47 = vrot.slane %v519_v37, 4  ;;  %v697_v48 = vld [vmem:[#allocation2 + $0xc8] sm:$0x1]  ;;  %v1791_v53 = vrot.slane %v1789_v36, 4 }
  0xcc   : > { %1867 = vrot.lane.b32.xlu0 %v1776_v34, %s4635_s25  ;;  %v1792_v54 = vrot.slane %v1658_v41, 5  ;;  %1611 = vst.msk [vmem:[#allocation3 + $0x2c] sm:$0xf] %vm1599_vm15, %v1526_v8  ;;  %v1786_v40 = vsel %vm5169_vm14, %v1784_v56, %v1785_v45  ;;  %v1659_v58 = vld [vmem:[#allocation2 + $0x6c] sm:$0xe]  ;;  %v1796_v46 = vrot.slane %v1660_v55, 5  ;;  %v1790_v14 = vsel %vm5169_vm14, %v4504_v49, %v1789_v36 }
  0xcd   : > { %v530_v13 = vor.u32 %v528_v29, %v527_v16  ;;  %v532_v50 = vrot.slane %v527_v16, 4  ;;  %v694_v57 = vsel %vm4716_vm7, %v522_v39, %v693_v5  ;;  %v708_v62 = vld [vmem:[#allocation2 + $0xcc] sm:$0xf]  ;;  %v1661_v17 = vld [vmem:[#allocation2 + $0x74] sm:$0x1]  ;;  %v4505_v1 = vrot.slane %v1659_v58, 9 }
  0xce   : > { %1869 = vrot.lane.b32.xlu1 %v1779_v44, %s4635_s25  ;;  %695 = vst [vmem:[#allocation2 + $0xc0] sm:$0xf] %v694_v57  ;;  %v1663_v0 = vld [vmem:[#allocation2 + $0x7c] sm:$0xf]  ;;  %v709_v52 = vsel %vm4716_vm7, %v5116_v6, %v708_v62  ;;  %v1662_v3 = vld [vmem:[#allocation2 + $0x78] sm:$0xe]  ;;  %v1793_v35 = vsel %vm5169_vm14, %v1791_v53, %v1792_v54  ;;  %v1530_v19 = vpop.permute.xlu1 %1529 }
  0xcf   : > { %v531_v60 = vsel %vm4700_vm5, %v523_v47, %v530_v13  ;;  %v698_v59 = vsel %vm4709_vm6, %v532_v50, %v697_v48  ;;  %710 = vst [vmem:[#allocation2 + $0xcc] sm:$0xf] %v709_v52  ;;  %v1664_v51 = vld [vmem:[#allocation2 + $0x80] sm:$0x1]  ;;  %v1798_v7 = vrot.slane %v1796_v46, 4  ;;  %v1799_v15 = vrot.slane %v1661_v17, 5 }
  0xd0   : > { %696 = vst.msk [vmem:[#allocation2 + $0xc4] sm:$0xf] %vm582_vm2, %v531_v60  ;;  %699 = vst [vmem:[#allocation2 + $0xc8] sm:$0x1] %v698_v59  ;;  %1871 = vrot.lane.b32.xlu0 %v1783_v10, %s4635_s25  ;;  %v1803_v33 = vrot.slane %v1663_v0, 5  ;;  %v1797_v38 = vsel %vm5169_vm14, %v4505_v1, %v1796_v46  ;;  %v4506_v30 = vrot.slane %v1662_v3, 9 }
  0xd1   : > { %v712_v11 = vld [vmem:[#allocation2 + $0xd4] sm:$0x1]  ;;  %v1666_v32 = vld [vmem:[#allocation2 + $0x88] sm:$0xf]  ;;  %v1665_v6 = vld [vmem:[#allocation2 + $0x84] sm:$0xe]  ;;  %v1800_v61 = vsel %vm5169_vm14, %v1798_v7, %v1799_v15 }
  0xd2   : > { %1873 = vrot.lane.b32.xlu1 %v1786_v40, %s4635_s25  ;;  %v1667_v9 = vld [vmem:[#allocation2 + $0x8c] sm:$0x1]  ;;  %v713_v21 = vsel %vm4709_vm6, %v515_v20, %v712_v11  ;;  %v1806_v18 = vrot.slane %v1664_v51, 5  ;;  %1613 = vst.msk [vmem:[#allocation3 + $0x34] sm:$0xf] %vm1599_vm15, %v1530_v19  ;;  %v1805_v26 = vrot.slane %v1803_v33, 4  ;;  %v1804_v36 = vsel %vm5169_vm14, %v4506_v30, %v1803_v33 }
  0xd3   : > { %714 = vst [vmem:[#allocation2 + $0xd4] sm:$0x1] %v713_v21  ;;  %v1810_v4 = vrot.slane %v1666_v32, 5  ;;  %v876_v27 = vld [vmem:[#allocation2 + $0xd0] sm:$0x8]  ;;  %v4507_v2 = vrot.slane %v1665_v6, 9 }
  0xd4   : > { %1875 = vrot.lane.b32.xlu0 %v1790_v14, %s4635_s25  ;;  %v1669_v20 = vld [vmem:[#allocation2 + $0x94] sm:$0xf]  ;;  %v1813_v41 = vrot.slane %v1667_v9, 5  ;;  %v1528_v37 = vpop.permute.xlu0 %1527  ;;  %v4495_v45 = vrot.slane %v876_v27, 11  ;;  %v1807_v5 = vsel %vm5169_vm14, %v1805_v26, %v1806_v18  ;;  %v1668_v55 = vld [vmem:[#allocation2 + $0x90] sm:$0xe] }
  0xd5   : > { %v731_v63 = vld [vmem:[#allocation2 + $0xc0] sm:$0x2]  ;;  %v853_v23 = vld [vmem:[#allocation2 + $0xc0] sm:$0x1]  ;;  %v1812_v16 = vrot.slane %v1810_v4, 4  ;;  %v1817_v39 = vrot.slane %v1669_v20, 5  ;;  %v1534_v47 = vpop.permute.xlu1 %1533  ;;  %v1811_v10 = vsel %vm5169_vm14, %v4507_v2, %v1810_v4 }
  0xd6   : > { %1877 = vrot.lane.b32.xlu1 %v1793_v35, %s4635_s25  ;;  %v4476_v25 = vrot.slane %v731_v63, 9  ;;  %v732_v42 = vld [vmem:[#allocation2 + $0xcc] sm:$0x2]  ;;  %v856_v56 = vld [vmem:[#allocation2 + $0xcc] sm:$0x1]  ;;  %v4508_v53 = vrot.slane %v1668_v55, 9 }
  0xd7   : > { %v875_v28 = vld [vmem:[#allocation2 + $0xc4] sm:$0x8]  ;;  %v998_v24 = vld [vmem:[#allocation2 + $0xc8] sm:$0x1]  ;;  %v4477_v44 = vrot.slane %v732_v42, 9  ;;  %v1814_v57 = vsel %vm5169_vm14, %v1812_v16, %v1813_v41  ;;  %v1819_v40 = vrot.slane %v1817_v39, 4 }
  0xd8   : > { %1879 = vrot.lane.b32.xlu0 %v1797_v38, %s4635_s25  ;;  %v854_v29 = vsel %vm4709_vm6, %v4476_v25, %v853_v23  ;;  %v4494_v34 = vrot.slane %v875_v28, 11  ;;  %1612 = vst.msk [vmem:[#allocation3 + $0x30] sm:$0xf] %vm1599_vm15, %v1528_v37  ;;  %v1670_v49 = vld [vmem:[#allocation2 + $0x98] sm:$0x1]  ;;  %v1818_v17 = vsel %vm5169_vm14, %v4508_v53, %v1817_v39  ;;  %vm1939_vm0 = vcmask 93248  }
  0xd9   : > { %855 = vst [vmem:[#allocation2 + $0xc0] sm:$0x1] %v854_v29  ;;  %v1672_v8 = vld [vmem:[#allocation2 + $0xa0] sm:$0xf]  ;;  %1615 = vst.msk [vmem:[#allocation3 + $0x3c] sm:$0xf] %vm1599_vm15, %v1534_v47  ;;  %v857_v13 = vsel %vm4709_vm6, %v4477_v44, %v856_v56 }
  0xda   : > { %1881 = vrot.lane.b32.xlu1 %v1800_v61, %s4635_s25  ;;  %v999_v48 = vsel %vm4764_vm8, %v4494_v34, %v998_v24  ;;  %858 = vst [vmem:[#allocation2 + $0xcc] sm:$0x1] %v857_v13  ;;  %v1001_v50 = vld [vmem:[#allocation2 + $0xd4] sm:$0x1]  ;;  %v1820_v58 = vrot.slane %v1670_v49, 5  ;;  %v1824_v46 = vrot.slane %v1672_v8, 5 }
  0xdb   : > { %1000 = vst [vmem:[#allocation2 + $0xc8] sm:$0x1] %v999_v48  ;;  %v1002_v54 = vsel %vm4764_vm8, %v4495_v45, %v1001_v50  ;;  %v1671_v22 = vld [vmem:[#allocation2 + $0x9c] sm:$0xe]  ;;  %v1673_v60 = vld [vmem:[#allocation2 + $0xa4] sm:$0x1] }
  0xdc   : > { %1883 = vrot.lane.b32.xlu0 %v1804_v36, %s4635_s25  ;;  %1003 = vst [vmem:[#allocation2 + $0xd4] sm:$0x1] %v1002_v54  ;;  %v1675_v59 = vld [vmem:[#allocation2 + $0xac] sm:$0xf]  ;;  %v1532_v62 = vpop.permute.xlu0 %1531  ;;  %v4509_v12 = vrot.slane %v1671_v22, 9  ;;  %v1821_v0 = vsel %vm5169_vm14, %v1819_v40, %v1820_v58  ;;  %v1826_v52 = vrot.slane %v1824_v46, 4 }
  0xdd   : > { %1614 = vst.msk [vmem:[#allocation3 + $0x38] sm:$0xf] %vm1599_vm15, %v1532_v62  ;;  %v1827_v14 = vrot.slane %v1673_v60, 5  ;;  %v1674_v1 = vld [vmem:[#allocation2 + $0xa8] sm:$0xe]  ;;  %v1831_v3 = vrot.slane %v1675_v59, 5 }
  0xde   : > { %1885 = vrot.lane.b32.xlu1 %v1807_v5, %s4635_s25  ;;  %v1538_v51 = vpop.permute.xlu1 %1537  ;;  %v1676_v35 = vld [vmem:[#allocation2 + $0xb0] sm:$0x1]  ;;  %v1678_v7 = vld [vmem:[#allocation2 + $0xb8] sm:$0xf]  ;;  %v1825_v15 = vsel %vm5169_vm14, %v4509_v12, %v1824_v46  ;;  %v4510_v33 = vrot.slane %v1674_v1, 9  ;;  %vm2132_vm1 = vcmask 126048  }
  0xdf   : > { %1617 = vst.msk [vmem:[#allocation3 + $0x44] sm:$0xf] %vm1599_vm15, %v1538_v51  ;;  %v1828_v11 = vsel %vm5169_vm14, %v1826_v52, %v1827_v14  ;;  %v1833_v32 = vrot.slane %v1831_v3, 4  ;;  %v1834_v6 = vrot.slane %v1676_v35, 5  ;;  %v1677_v9 = vld [vmem:[#allocation2 + $0xb4] sm:$0xe] }
  0xe0   : > { %1887 = vrot.lane.b32.xlu0 %v1811_v10, %s4635_s25  ;;  %v1838_v19 = vrot.slane %v1678_v7, 5  ;;  %v1679_v38 = vld [vmem:[#allocation2 + $0xbc] sm:$0x1]  ;;  %v1832_v18 = vsel %vm5169_vm14, %v4510_v33, %v1831_v3  ;;  %v4511_v63 = vrot.slane %v1677_v9, 9  ;;  %v1972_v20 = vld [vmem:[#allocation2 + $0xc] sm:$0xf] }
  0xe1   : > { %v1835_v23 = vsel %vm5169_vm14, %v1833_v32, %v1834_v6  ;;  %v1841_v26 = vrot.slane %v1679_v38, 5  ;;  %v1973_v24 = vld [vmem:[#allocation2 + $0x10] sm:$0xf]  ;;  %v1974_v2 = vld [vmem:[#allocation2 + $0x18] sm:$0xf]  ;;  %vm2693_vm2 = vcmask 158848  }
  0xe2   : > { %1889 = vrot.lane.b32.xlu1 %v1814_v57, %s4635_s25  ;;  %v1536_v21 = vpop.permute.xlu0 %1535  ;;  %v1840_v61 = vrot.slane %v1838_v19, 4  ;;  %v1839_v4 = vsel %vm5169_vm14, %v4511_v63, %v1838_v19  ;;  %v1975_v34 = vld [vmem:[#allocation2 + $0x1c] sm:$0xf]  ;;  %v1976_v42 = vld [vmem:[#allocation2 + $0x24] sm:$0xf]  ;;  %vm3030_vm3 = vcmask 191648  }
  0xe3   : > { %1616 = vst.msk [vmem:[#allocation3 + $0x40] sm:$0xf] %vm1599_vm15, %v1536_v21  ;;  %v1977_v36 = vld [vmem:[#allocation2 + $0x28] sm:$0xf]  ;;  %v1978_v37 = vld [vmem:[#allocation2 + $0x30] sm:$0xf] }
  0xe4   : > { %1891 = vrot.lane.b32.xlu0 %v1818_v17, %s4635_s25  ;;  %v1542_v30 = vpop.permute.xlu1 %1541  ;;  %v1842_v25 = vsel %vm5169_vm14, %v1840_v61, %v1841_v26  ;;  %v1979_v44 = vld [vmem:[#allocation2 + $0x34] sm:$0xf]  ;;  %v1980_v45 = vld [vmem:[#allocation2 + $0x3c] sm:$0xf]  ;;  %v1981_v16 = vld [vmem:[#allocation2 + $0x40] sm:$0xf] }
  0xe5   : > { %1619 = vst.msk [vmem:[#allocation3 + $0x4c] sm:$0xf] %vm1599_vm15, %v1542_v30  ;;  %v1982_v55 = vld [vmem:[#allocation2 + $0x48] sm:$0xf]  ;;  %v1983_v39 = vld [vmem:[#allocation2 + $0x4c] sm:$0xf] }
  0xe6   : > { %1893 = vrot.lane.b32.xlu1 %v1821_v0, %s4635_s25  ;;  %v1984_v47 = vld [vmem:[#allocation2 + $0x54] sm:$0xf]  ;;  %v1985_v48 = vld [vmem:[#allocation2 + $0x58] sm:$0xf]  ;;  %v1986_v13 = vld [vmem:[#allocation2 + $0x60] sm:$0xf] }
  0xe7   : > { %v1987_v50 = vld [vmem:[#allocation2 + $0x64] sm:$0xf]  ;;  %v1988_v54 = vld [vmem:[#allocation2 + $0x6c] sm:$0xf]  ;;  %v1989_v57 = vld [vmem:[#allocation2 + $0x70] sm:$0xf] }
  0xe8   : > { %1895 = vrot.lane.b32.xlu0 %v1825_v15, %s4635_s25  ;;  %v1990_v40 = vld [vmem:[#allocation2 + $0x78] sm:$0xf]  ;;  %v1991_v58 = vld [vmem:[#allocation2 + $0x7c] sm:$0xf]  ;;  %v2186_v46 = vld [vmem:[#allocation2 + $0x60] sm:$0xf] }
  0xe9   : > { %v2187_v60 = vld [vmem:[#allocation2 + $0x64] sm:$0xf]  ;;  %v2382_v62 = vshrl.u32 %v2186_v46, 16  ;;  %v2385_v17 = vshll.u32 %v2186_v46, 16  ;;  %v1993_v12 = vld [vmem:[#allocation2 + $0x88] sm:$0xf] }
  0xea   : > { %1897 = vrot.lane.b32.xlu1 %v1828_v11, %s4635_s25  ;;  %v1992_v59 = vld [vmem:[#allocation2 + $0x84] sm:$0xf]  ;;  %v2391_v0 = vshll.u32 %v2187_v60, 16  ;;  %v2395_v52 = vshrl.u32 %v2187_v60, 16  ;;  %v2210_v14 = vld [vmem:[#allocation2 + $0xc0] sm:$0xf] }
  0xeb   : > { %v1540_v27 = vpop.permute.xlu0 %1539  ;;  %v2211_v1 = vld [vmem:[#allocation2 + $0xc4] sm:$0xf]  ;;  %v1994_v51 = vld [vmem:[#allocation2 + $0x90] sm:$0xf]  ;;  %v2384_v35 = vrot.slane %v2382_v62, 4  ;;  %v2387_v7 = vrot.slane %v2385_v17, 5 }
  0xec   : > { %1899 = vrot.lane.b32.xlu0 %v1832_v18, %s4635_s25  ;;  %1618 = vst.msk [vmem:[#allocation3 + $0x48] sm:$0xf] %vm1599_vm15, %v1540_v27  ;;  %v2574_v15 = vshrl.u32 %v2210_v14, 16  ;;  %v2577_v33 = vshll.u32 %v2210_v14, 16  ;;  %v1995_v11 = vld [vmem:[#allocation2 + $0x94] sm:$0xf] }
  0xed   : > { %v2393_v32 = vrot.slane %v2391_v0, 5  ;;  %v2397_v6 = vrot.slane %v2395_v52, 4  ;;  %v2583_v9 = vshll.u32 %v2211_v1, 16  ;;  %v2587_v19 = vshrl.u32 %v2211_v1, 16  ;;  %v2188_v21 = vld [vmem:[#allocation2 + $0x68] sm:$0x1] }
  0xee   : > { %1901 = vrot.lane.b32.xlu1 %v1835_v23, %s4635_s25  ;;  %v1546_v28 = vpop.permute.xlu1 %1545  ;;  %v1996_v38 = vld [vmem:[#allocation2 + $0x9c] sm:$0xf]  ;;  %v2388_v30 = vor.u32 %v2387_v7, %v2384_v35  ;;  %v2576_v18 = vrot.slane %v2574_v15, 4  ;;  %v2579_v63 = vrot.slane %v2577_v33, 5  ;;  %v1997_v61 = vld [vmem:[#allocation2 + $0xa0] sm:$0xf] }
  0xef   : > { %1621 = vst.msk [vmem:[#allocation3 + $0x54] sm:$0xf] %vm1599_vm15, %v1546_v28  ;;  %v2398_v26 = vor.u32 %v2397_v6, %v2393_v32  ;;  %v2589_v27 = vrot.slane %v2587_v19, 4  ;;  %v2212_v28 = vld [vmem:[#allocation2 + $0xc8] sm:$0x1]  ;;  %vm3224_vm4 = vcmask 224448  }
  0xf0   : > { %1903 = vrot.lane.b32.xlu0 %v1839_v4, %s4635_s25  ;;  %v2401_v4 = vshll.u32 %v2188_v21, 16  ;;  %v2771_v60 = vld [vmem:[#allocation2 + $0xc0] sm:$0xe]  ;;  %v3279_v62 = vld [vmem:[#allocation2 + $0x70] sm:$0xf]  ;;  %vm3785_vm5 = vcmask 257248  }
  0xf1   : > { %v4527_v1 = vrot.slane %v2771_v60, 9  ;;  %v3487_v33 = vshrl.u32 %v3279_v62, 16  ;;  %v3303_v6 = vld [vmem:[#allocation2 + $0xd0] sm:$0xf]  ;;  %vm4122_vm6 = vcmask 290048   ;;  %vm4268_vm7 = vcmask 293888  }
  0xf2   : > { %1905 = vrot.lane.b32.xlu1 %v1842_v25, %s4635_s25  ;;  %v1508_v29 = vpop.permute.xlu1 %1507  ;;  %v2585_v25 = vrot.slane %v2583_v9, 5 }
  0xf3   : > { %1602 = vst.msk [vmem:[#allocation3 + $0x8] sm:$0xf] %vm1599_vm15, %v1508_v29  ;;  %v2580_v29 = vor.u32 %v2579_v63, %v2576_v18 }
  0xf4   : > { %2036 = vrot.lane.b32.xlu0 %v1972_v20, %s4636_s26 }
  0xf6   : > { %2038 = vrot.lane.b32.xlu1 %v1973_v24, %s4636_s26  ;;  %v2002_v24 = vld [vmem:[#allocation2 + $0xc0] sm:$0xf] }
  0xf8   : > { %2040 = vrot.lane.b32.xlu0 %v1974_v2, %s4636_s26  ;;  %v2389_v2 = vrot.slane %v2388_v30, 4 }
  0xf9   : > { %v1544_v41 = vpop.permute.xlu0 %1543 }
  0xfa   : > { %2042 = vrot.lane.b32.xlu1 %v1975_v34, %s4636_s26  ;;  %1620 = vst.msk [vmem:[#allocation3 + $0x50] sm:$0xf] %vm1599_vm15, %v1544_v41  ;;  %v2403_v41 = vrot.slane %v2401_v4, 5  ;;  %v3679_v4 = vshrl.u32 %v3303_v6, 16 }
  0xfc   : > { %2044 = vrot.lane.b32.xlu0 %v1976_v42, %s4636_s26  ;;  %v2003_v42 = vld [vmem:[#allocation2 + $0xc4] sm:$0xf] }
  0xfd   : > { %v1548_v56 = vpop.permute.xlu0 %1547 }
  0xfe   : > { %2046 = vrot.lane.b32.xlu1 %v1977_v36, %s4636_s26  ;;  %1622 = vst.msk [vmem:[#allocation3 + $0x58] sm:$0xf] %vm1599_vm15, %v1548_v56  ;;  %v2399_v36 = vrot.slane %v2398_v26, 4  ;;  %v3675_v26 = vshll.u32 %v3303_v6, 16  ;;  %v2207_v6 = vld [vmem:[#allocation2 + $0xb4] sm:$0xf] }
 0x100   : > { %2048 = vrot.lane.b32.xlu0 %v1978_v37, %s4636_s26  ;;  %v1550_v5 = vpop.permute.xlu1 %1549  ;;  %v2590_v37 = vor.u32 %v2589_v27, %v2585_v25  ;;  %v3280_v27 = vld [vmem:[#allocation2 + $0x74] sm:$0x1] }
 0x101   : > { %1623 = vst.msk [vmem:[#allocation3 + $0x5c] sm:$0xf] %vm1599_vm15, %v1550_v5  ;;  %v2394_v5 = vsel %vm4812_vm11, %v2389_v2, %v2393_v32 }
 0x102   : > { %2050 = vrot.lane.b32.xlu1 %v1979_v44, %s4636_s26  ;;  %v2593_v44 = vshll.u32 %v2212_v28, 16 }
 0x104   : > { %2052 = vrot.lane.b32.xlu0 %v1980_v45, %s4636_s26  ;;  %v2748_v45 = vld [vmem:[#allocation2 + $0x64] sm:$0xf] }
 0x106   : > { %2054 = vrot.lane.b32.xlu1 %v1981_v16, %s4636_s26  ;;  %v2581_v16 = vrot.slane %v2580_v29, 4 }
 0x108   : > { %2056 = vrot.lane.b32.xlu0 %v1982_v55, %s4636_s26  ;;  %v2747_v55 = vld [vmem:[#allocation2 + $0x60] sm:$0xe] }
 0x109   : > { %v1554_v49 = vpop.permute.xlu1 %1553 }
 0x10a   : > { %2058 = vrot.lane.b32.xlu1 %v1983_v39, %s4636_s26  ;;  %1625 = vst.msk [vmem:[#allocation3 + $0x64] sm:$0xf] %vm1599_vm15, %v1554_v49  ;;  %v2595_v49 = vrot.slane %v2593_v44, 5 }
 0x10b   : > { %v1552_v8 = vpop.permute.xlu0 %1551 }
 0x10c   : > { %2060 = vrot.lane.b32.xlu0 %v1984_v47, %s4636_s26  ;;  %1624 = vst.msk [vmem:[#allocation3 + $0x60] sm:$0xf] %vm1599_vm15, %v1552_v8  ;;  %v2404_v47 = vsel %vm4812_vm11, %v2399_v36, %v2403_v41  ;;  %v2873_v8 = vrot.slane %v2748_v45, 5  ;;  %v3493_v36 = vshll.u32 %v3280_v27, 16  ;;  %v3677_v41 = vrot.slane %v3675_v26, 5 }
 0x10d   : > { %v3094_v45 = vld [vmem:[#allocation2 + $0xcc] sm:$0xf] }
 0x10e   : > { %2062 = vrot.lane.b32.xlu1 %v1985_v48, %s4636_s26  ;;  %v2591_v48 = vrot.slane %v2590_v37, 4  ;;  %v2875_v46 = vrot.slane %v2873_v8, 4  ;;  %v3681_v37 = vrot.slane %v3679_v4, 4  ;;  %v2550_v4 = vshrl.u32 %v2207_v6, 16 }
 0x10f   : > { %v1558_v10 = vpop.permute.xlu1 %1557  ;;  %v1556_v53 = vpop.permute.xlu0 %1555 }
 0x110   : > { %2064 = vrot.lane.b32.xlu0 %v1986_v13, %s4636_s26  ;;  %1627 = vst.msk [vmem:[#allocation3 + $0x6c] sm:$0xf] %vm1599_vm15, %v1558_v10  ;;  %1626 = vst.msk [vmem:[#allocation3 + $0x68] sm:$0xf] %vm1599_vm15, %v1556_v53  ;;  %v2749_v13 = vld [vmem:[#allocation2 + $0x68] sm:$0x1]  ;;  %v2586_v53 = vsel %vm4812_vm11, %v2581_v16, %v2585_v25 }
 0x111   : > { %v2772_v10 = vld [vmem:[#allocation2 + $0xc4] sm:$0xf] }
 0x112   : > { %2066 = vrot.lane.b32.xlu1 %v1987_v50, %s4636_s26 }
 0x114   : > { %2068 = vrot.lane.b32.xlu0 %v1988_v54, %s4636_s26  ;;  %v4519_v54 = vrot.slane %v2747_v55, 9  ;;  %v3840_v55 = vld [vmem:[#allocation2 + $0x70] sm:$0xf] }
 0x116   : > { %2070 = vrot.lane.b32.xlu1 %v1989_v57, %s4636_s26  ;;  %v1560_v22 = vpop.permute.xlu0 %1559  ;;  %v2876_v57 = vrot.slane %v2749_v13, 5  ;;  %v2874_v14 = vsel %vm5169_vm14, %v4519_v54, %v2873_v8  ;;  %v3682_v8 = vor.u32 %v3681_v37, %v3677_v41  ;;  %v3841_v54 = vld [vmem:[#allocation2 + $0x74] sm:$0x1]  ;;  %v2552_v37 = vrot.slane %v2550_v4, 4 }
 0x117   : > { %1628 = vst.msk [vmem:[#allocation3 + $0x70] sm:$0xf] %vm1599_vm15, %v1560_v22  ;;  %v2596_v22 = vsel %vm4812_vm11, %v2591_v48, %v2595_v49  ;;  %v3495_v49 = vrot.slane %v3493_v36, 5 }
 0x118   : > { %2072 = vrot.lane.b32.xlu0 %v1990_v40, %s4636_s26  ;;  %v3278_v40 = vld [vmem:[#allocation2 + $0x6c] sm:$0xf]  ;;  %v2877_v35 = vsel %vm5169_vm14, %v2875_v46, %v2876_v57 }
 0x119   : > { %v3474_v0 = vshrl.u32 %v3278_v40, 16  ;;  %v3477_v52 = vshll.u32 %v3278_v40, 16 }
 0x11a   : > { %2074 = vrot.lane.b32.xlu1 %v1991_v58, %s4636_s26 }
 0x11b   : > { %v1562_v3 = vpop.permute.xlu1 %1561  ;;  %v3476_v9 = vrot.slane %v3474_v0, 4  ;;  %v3479_v19 = vrot.slane %v3477_v52, 5 }
 0x11c   : > { %2076 = vrot.lane.b32.xlu0 %v1992_v59, %s4636_s26  ;;  %1629 = vst.msk [vmem:[#allocation3 + $0x74] sm:$0xf] %vm1599_vm15, %v1562_v3  ;;  %v2929_v59 = vrot.slane %v2772_v10, 5  ;;  %v3483_v3 = vshll.u32 %v3279_v62, 16  ;;  %v3839_v10 = vld [vmem:[#allocation2 + $0x6c] sm:$0xe] }
 0x11d   : > { %v3480_v28 = vor.u32 %v3479_v19, %v3476_v9  ;;  %v4535_v0 = vrot.slane %v3839_v10, 9 }
 0x11e   : > { %2078 = vrot.lane.b32.xlu1 %v1993_v12, %s4636_s26  ;;  %v2773_v12 = vld [vmem:[#allocation2 + $0xc8] sm:$0x1]  ;;  %v2931_v7 = vrot.slane %v2929_v59, 4  ;;  %v2930_v21 = vsel %vm5169_vm14, %v4527_v1, %v2929_v59  ;;  %v3683_v59 = vrot.slane %v3682_v8, 4  ;;  %v3863_v1 = vld [vmem:[#allocation2 + $0xcc] sm:$0xe] }
 0x11f   : > { %v2932_v15 = vrot.slane %v2773_v12, 5  ;;  %v4543_v19 = vrot.slane %v3863_v1, 9  ;;  %v2746_v1 = vld [vmem:[#allocation2 + $0x5c] sm:$0x1] }
 0x120   : > { %2080 = vrot.lane.b32.xlu0 %v1994_v51, %s4636_s26 }
 0x122   : > { %2082 = vrot.lane.b32.xlu1 %v1995_v11, %s4636_s26  ;;  %v1564_v23 = vpop.permute.xlu0 %1563  ;;  %v3302_v11 = vld [vmem:[#allocation2 + $0xcc] sm:$0xf] }
 0x123   : > { %1630 = vst.msk [vmem:[#allocation3 + $0x78] sm:$0xf] %vm1599_vm15, %v1564_v23  ;;  %v3666_v30 = vshrl.u32 %v3302_v11, 16  ;;  %v3669_v18 = vshll.u32 %v3302_v11, 16  ;;  %v2933_v23 = vsel %vm5169_vm14, %v2931_v7, %v2932_v15 }
 0x124   : > { %v1566_v20 = vpop.permute.xlu1 %1565  ;;  %2084 = vrot.lane.b32.xlu0 %v1996_v38, %s4636_s26  ;;  %v5416_v38 = vrot.slane %v3483_v3, 5 }
 0x125   : > { %1631 = vst.msk [vmem:[#allocation3 + $0x7c] sm:$0xf] %vm1599_vm15, %v1566_v20  ;;  %v3078_v20 = vld [vmem:[#allocation2 + $0x6c] sm:$0xf]  ;;  %v3671_v2 = vrot.slane %v3669_v18, 5 }
 0x126   : > { %2086 = vrot.lane.b32.xlu1 %v1997_v61, %s4636_s26  ;;  %v1844_v34 = vpop.permute.xlu0 %1843  ;;  %v3489_v61 = vrot.slane %v3487_v33, 4 }
 0x127   : > { %1940 = vst.msk [vmem:[#allocation3] sm:$0xf] %vm1939_vm0, %v1844_v34  ;;  %v3079_v34 = vld [vmem:[#allocation2 + $0x70] sm:$0xf] }
 0x128   : > { %v1846_v56 = vpop.permute.xlu1 %1845  ;;  %2096 = vrot.lane.b32.xlu0 %v2002_v24, %s4636_s26  ;;  %v3668_v24 = vrot.slane %v3666_v30, 4 }
 0x129   : > { %1941 = vst.msk [vmem:[#allocation3 + $0x4] sm:$0xf] %vm1939_vm0, %v1846_v56  ;;  %v3304_v56 = vld [vmem:[#allocation2 + $0xd4] sm:$0x1] }
 0x12a   : > { %2098 = vrot.lane.b32.xlu1 %v2003_v42, %s4636_s26  ;;  %v1848_v39 = vpop.permute.xlu0 %1847  ;;  %v3490_v42 = vor.u32 %v3489_v61, %v5416_v38  ;;  %v3672_v16 = vor.u32 %v3671_v2, %v3668_v24  ;;  %v3685_v13 = vshll.u32 %v3304_v56, 16 }
 0x12b   : > { %1942 = vst.msk [vmem:[#allocation3 + $0x8] sm:$0xf] %vm1939_vm0, %v1848_v39 }
 0x12c   : > { %v1850_v50 = vpop.permute.xlu1 %1849  ;;  %2625 = vrot.lane.b32.xlu0 %v2394_v5, %s4637_s27  ;;  %v3481_v5 = vrot.slane %v3480_v28, 4  ;;  %v3491_v48 = vrot.slane %v3490_v42, 4  ;;  %v3673_v40 = vrot.slane %v3672_v16, 4  ;;  %v3687_v62 = vrot.slane %v3685_v13, 5  ;;  %v2185_v28 = vld [vmem:[#allocation2 + $0x5c] sm:$0x1] }
 0x12d   : > { %1943 = vst.msk [vmem:[#allocation3 + $0xc] sm:$0xf] %vm1939_vm0, %v1850_v50 }
 0x12e   : > { %2627 = vrot.lane.b32.xlu1 %v2404_v47, %s4637_s27  ;;  %v1852_v58 = vpop.permute.xlu0 %1851  ;;  %v3095_v47 = vld [vmem:[#allocation2 + $0xd0] sm:$0xf]  ;;  %v3486_v57 = vsel %vm4812_vm11, %v3481_v5, %v5416_v38  ;;  %v3496_v60 = vsel %vm4812_vm11, %v3491_v48, %v3495_v49  ;;  %v3688_v11 = vsel %vm4812_vm11, %v3683_v59, %v3687_v62  ;;  %v2208_v38 = vld [vmem:[#allocation2 + $0xb8] sm:$0xf]  ;;  %v2000_v48 = vld [vmem:[#allocation2 + $0xb4] sm:$0xf] }
 0x12f   : > { %1944 = vst.msk [vmem:[#allocation3 + $0x10] sm:$0xf] %vm1939_vm0, %v1852_v58  ;;  %v3864_v58 = vld [vmem:[#allocation2 + $0xd0] sm:$0xf]  ;;  %v2559_v2 = vshll.u32 %v2208_v38, 16 }
 0x130   : > { %v1854_v17 = vpop.permute.xlu1 %1853  ;;  %2657 = vrot.lane.b32.xlu0 %v2586_v53, %s4637_s27  ;;  %v3965_v53 = vrot.slane %v3840_v55, 5  ;;  %v4021_v3 = vrot.slane %v3864_v58, 5  ;;  %v2745_v58 = vld [vmem:[#allocation2 + $0x58] sm:$0xf] }
 0x131   : > { %1945 = vst.msk [vmem:[#allocation3 + $0x14] sm:$0xf] %vm1939_vm0, %v1854_v17  ;;  %v2184_v17 = vld [vmem:[#allocation2 + $0x58] sm:$0xf]  ;;  %v2561_v16 = vrot.slane %v2559_v2, 5 }
 0x132   : > { %2659 = vrot.lane.b32.xlu1 %v2596_v22, %s4637_s27  ;;  %v1856_v51 = vpop.permute.xlu0 %1855  ;;  %v2183_v22 = vld [vmem:[#allocation2 + $0x54] sm:$0xf]  ;;  %v3967_v52 = vrot.slane %v3965_v53, 4  ;;  %v2367_v15 = vshll.u32 %v2184_v17, 16  ;;  %v3966_v30 = vsel %vm5169_vm14, %v4535_v0, %v3965_v53  ;;  %v4022_v42 = vsel %vm5169_vm14, %v4543_v19, %v4021_v3 }
 0x133   : > { %1946 = vst.msk [vmem:[#allocation3 + $0x18] sm:$0xf] %vm1939_vm0, %v1856_v51  ;;  %v2358_v51 = vshrl.u32 %v2183_v22, 16  ;;  %v2361_v7 = vshll.u32 %v2183_v22, 16  ;;  %v2744_v0 = vld [vmem:[#allocation2 + $0x54] sm:$0xe] }
 0x134   : > { %v1858_v32 = vpop.permute.xlu1 %1857  ;;  %2962 = vrot.lane.b32.xlu0 %v2874_v14, %s4638_s28  ;;  %v3968_v14 = vrot.slane %v3841_v54, 5  ;;  %v2369_v26 = vrot.slane %v2367_v15, 5  ;;  %v2770_v15 = vld [vmem:[#allocation2 + $0xbc] sm:$0x1] }
 0x135   : > { %1947 = vst.msk [vmem:[#allocation3 + $0x1c] sm:$0xf] %vm1939_vm0, %v1858_v32  ;;  %v2371_v32 = vshrl.u32 %v2184_v17, 16  ;;  %v2363_v61 = vrot.slane %v2361_v7, 5  ;;  %v2768_v7 = vld [vmem:[#allocation2 + $0xb4] sm:$0xe] }
 0x136   : > { %2964 = vrot.lane.b32.xlu1 %v2877_v35, %s4638_s28  ;;  %v1860_v63 = vpop.permute.xlu0 %1859  ;;  %v3678_v35 = vsel %vm4812_vm11, %v3673_v40, %v3677_v41  ;;  %v3969_v18 = vsel %vm5169_vm14, %v3967_v52, %v3968_v14  ;;  %v2377_v41 = vshll.u32 %v2185_v28, 16  ;;  %v2866_v52 = vrot.slane %v2745_v58, 5  ;;  %v3092_v58 = vld [vmem:[#allocation2 + $0xc0] sm:$0xf] }
 0x137   : > { %1948 = vst.msk [vmem:[#allocation3 + $0x20] sm:$0xf] %vm1939_vm0, %v1860_v63  ;;  %v4023_v63 = vrot.slane %v4021_v3, 4  ;;  %v2373_v24 = vrot.slane %v2371_v32, 4 }
 0x138   : > { %v1862_v25 = vpop.permute.xlu1 %1861  ;;  %2994 = vrot.lane.b32.xlu0 %v2930_v21, %s4638_s28  ;;  %v3865_v21 = vld [vmem:[#allocation2 + $0xd4] sm:$0x1]  ;;  %v2379_v53 = vrot.slane %v2377_v41, 5  ;;  %v2868_v32 = vrot.slane %v2866_v52, 4 }
 0x139   : > { %1949 = vst.msk [vmem:[#allocation3 + $0x24] sm:$0xf] %vm1939_vm0, %v1862_v25  ;;  %v2553_v25 = vshll.u32 %v2207_v6, 16  ;;  %v2374_v5 = vor.u32 %v2373_v24, %v2369_v26  ;;  %v2869_v6 = vrot.slane %v2746_v1, 5  ;;  %v3300_v24 = vld [vmem:[#allocation2 + $0xc4] sm:$0xf] }
 0x13a   : > { %2996 = vrot.lane.b32.xlu1 %v2933_v23, %s4638_s28  ;;  %v1864_v29 = vpop.permute.xlu0 %1863  ;;  %v2360_v23 = vrot.slane %v2358_v51, 4  ;;  %v3836_v1 = vld [vmem:[#allocation2 + $0x60] sm:$0xe] }
 0x13b   : > { %1950 = vst.msk [vmem:[#allocation3 + $0x28] sm:$0xf] %vm1939_vm0, %v1864_v29  ;;  %v2563_v29 = vshrl.u32 %v2208_v38, 16  ;;  %v2375_v10 = vrot.slane %v2374_v5, 4  ;;  %v4526_v38 = vrot.slane %v2768_v7, 9  ;;  %v2870_v4 = vsel %vm5169_vm14, %v2868_v32, %v2869_v6 }
 0x13c   : > { %v1866_v44 = vpop.permute.xlu1 %1865  ;;  %3156 = vrot.lane.b32.xlu0 %v3078_v20, %s4639_s29  ;;  %v4024_v20 = vrot.slane %v3865_v21, 5  ;;  %v2364_v36 = vor.u32 %v2363_v61, %v2360_v23  ;;  %v3276_v21 = vld [vmem:[#allocation2 + $0x64] sm:$0xf]  ;;  %v3655_v5 = vshrl.u32 %v3300_v24, 16  ;;  %v3838_v7 = vld [vmem:[#allocation2 + $0x68] sm:$0x1] }
 0x13d   : > { %1951 = vst.msk [vmem:[#allocation3 + $0x2c] sm:$0xf] %vm1939_vm0, %v1866_v44  ;;  %v2555_v44 = vrot.slane %v2553_v25, 5  ;;  %v2565_v55 = vrot.slane %v2563_v29, 4  ;;  %v2380_v62 = vsel %vm4812_vm11, %v2375_v10, %v2379_v53  ;;  %v3459_v25 = vshll.u32 %v3276_v21, 16 }
 0x13e   : > { %3158 = vrot.lane.b32.xlu1 %v3079_v34, %s4639_s29  ;;  %v1868_v39 = vpop.permute.xlu0 %1867  ;;  %v2365_v49 = vrot.slane %v2364_v36, 4 }
 0x13f   : > { %1952 = vst.msk [vmem:[#allocation3 + $0x30] sm:$0xf] %vm1939_vm0, %v1868_v39  ;;  %v2556_v8 = vor.u32 %v2555_v44, %v2552_v37  ;;  %v2566_v54 = vor.u32 %v2565_v55, %v2561_v16  ;;  %v3461_v44 = vrot.slane %v3459_v25, 5  ;;  %v3277_v55 = vld [vmem:[#allocation2 + $0x68] sm:$0x1] }
 0x140   : > { %v1870_v50 = vpop.permute.xlu1 %1869  ;;  %3188 = vrot.lane.b32.xlu0 %v3094_v45, %s4639_s29  ;;  %v4025_v45 = vsel %vm5169_vm14, %v4023_v63, %v4024_v20  ;;  %v2370_v22 = vsel %vm4812_vm11, %v2365_v49, %v2369_v26  ;;  %v3299_v20 = vld [vmem:[#allocation2 + $0xc0] sm:$0xf]  ;;  %v3469_v10 = vshll.u32 %v3277_v55, 16 }
 0x141   : > { %1953 = vst.msk [vmem:[#allocation3 + $0x34] sm:$0xf] %vm1939_vm0, %v1870_v50  ;;  %v2001_v50 = vld [vmem:[#allocation2 + $0xb8] sm:$0xf]  ;;  %v2567_v17 = vrot.slane %v2566_v54, 4  ;;  %v3642_v36 = vshrl.u32 %v3299_v20, 16 }
 0x142   : > { %3190 = vrot.lane.b32.xlu1 %v3095_v47, %s4639_s29  ;;  %v1872_v46 = vpop.permute.xlu0 %1871  ;;  %v2209_v47 = vld [vmem:[#allocation2 + $0xbc] sm:$0x1]  ;;  %v3645_v41 = vshll.u32 %v3299_v20, 16  ;;  %v3657_v54 = vrot.slane %v3655_v5, 4 }
 0x143   : > { %1954 = vst.msk [vmem:[#allocation3 + $0x38] sm:$0xf] %vm1939_vm0, %v1872_v46  ;;  %v2557_v46 = vrot.slane %v2556_v8, 4 }
 0x144   : > { %v1874_v12 = vpop.permute.xlu1 %1873  ;;  %3717 = vrot.lane.b32.xlu0 %v3486_v57, %s4640_s30  ;;  %v2569_v57 = vshll.u32 %v2209_v47, 16  ;;  %v3647_v49 = vrot.slane %v3645_v41, 5 }
 0x145   : > { %1955 = vst.msk [vmem:[#allocation3 + $0x3c] sm:$0xf] %vm1939_vm0, %v1874_v12  ;;  %v2562_v51 = vsel %vm4812_vm11, %v2557_v46, %v2561_v16 }
 0x146   : > { %3719 = vrot.lane.b32.xlu1 %v3496_v60, %s4640_s30  ;;  %v1876_v33 = vpop.permute.xlu0 %1875  ;;  %v2769_v60 = vld [vmem:[#allocation2 + $0xb8] sm:$0xf]  ;;  %v2571_v12 = vrot.slane %v2569_v57, 5 }
 0x147   : > { %1956 = vst.msk [vmem:[#allocation3 + $0x40] sm:$0xf] %vm1939_vm0, %v1876_v33  ;;  %v2922_v3 = vrot.slane %v2769_v60, 5  ;;  %v3837_v60 = vld [vmem:[#allocation2 + $0x64] sm:$0xf] }
 0x148   : > { %v1878_v9 = vpop.permute.xlu1 %1877  ;;  %3749 = vrot.lane.b32.xlu0 %v3678_v35, %s4640_s30  ;;  %v4518_v35 = vrot.slane %v2744_v0, 9 }
 0x149   : > { %1957 = vst.msk [vmem:[#allocation3 + $0x44] sm:$0xf] %vm1939_vm0, %v1878_v9  ;;  %v3275_v9 = vld [vmem:[#allocation2 + $0x60] sm:$0xf]  ;;  %v2923_v2 = vsel %vm5169_vm14, %v4526_v38, %v2922_v3  ;;  %v2181_v38 = vld [vmem:[#allocation2 + $0x4c] sm:$0xf] }
 0x14a   : > { %3751 = vrot.lane.b32.xlu1 %v3688_v11, %s4640_s30  ;;  %v1880_v27 = vpop.permute.xlu0 %1879  ;;  %v2572_v11 = vsel %vm4812_vm11, %v2567_v17, %v2571_v12  ;;  %v2867_v63 = vsel %vm5169_vm14, %v4518_v35, %v2866_v52  ;;  %v3450_v23 = vshrl.u32 %v3275_v9, 16  ;;  %v3453_v61 = vshll.u32 %v3275_v9, 16  ;;  %v2180_v9 = vld [vmem:[#allocation2 + $0x48] sm:$0xf] }
 0x14b   : > { %1958 = vst.msk [vmem:[#allocation3 + $0x48] sm:$0xf] %vm1939_vm0, %v1880_v27  ;;  %v3463_v27 = vshrl.u32 %v3276_v21, 16  ;;  %v3471_v12 = vrot.slane %v3469_v10, 5  ;;  %v4534_v21 = vrot.slane %v3836_v1, 9  ;;  %v2337_v25 = vshll.u32 %v2180_v9, 16 }
 0x14c   : > { %v1882_v34 = vpop.permute.xlu1 %1881  ;;  %4054 = vrot.lane.b32.xlu0 %v3966_v30, %s4641_s6  ;;  %v2924_v30 = vrot.slane %v2922_v3, 4  ;;  %v3958_v3 = vrot.slane %v3837_v60, 5 }
 0x14d   : > { %1959 = vst.msk [vmem:[#allocation3 + $0x4c] sm:$0xf] %vm1939_vm0, %v1882_v34  ;;  %v3452_v34 = vrot.slane %v3450_v23, 4 }
 0x14e   : > { %4056 = vrot.lane.b32.xlu1 %v3969_v18, %s4641_s6  ;;  %v1884_v56 = vpop.permute.xlu0 %1883  ;;  %v2925_v18 = vrot.slane %v2770_v15, 5  ;;  %v3861_v15 = vld [vmem:[#allocation2 + $0xc4] sm:$0xf] }
 0x14f   : > { %1960 = vst.msk [vmem:[#allocation3 + $0x50] sm:$0xf] %vm1939_vm0, %v1884_v56  ;;  %v3465_v56 = vrot.slane %v3463_v27, 4 }
 0x150   : > { %v1886_v39 = vpop.permute.xlu1 %1885  ;;  %4086 = vrot.lane.b32.xlu0 %v4022_v42, %s4641_s6  ;;  %v2926_v29 = vsel %vm5169_vm14, %v2924_v30, %v2925_v18  ;;  %v3455_v42 = vrot.slane %v3453_v61, 5  ;;  %v3960_v30 = vrot.slane %v3958_v3, 4  ;;  %v3961_v18 = vrot.slane %v3838_v7, 5  ;;  %v3860_v61 = vld [vmem:[#allocation2 + $0xc0] sm:$0xe] }
 0x151   : > { %1961 = vst.msk [vmem:[#allocation3 + $0x54] sm:$0xf] %vm1939_vm0, %v1886_v39  ;;  %v3076_v39 = vld [vmem:[#allocation2 + $0x60] sm:$0xf]  ;;  %v4542_v41 = vrot.slane %v3860_v61, 9 }
 0x152   : > { %4088 = vrot.lane.b32.xlu1 %v4025_v45, %s4641_s6  ;;  %v1888_v13 = vpop.permute.xlu0 %1887  ;;  %v3651_v45 = vshll.u32 %v3300_v24, 16  ;;  %v3456_v47 = vor.u32 %v3455_v42, %v3452_v34  ;;  %v2347_v24 = vshrl.u32 %v2181_v38, 16  ;;  %v3959_v34 = vsel %vm5169_vm14, %v4534_v21, %v3958_v3  ;;  %v2205_v42 = vld [vmem:[#allocation2 + $0xac] sm:$0xf] }
 0x153   : > { %1962 = vst.msk [vmem:[#allocation3 + $0x58] sm:$0xf] %vm1939_vm0, %v1888_v13  ;;  %v3077_v13 = vld [vmem:[#allocation2 + $0x64] sm:$0xf]  ;;  %v2742_v7 = vld [vmem:[#allocation2 + $0x4c] sm:$0xf] }
 0x154   : > { %v1890_v40 = vpop.permute.xlu1 %1889  ;;  %2092 = vrot.lane.b32.xlu0 %v2000_v48, %s4636_s26  ;;  %v3644_v48 = vrot.slane %v3642_v36, 4  ;;  %v3653_v53 = vrot.slane %v3651_v45, 5  ;;  %v3962_v36 = vsel %vm5169_vm14, %v3960_v30, %v3961_v18  ;;  %v2339_v45 = vrot.slane %v2337_v25, 5  ;;  %v2743_v30 = vld [vmem:[#allocation2 + $0x50] sm:$0x1] }
 0x155   : > { %1963 = vst.msk [vmem:[#allocation3 + $0x5c] sm:$0xf] %vm1939_vm0, %v1890_v40  ;;  %v3301_v40 = vld [vmem:[#allocation2 + $0xc8] sm:$0x1] }
 0x156   : > { %2094 = vrot.lane.b32.xlu1 %v2001_v50, %s4636_s26  ;;  %v1892_v59 = vpop.permute.xlu0 %1891  ;;  %v3466_v50 = vor.u32 %v3465_v56, %v3461_v44  ;;  %v3648_v46 = vor.u32 %v3647_v49, %v3644_v48  ;;  %v3658_v0 = vor.u32 %v3657_v54, %v3653_v53  ;;  %v3661_v52 = vshll.u32 %v3301_v40, 16 }
 0x157   : > { %1964 = vst.msk [vmem:[#allocation3 + $0x60] sm:$0xf] %vm1939_vm0, %v1892_v59  ;;  %v2535_v48 = vshll.u32 %v2205_v42, 16  ;;  %v2539_v49 = vshrl.u32 %v2205_v42, 16 }
 0x158   : > { %v1894_v14 = vpop.permute.xlu1 %1893  ;;  %2621 = vrot.lane.b32.xlu0 %v2370_v22, %s4637_s27  ;;  %v3457_v22 = vrot.slane %v3456_v47, 4  ;;  %v3467_v17 = vrot.slane %v3466_v50, 4  ;;  %v3649_v35 = vrot.slane %v3648_v46, 4  ;;  %v3659_v32 = vrot.slane %v3658_v0, 4 }
 0x159   : > { %1965 = vst.msk [vmem:[#allocation3 + $0x64] sm:$0xf] %vm1939_vm0, %v1894_v14  ;;  %v3663_v6 = vrot.slane %v3661_v52, 5  ;;  %v2349_v47 = vrot.slane %v2347_v24, 4  ;;  %v2537_v46 = vrot.slane %v2535_v48, 5  ;;  %v2541_v60 = vrot.slane %v2539_v49, 4 }
 0x15a   : > { %2623 = vrot.lane.b32.xlu1 %v2380_v62, %s4637_s27  ;;  %v1896_v33 = vpop.permute.xlu0 %1895  ;;  %v3093_v62 = vld [vmem:[#allocation2 + $0xc4] sm:$0xf]  ;;  %v3654_v23 = vsel %vm4812_vm11, %v3649_v35, %v3653_v53  ;;  %v3272_v24 = vld [vmem:[#allocation2 + $0x54] sm:$0xf] }
 0x15b   : > { %1966 = vst.msk [vmem:[#allocation3 + $0x68] sm:$0xf] %vm1939_vm0, %v1896_v33  ;;  %v3664_v20 = vsel %vm4812_vm11, %v3659_v32, %v3663_v6  ;;  %v2741_v32 = vld [vmem:[#allocation2 + $0x48] sm:$0xe]  ;;  %v2859_v6 = vrot.slane %v2742_v7, 5 }
 0x15c   : > { %v1898_v19 = vpop.permute.xlu1 %1897  ;;  %2653 = vrot.lane.b32.xlu0 %v2562_v51, %s4637_s27  ;;  %v3462_v51 = vsel %vm4812_vm11, %v3457_v22, %v3461_v44 }
 0x15d   : > { %1967 = vst.msk [vmem:[#allocation3 + $0x6c] sm:$0xf] %vm1939_vm0, %v1898_v19 }
 0x15e   : > { %2655 = vrot.lane.b32.xlu1 %v2572_v11, %s4637_s27  ;;  %v1900_v26 = vpop.permute.xlu0 %1899  ;;  %v3472_v11 = vsel %vm4812_vm11, %v3467_v17, %v3471_v12  ;;  %v1998_v17 = vld [vmem:[#allocation2 + $0xa8] sm:$0xf]  ;;  %v1999_v12 = vld [vmem:[#allocation2 + $0xac] sm:$0xf] }
 0x15f   : > { %1968 = vst.msk [vmem:[#allocation3 + $0x70] sm:$0xf] %vm1939_vm0, %v1900_v26  ;;  %v3862_v26 = vld [vmem:[#allocation2 + $0xc8] sm:$0x1] }
 0x160   : > { %v1902_v28 = vpop.permute.xlu1 %1901  ;;  %2958 = vrot.lane.b32.xlu0 %v2867_v63, %s4638_s28  ;;  %v4014_v63 = vrot.slane %v3861_v15, 5  ;;  %v4017_v44 = vrot.slane %v3862_v26, 5  ;;  %v2861_v26 = vrot.slane %v2859_v6, 4 }
 0x161   : > { %1969 = vst.msk [vmem:[#allocation3 + $0x74] sm:$0xf] %vm1939_vm0, %v1902_v28  ;;  %v2343_v28 = vshll.u32 %v2181_v38, 16 }
 0x162   : > { %2960 = vrot.lane.b32.xlu1 %v2870_v4, %s4638_s28  ;;  %v1904_v37 = vpop.permute.xlu0 %1903  ;;  %v2334_v4 = vshrl.u32 %v2180_v9, 16  ;;  %v4015_v50 = vsel %vm5169_vm14, %v4542_v41, %v4014_v63 }
 0x163   : > { %1970 = vst.msk [vmem:[#allocation3 + $0x78] sm:$0xf] %vm1939_vm0, %v1904_v37  ;;  %v4016_v37 = vrot.slane %v4014_v63, 4  ;;  %v2766_v63 = vld [vmem:[#allocation2 + $0xac] sm:$0xf] }
 0x164   : > { %v1906_v16 = vpop.permute.xlu1 %1905  ;;  %2990 = vrot.lane.b32.xlu0 %v2923_v2, %s4638_s28  ;;  %v2204_v2 = vld [vmem:[#allocation2 + $0xa8] sm:$0xf]  ;;  %v2336_v56 = vrot.slane %v2334_v4, 4  ;;  %v2862_v4 = vrot.slane %v2743_v30, 5 }
 0x165   : > { %1971 = vst.msk [vmem:[#allocation3 + $0x7c] sm:$0xf] %vm1939_vm0, %v1906_v16  ;;  %v2526_v5 = vshrl.u32 %v2204_v2, 16  ;;  %v2529_v16 = vshll.u32 %v2204_v2, 16  ;;  %v4018_v10 = vsel %vm5169_vm14, %v4016_v37, %v4017_v44  ;;  %v3426_v44 = vshrl.u32 %v3272_v24, 16 }
 0x166   : > { %2992 = vrot.lane.b32.xlu1 %v2926_v29, %s4638_s28  ;;  %v2037_v8 = vpop.permute.xlu0 %2036  ;;  %v2340_v53 = vor.u32 %v2339_v45, %v2336_v56  ;;  %v2863_v41 = vsel %vm5169_vm14, %v2861_v26, %v2862_v4  ;;  %v3429_v56 = vshll.u32 %v3272_v24, 16  ;;  %v3297_v45 = vld [vmem:[#allocation2 + $0xb8] sm:$0xf] }
 0x167   : > { %2133 = vst.msk [vmem:[#allocation3] sm:$0xf] %vm2132_vm1, %v2037_v8  ;;  %v2528_v54 = vrot.slane %v2526_v5, 4  ;;  %v3858_v24 = vld [vmem:[#allocation2 + $0xb8] sm:$0xf] }
 0x168   : > { %v2039_v57 = vpop.permute.xlu1 %2038  ;;  %3152 = vrot.lane.b32.xlu0 %v3076_v39, %s4639_s29  ;;  %v2345_v39 = vrot.slane %v2343_v28, 5  ;;  %v2341_v0 = vrot.slane %v2340_v53, 4  ;;  %v2915_v28 = vrot.slane %v2766_v63, 5  ;;  %v3428_v53 = vrot.slane %v3426_v44, 4 }
 0x169   : > { %2134 = vst.msk [vmem:[#allocation3 + $0x4] sm:$0xf] %vm2132_vm1, %v2039_v57  ;;  %v2531_v57 = vrot.slane %v2529_v16, 5 }
 0x16a   : > { %3154 = vrot.lane.b32.xlu1 %v3077_v13, %s4639_s29  ;;  %v2041_v59 = vpop.permute.xlu0 %2040  ;;  %v2182_v13 = vld [vmem:[#allocation2 + $0x50] sm:$0x1]  ;;  %v2917_v16 = vrot.slane %v2915_v28, 4 }
 0x16b   : > { %2135 = vst.msk [vmem:[#allocation3 + $0x8] sm:$0xf] %vm2132_vm1, %v2041_v59  ;;  %v2353_v22 = vshll.u32 %v2182_v13, 16  ;;  %v2532_v52 = vor.u32 %v2531_v57, %v2528_v54  ;;  %v3627_v13 = vshll.u32 %v3297_v45, 16  ;;  %v3431_v54 = vrot.slane %v3429_v56, 5 }
 0x16c   : > { %v2043_v14 = vpop.permute.xlu1 %2042  ;;  %3184 = vrot.lane.b32.xlu0 %v3092_v58, %s4639_s29  ;;  %v2350_v58 = vor.u32 %v2349_v47, %v2345_v39 }
 0x16d   : > { %2136 = vst.msk [vmem:[#allocation3 + $0xc] sm:$0xf] %vm2132_vm1, %v2043_v14  ;;  %v2355_v3 = vrot.slane %v2353_v22, 5 }
 0x16e   : > { %3186 = vrot.lane.b32.xlu1 %v3093_v62, %s4639_s29  ;;  %v2045_v33 = vpop.permute.xlu0 %2044  ;;  %v2206_v62 = vld [vmem:[#allocation2 + $0xb0] sm:$0x1]  ;;  %v2351_v1 = vrot.slane %v2350_v58, 4 }
 0x16f   : > { %2137 = vst.msk [vmem:[#allocation3 + $0x10] sm:$0xf] %vm2132_vm1, %v2045_v33  ;;  %v2545_v35 = vshll.u32 %v2206_v62, 16  ;;  %v2346_v33 = vsel %vm4812_vm11, %v2341_v0, %v2345_v39  ;;  %v3074_v0 = vld [vmem:[#allocation2 + $0x54] sm:$0xf] }
 0x170   : > { %v2047_v19 = vpop.permute.xlu1 %2046  ;;  %3713 = vrot.lane.b32.xlu0 %v3462_v51, %s4640_s30  ;;  %v2542_v51 = vor.u32 %v2541_v60, %v2537_v46  ;;  %v3274_v60 = vld [vmem:[#allocation2 + $0x5c] sm:$0x1] }
 0x171   : > { %2138 = vst.msk [vmem:[#allocation3 + $0x14] sm:$0xf] %vm2132_vm1, %v2047_v19  ;;  %v2356_v19 = vsel %vm4812_vm11, %v2351_v1, %v2355_v3  ;;  %v2547_v38 = vrot.slane %v2545_v35, 5  ;;  %v3075_v3 = vld [vmem:[#allocation2 + $0x58] sm:$0xf]  ;;  %v3445_v35 = vshll.u32 %v3274_v60, 16 }
 0x172   : > { %3715 = vrot.lane.b32.xlu1 %v3472_v11, %s4640_s30  ;;  %v2049_v27 = vpop.permute.xlu0 %2048  ;;  %v2533_v11 = vrot.slane %v2532_v52, 4  ;;  %v2543_v21 = vrot.slane %v2542_v51, 4  ;;  %v3432_v52 = vor.u32 %v3431_v54, %v3428_v53  ;;  %v3859_v53 = vld [vmem:[#allocation2 + $0xbc] sm:$0x1] }
 0x173   : > { %2139 = vst.msk [vmem:[#allocation3 + $0x18] sm:$0xf] %vm2132_vm1, %v2049_v27  ;;  %v3447_v30 = vrot.slane %v3445_v35, 5 }
 0x174   : > { %v2051_v29 = vpop.permute.xlu1 %2050  ;;  %3745 = vrot.lane.b32.xlu0 %v3654_v23, %s4640_s30  ;;  %v4517_v23 = vrot.slane %v2741_v32, 9  ;;  %v2538_v61 = vsel %vm4812_vm11, %v2533_v11, %v2537_v46  ;;  %v2548_v27 = vsel %vm4812_vm11, %v2543_v21, %v2547_v38  ;;  %v3090_v32 = vld [vmem:[#allocation2 + $0xb4] sm:$0xf]  ;;  %v3091_v21 = vld [vmem:[#allocation2 + $0xb8] sm:$0xf] }
 0x175   : > { %2140 = vst.msk [vmem:[#allocation3 + $0x1c] sm:$0xf] %vm2132_vm1, %v2051_v29  ;;  %v2767_v29 = vld [vmem:[#allocation2 + $0xb0] sm:$0x1] }
 0x176   : > { %3747 = vrot.lane.b32.xlu1 %v3664_v20, %s4640_s30  ;;  %v2053_v55 = vpop.permute.xlu0 %2052  ;;  %v2765_v20 = vld [vmem:[#allocation2 + $0xa8] sm:$0xe]  ;;  %v2860_v42 = vsel %vm5169_vm14, %v4517_v23, %v2859_v6  ;;  %v3433_v6 = vrot.slane %v3432_v52, 4 }
 0x177   : > { %2141 = vst.msk [vmem:[#allocation3 + $0x20] sm:$0xf] %vm2132_vm1, %v2053_v55  ;;  %v4525_v37 = vrot.slane %v2765_v20, 9  ;;  %v2918_v55 = vrot.slane %v2767_v29, 5 }
 0x178   : > { %v2055_v8 = vpop.permute.xlu1 %2054  ;;  %4050 = vrot.lane.b32.xlu0 %v3959_v34, %s4641_s6  ;;  %v3273_v34 = vld [vmem:[#allocation2 + $0x58] sm:$0xf] }
 0x179   : > { %2142 = vst.msk [vmem:[#allocation3 + $0x24] sm:$0xf] %vm2132_vm1, %v2055_v8  ;;  %v3435_v39 = vshll.u32 %v3273_v34, 16  ;;  %v3439_v47 = vshrl.u32 %v3273_v34, 16 }
 0x17a   : > { %4052 = vrot.lane.b32.xlu1 %v3962_v36, %s4641_s6  ;;  %v2057_v40 = vpop.permute.xlu0 %2056  ;;  %v3296_v36 = vld [vmem:[#allocation2 + $0xb4] sm:$0xf] }
 0x17b   : > { %2143 = vst.msk [vmem:[#allocation3 + $0x28] sm:$0xf] %vm2132_vm1, %v2057_v40  ;;  %v3618_v49 = vshrl.u32 %v3296_v36, 16  ;;  %v3621_v8 = vshll.u32 %v3296_v36, 16  ;;  %v2919_v40 = vsel %vm5169_vm14, %v2917_v16, %v2918_v55  ;;  %v5574_v58 = vrot.slane %v3435_v39, 5 }
 0x17c   : > { %v2059_v59 = vpop.permute.xlu1 %2058  ;;  %4082 = vrot.lane.b32.xlu0 %v4015_v50, %s4641_s6  ;;  %v3631_v50 = vshrl.u32 %v3297_v45, 16  ;;  %v3441_v22 = vrot.slane %v3439_v47, 4  ;;  %v4007_v47 = vrot.slane %v3858_v24, 5 }
 0x17d   : > { %2144 = vst.msk [vmem:[#allocation3 + $0x2c] sm:$0xf] %vm2132_vm1, %v2059_v59  ;;  %v3620_v59 = vrot.slane %v3618_v49, 4  ;;  %v3623_v62 = vrot.slane %v3621_v8, 5  ;;  %v3438_v20 = vsel %vm4812_vm11, %v3433_v6, %v5574_v58 }
 0x17e   : > { %4084 = vrot.lane.b32.xlu1 %v4018_v10, %s4641_s6  ;;  %v2061_v14 = vpop.permute.xlu0 %2060  ;;  %v2916_v10 = vsel %vm5169_vm14, %v4525_v37, %v2915_v28  ;;  %v3442_v51 = vor.u32 %v3441_v22, %v5574_v58  ;;  %v3835_v28 = vld [vmem:[#allocation2 + $0x5c] sm:$0x1] }
 0x17f   : > { %2145 = vst.msk [vmem:[#allocation3 + $0x30] sm:$0xf] %vm2132_vm1, %v2061_v14  ;;  %v3298_v14 = vld [vmem:[#allocation2 + $0xbc] sm:$0x1]  ;;  %v3954_v39 = vrot.slane %v3835_v28, 5 }
 0x180   : > { %v2063_v15 = vpop.permute.xlu1 %2062  ;;  %2088 = vrot.lane.b32.xlu0 %v1998_v17, %s4636_s26  ;;  %v5579_v17 = vrot.slane %v3627_v13, 5  ;;  %v3637_v11 = vshll.u32 %v3298_v14, 16  ;;  %v3443_v38 = vrot.slane %v3442_v51, 4  ;;  %v2201_v37 = vld [vmem:[#allocation2 + $0x9c] sm:$0xf] }
 0x181   : > { %2146 = vst.msk [vmem:[#allocation3 + $0x34] sm:$0xf] %vm2132_vm1, %v2063_v15  ;;  %v3624_v15 = vor.u32 %v3623_v62, %v3620_v59  ;;  %v2502_v13 = vshrl.u32 %v2201_v37, 16 }
 0x182   : > { %2090 = vrot.lane.b32.xlu1 %v1999_v12, %s4636_s26  ;;  %v2065_v9 = vpop.permute.xlu0 %2064  ;;  %v3633_v12 = vrot.slane %v3631_v50, 4  ;;  %v3639_v4 = vrot.slane %v3637_v11, 5  ;;  %v2505_v50 = vshll.u32 %v2201_v37, 16 }
 0x183   : > { %2147 = vst.msk [vmem:[#allocation3 + $0x38] sm:$0xf] %vm2132_vm1, %v2065_v9  ;;  %v3834_v9 = vld [vmem:[#allocation2 + $0x58] sm:$0xf]  ;;  %v3625_v23 = vrot.slane %v3624_v15, 4  ;;  %v2504_v52 = vrot.slane %v2502_v13, 4 }
 0x184   : > { %v2067_v18 = vpop.permute.xlu1 %2066  ;;  %2617 = vrot.lane.b32.xlu0 %v2346_v33, %s4637_s27  ;;  %v3634_v33 = vor.u32 %v3633_v12, %v5579_v17  ;;  %v4010_v12 = vrot.slane %v3859_v53, 5  ;;  %v2507_v14 = vrot.slane %v2505_v50, 5  ;;  %v3294_v53 = vld [vmem:[#allocation2 + $0xac] sm:$0xf] }
 0x185   : > { %2148 = vst.msk [vmem:[#allocation3 + $0x3c] sm:$0xf] %vm2132_vm1, %v2067_v18  ;;  %v2177_v18 = vld [vmem:[#allocation2 + $0x3c] sm:$0xf]  ;;  %v3630_v56 = vsel %vm4812_vm11, %v3625_v23, %v5579_v17  ;;  %v4009_v17 = vrot.slane %v4007_v47, 4 }
 0x186   : > { %2619 = vrot.lane.b32.xlu1 %v2356_v19, %s4637_s27  ;;  %v2069_v25 = vpop.permute.xlu0 %2068  ;;  %v3635_v26 = vrot.slane %v3634_v33, 4  ;;  %v2313_v29 = vshll.u32 %v2177_v18, 16  ;;  %v2203_v33 = vld [vmem:[#allocation2 + $0xa4] sm:$0x1] }
 0x187   : > { %2149 = vst.msk [vmem:[#allocation3 + $0x40] sm:$0xf] %vm2132_vm1, %v2069_v25  ;;  %v3833_v25 = vld [vmem:[#allocation2 + $0x54] sm:$0xe] }
 0x188   : > { %v2071_v2 = vpop.permute.xlu1 %2070  ;;  %2649 = vrot.lane.b32.xlu0 %v2538_v61, %s4637_s27  ;;  %v2178_v61 = vld [vmem:[#allocation2 + $0x40] sm:$0xf]  ;;  %v4533_v45 = vrot.slane %v3833_v25, 9  ;;  %v3640_v16 = vsel %vm4812_vm11, %v3635_v26, %v3639_v4  ;;  %v2315_v8 = vrot.slane %v2313_v29, 5  ;;  %v2738_v4 = vld [vmem:[#allocation2 + $0x3c] sm:$0xe] }
 0x189   : > { %2150 = vst.msk [vmem:[#allocation3 + $0x44] sm:$0xf] %vm2132_vm1, %v2071_v2  ;;  %v2310_v2 = vshrl.u32 %v2177_v18, 16  ;;  %v2319_v36 = vshll.u32 %v2178_v61, 16  ;;  %v2521_v18 = vshll.u32 %v2203_v33, 16 }
 0x18a   : > { %2651 = vrot.lane.b32.xlu1 %v2548_v27, %s4637_s27  ;;  %v2073_v5 = vpop.permute.xlu0 %2072  ;;  %v3951_v27 = vrot.slane %v3834_v9, 5  ;;  %v2508_v9 = vor.u32 %v2507_v14, %v2504_v52 }
 0x18b   : > { %2151 = vst.msk [vmem:[#allocation3 + $0x48] sm:$0xf] %vm2132_vm1, %v2073_v5  ;;  %v2202_v5 = vld [vmem:[#allocation2 + $0xa0] sm:$0xf]  ;;  %v2312_v49 = vrot.slane %v2310_v2, 4  ;;  %v2321_v54 = vrot.slane %v2319_v36, 5 }
 0x18c   : > { %v2075_v48 = vpop.permute.xlu1 %2074  ;;  %2954 = vrot.lane.b32.xlu0 %v2860_v42, %s4638_s28  ;;  %v3448_v42 = vsel %vm4812_vm11, %v3443_v38, %v3447_v30  ;;  %v3953_v55 = vrot.slane %v3951_v27, 4  ;;  %v2515_v58 = vshrl.u32 %v2202_v5, 16  ;;  %v3952_v60 = vsel %vm5169_vm14, %v4533_v45, %v3951_v27  ;;  %v2740_v2 = vld [vmem:[#allocation2 + $0x44] sm:$0x1]  ;;  %v2762_v45 = vld [vmem:[#allocation2 + $0x9c] sm:$0xe] }
 0x18d   : > { %2152 = vst.msk [vmem:[#allocation3 + $0x4c] sm:$0xf] %vm2132_vm1, %v2075_v48  ;;  %v3857_v48 = vld [vmem:[#allocation2 + $0xb4] sm:$0xe]  ;;  %v2509_v26 = vrot.slane %v2508_v9, 4  ;;  %v2523_v24 = vrot.slane %v2521_v18, 5 }
 0x18e   : > { %2956 = vrot.lane.b32.xlu1 %v2863_v41, %s4638_s28  ;;  %v2077_v57 = vpop.permute.xlu0 %2076  ;;  %v2323_v41 = vshrl.u32 %v2178_v61, 16  ;;  %v3955_v59 = vsel %vm5169_vm14, %v3953_v55, %v3954_v39  ;;  %v4541_v62 = vrot.slane %v3857_v48, 9  ;;  %v2855_v37 = vrot.slane %v2740_v2, 5  ;;  %v2764_v39 = vld [vmem:[#allocation2 + $0xa4] sm:$0x1] }
 0x18f   : > { %2153 = vst.msk [vmem:[#allocation3 + $0x50] sm:$0xf] %vm2132_vm1, %v2077_v57  ;;  %v4524_v13 = vrot.slane %v2762_v45, 9 }
 0x190   : > { %v2079_v46 = vpop.permute.xlu1 %2078  ;;  %2986 = vrot.lane.b32.xlu0 %v2916_v10, %s4638_s28  ;;  %v2325_v57 = vrot.slane %v2323_v41, 4  ;;  %v4008_v11 = vsel %vm5169_vm14, %v4541_v62, %v4007_v47  ;;  %v3270_v47 = vld [vmem:[#allocation2 + $0x4c] sm:$0xf]  ;;  %v3603_v62 = vshll.u32 %v3294_v53, 16 }
 0x191   : > { %2154 = vst.msk [vmem:[#allocation3 + $0x54] sm:$0xf] %vm2132_vm1, %v2079_v46  ;;  %v2179_v46 = vld [vmem:[#allocation2 + $0x44] sm:$0x1] }
 0x192   : > { %2988 = vrot.lane.b32.xlu1 %v2919_v40, %s4638_s28  ;;  %v2081_v1 = vpop.permute.xlu0 %2080  ;;  %v2511_v40 = vshll.u32 %v2202_v5, 16  ;;  %v2329_v51 = vshll.u32 %v2179_v46, 16 }
 0x193   : > { %2155 = vst.msk [vmem:[#allocation3 + $0x58] sm:$0xf] %vm2132_vm1, %v2081_v1 }
 0x194   : > { %v2083_v7 = vpop.permute.xlu1 %2082  ;;  %3148 = vrot.lane.b32.xlu0 %v3074_v0, %s4639_s29  ;;  %v2316_v0 = vor.u32 %v2315_v8, %v2312_v49  ;;  %v2513_v35 = vrot.slane %v2511_v40, 5  ;;  %v2331_v38 = vrot.slane %v2329_v51, 5  ;;  %v3293_v49 = vld [vmem:[#allocation2 + $0xa8] sm:$0xf]  ;;  %v2911_v40 = vrot.slane %v2764_v39, 5 }
 0x195   : > { %2156 = vst.msk [vmem:[#allocation3 + $0x5c] sm:$0xf] %vm2132_vm1, %v2083_v7  ;;  %v2517_v7 = vrot.slane %v2515_v58, 4  ;;  %v3411_v58 = vshll.u32 %v3270_v47, 16 }
 0x196   : > { %3150 = vrot.lane.b32.xlu1 %v3075_v3, %s4639_s29  ;;  %v2085_v19 = vpop.permute.xlu0 %2084  ;;  %v2326_v3 = vor.u32 %v2325_v57, %v2321_v54  ;;  %v2317_v6 = vrot.slane %v2316_v0, 4  ;;  %v2514_v36 = vsel %vm4812_vm11, %v2509_v26, %v2513_v35 }
 0x197   : > { %2157 = vst.msk [vmem:[#allocation3 + $0x60] sm:$0xf] %vm2132_vm1, %v2085_v19  ;;  %v2518_v30 = vor.u32 %v2517_v7, %v2513_v35  ;;  %v3271_v7 = vld [vmem:[#allocation2 + $0x50] sm:$0x1] }
 0x198   : > { %v2087_v63 = vpop.permute.xlu1 %2086  ;;  %3180 = vrot.lane.b32.xlu0 %v3090_v32, %s4639_s29  ;;  %v4011_v32 = vsel %vm5169_vm14, %v4009_v17, %v4010_v12  ;;  %v2322_v61 = vsel %vm4812_vm11, %v2317_v6, %v2321_v54  ;;  %v3607_v17 = vshrl.u32 %v3294_v53, 16  ;;  %v3072_v6 = vld [vmem:[#allocation2 + $0x48] sm:$0xf]  ;;  %v3421_v18 = vshll.u32 %v3271_v7, 16 }
 0x199   : > { %2158 = vst.msk [vmem:[#allocation3 + $0x64] sm:$0xf] %vm2132_vm1, %v2087_v63  ;;  %v2739_v63 = vld [vmem:[#allocation2 + $0x40] sm:$0xf]  ;;  %v2519_v28 = vrot.slane %v2518_v30, 4 }
 0x19a   : > { %3182 = vrot.lane.b32.xlu1 %v3091_v21, %s4639_s29  ;;  %v2097_v34 = vpop.permute.xlu0 %2096  ;;  %v2327_v21 = vrot.slane %v2326_v3, 4  ;;  %v2852_v25 = vrot.slane %v2739_v63, 5  ;;  %v5654_v3 = vrot.slane %v3411_v58, 5  ;;  %v3423_v2 = vrot.slane %v3421_v18, 5 }
 0x19b   : > { %2163 = vst.msk [vmem:[#allocation3 + $0x78] sm:$0xf] %vm2132_vm1, %v2097_v34  ;;  %v2763_v34 = vld [vmem:[#allocation2 + $0xa0] sm:$0xf] }
 0x19c   : > { %v2099_v44 = vpop.permute.xlu1 %2098  ;;  %3709 = vrot.lane.b32.xlu0 %v3438_v20, %s4640_s30  ;;  %v2332_v20 = vsel %vm4812_vm11, %v2327_v21, %v2331_v38  ;;  %v2854_v41 = vrot.slane %v2852_v25, 4  ;;  %v2908_v5 = vrot.slane %v2763_v34, 5  ;;  %v3073_v38 = vld [vmem:[#allocation2 + $0x4c] sm:$0xf] }
 0x19d   : > { %2164 = vst.msk [vmem:[#allocation3 + $0x7c] sm:$0xf] %vm2132_vm1, %v2099_v44 }
 0x19e   : > { %3711 = vrot.lane.b32.xlu1 %v3448_v42, %s4640_s30  ;;  %v2626_v10 = vpop.permute.xlu0 %2625  ;;  %v4516_v42 = vrot.slane %v2738_v4, 9  ;;  %v2856_v8 = vsel %vm5169_vm14, %v2854_v41, %v2855_v37  ;;  %v2910_v57 = vrot.slane %v2908_v5, 4  ;;  %v2909_v12 = vsel %vm5169_vm14, %v4524_v13, %v2908_v5  ;;  %v3088_v4 = vld [vmem:[#allocation2 + $0xa8] sm:$0xf]  ;;  %v3832_v5 = vld [vmem:[#allocation2 + $0x50] sm:$0x1] }
 0x19f   : > { %2708 = vst.msk [vmem:[#allocation3 + $0x38] sm:$0xf] %vm2693_vm2, %v2626_v10  ;;  %v2198_v13 = vld [vmem:[#allocation2 + $0x90] sm:$0xf]  ;;  %v3947_v58 = vrot.slane %v3832_v5, 5 }
 0x1a0   : > { %v2628_v22 = vpop.permute.xlu1 %2627  ;;  %3741 = vrot.lane.b32.xlu0 %v3630_v56, %s4640_s30  ;;  %v2524_v56 = vsel %vm4812_vm11, %v2519_v28, %v2523_v24  ;;  %v2853_v48 = vsel %vm5169_vm14, %v4516_v42, %v2852_v25  ;;  %v3089_v28 = vld [vmem:[#allocation2 + $0xac] sm:$0xf] }
 0x1a1   : > { %2709 = vst.msk [vmem:[#allocation3 + $0x3c] sm:$0xf] %vm2693_vm2, %v2628_v22  ;;  %v3415_v22 = vshrl.u32 %v3270_v47, 16 }
 0x1a2   : > { %3743 = vrot.lane.b32.xlu1 %v3640_v16, %s4640_s30  ;;  %v2658_v1 = vpop.permute.xlu0 %2657  ;;  %v3269_v16 = vld [vmem:[#allocation2 + $0x48] sm:$0xf] }
 0x1a3   : > { %2724 = vst.msk [vmem:[#allocation3 + $0x78] sm:$0xf] %vm2693_vm2, %v2658_v1  ;;  %v3402_v50 = vshrl.u32 %v3269_v16, 16  ;;  %v3405_v10 = vshll.u32 %v3269_v16, 16  ;;  %v2912_v1 = vsel %vm5169_vm14, %v2910_v57, %v2911_v40  ;;  %v3417_v51 = vrot.slane %v3415_v22, 4 }
 0x1a4   : > { %v2660_v15 = vpop.permute.xlu1 %2659  ;;  %4046 = vrot.lane.b32.xlu0 %v3952_v60, %s4641_s6  ;;  %v3594_v60 = vshrl.u32 %v3293_v49, 16  ;;  %v3855_v16 = vld [vmem:[#allocation2 + $0xac] sm:$0xf]  ;;  %v3854_v22 = vld [vmem:[#allocation2 + $0xa8] sm:$0xe] }
 0x1a5   : > { %2725 = vst.msk [vmem:[#allocation3 + $0x7c] sm:$0xf] %vm2693_vm2, %v2660_v15  ;;  %v3404_v0 = vrot.slane %v3402_v50, 4  ;;  %v3407_v52 = vrot.slane %v3405_v10, 5  ;;  %v3418_v30 = vor.u32 %v3417_v51, %v5654_v3 }
 0x1a6   : > { %4048 = vrot.lane.b32.xlu1 %v3955_v59, %s4641_s6  ;;  %v2963_v19 = vpop.permute.xlu0 %2962  ;;  %v3597_v59 = vshll.u32 %v3293_v49, 16  ;;  %v3596_v15 = vrot.slane %v3594_v60, 4  ;;  %v3856_v60 = vld [vmem:[#allocation2 + $0xb0] sm:$0x1] }
 0x1a7   : > { %3045 = vst.msk [vmem:[#allocation3 + $0x38] sm:$0xf] %vm3030_vm3, %v2963_v19  ;;  %v3408_v9 = vor.u32 %v3407_v52, %v3404_v0  ;;  %v3295_v19 = vld [vmem:[#allocation2 + $0xb0] sm:$0x1]  ;;  %v3419_v24 = vrot.slane %v3418_v30, 4 }
 0x1a8   : > { %v2965_v23 = vpop.permute.xlu1 %2964  ;;  %4078 = vrot.lane.b32.xlu0 %v4008_v11, %s4641_s6  ;;  %v3599_v33 = vrot.slane %v3597_v59, 5  ;;  %v5659_v11 = vrot.slane %v3603_v62, 5  ;;  %v3613_v26 = vshll.u32 %v3295_v19, 16 }
 0x1a9   : > { %3046 = vst.msk [vmem:[#allocation3 + $0x3c] sm:$0xf] %vm3030_vm3, %v2965_v23  ;;  %v3409_v25 = vrot.slane %v3408_v9, 4 }
 0x1aa   : > { %4080 = vrot.lane.b32.xlu1 %v4011_v32, %s4641_s6  ;;  %v2995_v27 = vpop.permute.xlu0 %2994  ;;  %v3609_v32 = vrot.slane %v3607_v17, 4  ;;  %v3600_v23 = vor.u32 %v3599_v33, %v3596_v15  ;;  %v3615_v37 = vrot.slane %v3613_v26, 5  ;;  %v2478_v17 = vshrl.u32 %v2198_v13, 16 }
 0x1ab   : > { %3061 = vst.msk [vmem:[#allocation3 + $0x78] sm:$0xf] %vm3030_vm3, %v2995_v27  ;;  %v3831_v27 = vld [vmem:[#allocation2 + $0x4c] sm:$0xf]  ;;  %v3414_v45 = vsel %vm4812_vm11, %v3409_v25, %v5654_v3  ;;  %v4540_v33 = vrot.slane %v3854_v22, 9 }
 0x1ac   : > { %v2997_v29 = vpop.permute.xlu1 %2996  ;;  %2613 = vrot.lane.b32.xlu0 %v2322_v61, %s4637_s27  ;;  %v3610_v61 = vor.u32 %v3609_v32, %v5659_v11  ;;  %v3601_v42 = vrot.slane %v3600_v23, 4  ;;  %v2480_v19 = vrot.slane %v2478_v17, 4  ;;  %v3266_v22 = vld [vmem:[#allocation2 + $0x3c] sm:$0xf] }
 0x1ad   : > { %3062 = vst.msk [vmem:[#allocation3 + $0x7c] sm:$0xf] %vm3030_vm3, %v2997_v29  ;;  %v2174_v29 = vld [vmem:[#allocation2 + $0x30] sm:$0xf]  ;;  %v3290_v17 = vld [vmem:[#allocation2 + $0x9c] sm:$0xf] }
 0x1ae   : > { %2615 = vrot.lane.b32.xlu1 %v2332_v20, %s4637_s27  ;;  %v3157_v44 = vpop.permute.xlu0 %3156  ;;  %v3611_v41 = vrot.slane %v3610_v61, 4  ;;  %v2289_v39 = vshll.u32 %v2174_v29, 16  ;;  %v3606_v10 = vsel %vm4812_vm11, %v3601_v42, %v5659_v11 }
 0x1af   : > { %3239 = vst.msk [vmem:[#allocation3 + $0x38] sm:$0xf] %vm3224_vm4, %v3157_v44  ;;  %v3830_v44 = vld [vmem:[#allocation2 + $0x48] sm:$0xe] }
 0x1b0   : > { %v3159_v55 = vpop.permute.xlu1 %3158  ;;  %2645 = vrot.lane.b32.xlu0 %v2514_v36, %s4637_s27  ;;  %v2175_v36 = vld [vmem:[#allocation2 + $0x34] sm:$0xf]  ;;  %v4532_v53 = vrot.slane %v3830_v44, 9  ;;  %v3616_v57 = vsel %vm4812_vm11, %v3611_v41, %v3615_v37  ;;  %v2291_v62 = vrot.slane %v2289_v39, 5 }
 0x1b1   : > { %3240 = vst.msk [vmem:[#allocation3 + $0x3c] sm:$0xf] %vm3224_vm4, %v3159_v55  ;;  %v2286_v55 = vshrl.u32 %v2174_v29, 16  ;;  %v2295_v49 = vshll.u32 %v2175_v36, 16  ;;  %v2736_v41 = vld [vmem:[#allocation2 + $0x34] sm:$0xf] }
 0x1b2   : > { %2647 = vrot.lane.b32.xlu1 %v2524_v56, %s4637_s27  ;;  %v3189_v54 = vpop.permute.xlu0 %3188  ;;  %v3944_v56 = vrot.slane %v3831_v27, 5  ;;  %v2845_v5 = vrot.slane %v2736_v41, 5 }
 0x1b3   : > { %3255 = vst.msk [vmem:[#allocation3 + $0x78] sm:$0xf] %vm3224_vm4, %v3189_v54  ;;  %v2199_v54 = vld [vmem:[#allocation2 + $0x94] sm:$0xf]  ;;  %v2288_v59 = vrot.slane %v2286_v55, 4  ;;  %v5686_v52 = vrot.slane %v2295_v49, 5 }
 0x1b4   : > { %v3191_v46 = vpop.permute.xlu1 %3190  ;;  %2950 = vrot.lane.b32.xlu0 %v2853_v48, %s4638_s28  ;;  %v3424_v48 = vsel %vm4812_vm11, %v3419_v24, %v3423_v2  ;;  %v3946_v40 = vrot.slane %v3944_v56, 4  ;;  %v2491_v3 = vshrl.u32 %v2199_v54, 16  ;;  %v3945_v7 = vsel %vm5169_vm14, %v4532_v53, %v3944_v56 }
 0x1b5   : > { %3256 = vst.msk [vmem:[#allocation3 + $0x7c] sm:$0xf] %vm3224_vm4, %v3191_v46  ;;  %v4000_v46 = vrot.slane %v3855_v16, 5  ;;  %v2292_v9 = vor.u32 %v2291_v62, %v2288_v59  ;;  %v3267_v59 = vld [vmem:[#allocation2 + $0x40] sm:$0xf] }
 0x1b6   : > { %2952 = vrot.lane.b32.xlu1 %v2856_v8, %s4638_s28  ;;  %v3718_v14 = vpop.permute.xlu0 %3717  ;;  %v2299_v8 = vshrl.u32 %v2175_v36, 16  ;;  %v3948_v15 = vsel %vm5169_vm14, %v3946_v40, %v3947_v58  ;;  %v2493_v23 = vrot.slane %v2491_v3, 4  ;;  %v2759_v40 = vld [vmem:[#allocation2 + $0x90] sm:$0xe] }
 0x1b7   : > { %3800 = vst.msk [vmem:[#allocation3 + $0x38] sm:$0xf] %vm3785_vm5, %v3718_v14  ;;  %v4002_v11 = vrot.slane %v4000_v46, 4  ;;  %v4001_v25 = vsel %vm5169_vm14, %v4540_v33, %v4000_v46 }
 0x1b8   : > { %v3720_v35 = vpop.permute.xlu1 %3719  ;;  %2982 = vrot.lane.b32.xlu0 %v2909_v12, %s4638_s28  ;;  %v2481_v12 = vshll.u32 %v2198_v13, 16  ;;  %v2301_v14 = vrot.slane %v2299_v8, 4  ;;  %v2760_v8 = vld [vmem:[#allocation2 + $0x94] sm:$0xf] }
 0x1b9   : > { %3801 = vst.msk [vmem:[#allocation3 + $0x3c] sm:$0xf] %vm3785_vm5, %v3720_v35  ;;  %v2176_v35 = vld [vmem:[#allocation2 + $0x38] sm:$0x1]  ;;  %v2901_v58 = vrot.slane %v2760_v8, 5 }
 0x1ba   : > { %2984 = vrot.lane.b32.xlu1 %v2912_v1, %s4638_s28  ;;  %v3750_v21 = vpop.permute.xlu0 %3749  ;;  %v2487_v1 = vshll.u32 %v2199_v54, 16  ;;  %v2302_v30 = vor.u32 %v2301_v14, %v5686_v52  ;;  %v2305_v18 = vshll.u32 %v2176_v35, 16  ;;  %v3381_v14 = vshll.u32 %v3266_v22, 16 }
 0x1bb   : > { %3816 = vst.msk [vmem:[#allocation3 + $0x78] sm:$0xf] %vm3785_vm5, %v3750_v21  ;;  %v2483_v21 = vrot.slane %v2481_v12, 5 }
 0x1bc   : > { %v3752_v63 = vpop.permute.xlu1 %3751  ;;  %3144 = vrot.lane.b32.xlu0 %v3072_v6, %s4639_s29  ;;  %v4003_v6 = vrot.slane %v3856_v60, 5  ;;  %v2303_v29 = vrot.slane %v2302_v30, 4  ;;  %v2761_v60 = vld [vmem:[#allocation2 + $0x98] sm:$0x1] }
 0x1bd   : > { %3817 = vst.msk [vmem:[#allocation3 + $0x7c] sm:$0xf] %vm3785_vm5, %v3752_v63  ;;  %v2489_v63 = vrot.slane %v2487_v1, 5  ;;  %v2484_v24 = vor.u32 %v2483_v21, %v2480_v19  ;;  %v3291_v1 = vld [vmem:[#allocation2 + $0xa0] sm:$0xf]  ;;  %v2904_v35 = vrot.slane %v2761_v60, 5 }
 0x1be   : > { %3146 = vrot.lane.b32.xlu1 %v3073_v38, %s4639_s29  ;;  %v4055_v20 = vpop.permute.xlu0 %4054 }
 0x1bf   : > { %4137 = vst.msk [vmem:[#allocation3 + $0x38] sm:$0xf] %vm4122_vm6, %v4055_v20  ;;  %v4004_v20 = vsel %vm5169_vm14, %v4002_v11, %v4003_v6  ;;  %v2494_v42 = vor.u32 %v2493_v23, %v2489_v63  ;;  %v2485_v56 = vrot.slane %v2484_v24, 4  ;;  %v3570_v11 = vshrl.u32 %v3290_v17, 16 }
 0x1c0   : > { %v4057_v34 = vpop.permute.xlu1 %4056  ;;  %3176 = vrot.lane.b32.xlu0 %v3088_v4, %s4639_s29  ;;  %v2200_v4 = vld [vmem:[#allocation2 + $0x98] sm:$0x1]  ;;  %v3579_v6 = vshll.u32 %v3291_v1, 16 }
 0x1c1   : > { %4138 = vst.msk [vmem:[#allocation3 + $0x3c] sm:$0xf] %vm4122_vm6, %v4057_v34  ;;  %v2307_v34 = vrot.slane %v2305_v18, 5  ;;  %v2497_v36 = vshll.u32 %v2200_v4, 16  ;;  %v2495_v39 = vrot.slane %v2494_v42, 4  ;;  %v3572_v4 = vrot.slane %v3570_v11, 4 }
 0x1c2   : > { %3178 = vrot.lane.b32.xlu1 %v3089_v28, %s4639_s29  ;;  %v4087_v47 = vpop.permute.xlu0 %4086  ;;  %v2293_v28 = vrot.slane %v2292_v9, 4  ;;  %v3583_v9 = vshrl.u32 %v3291_v1, 16 }
 0x1c3   : > { %4153 = vst.msk [vmem:[#allocation3 + $0x78] sm:$0xf] %vm4122_vm6, %v4087_v47  ;;  %v2308_v55 = vsel %vm4812_vm11, %v2303_v29, %v2307_v34  ;;  %v2499_v47 = vrot.slane %v2497_v36, 5  ;;  %v3071_v34 = vld [vmem:[#allocation2 + $0x40] sm:$0xf] }
 0x1c4   : > { %v4089_v50 = vpop.permute.xlu1 %4088  ;;  %3705 = vrot.lane.b32.xlu0 %v3414_v45, %s4640_s30  ;;  %v2298_v44 = vsel %vm4812_vm11, %v2293_v28, %v5686_v52  ;;  %v2735_v45 = vld [vmem:[#allocation2 + $0x30] sm:$0xe]  ;;  %v3378_v52 = vshrl.u32 %v3266_v22, 16  ;;  %v3070_v28 = vld [vmem:[#allocation2 + $0x3c] sm:$0xf] }
 0x1c5   : > { %4154 = vst.msk [vmem:[#allocation3 + $0x7c] sm:$0xf] %vm4122_vm6, %v4089_v50  ;;  %v4515_v13 = vrot.slane %v2735_v45, 9  ;;  %v2490_v50 = vsel %vm4812_vm11, %v2485_v56, %v2489_v63  ;;  %v3086_v45 = vld [vmem:[#allocation2 + $0x9c] sm:$0xf] }
 0x1c6   : > { %3707 = vrot.lane.b32.xlu1 %v3424_v48, %s4640_s30  ;;  %v2093_v0 = vpop.permute.xlu0 %2092  ;;  %v2737_v48 = vld [vmem:[#allocation2 + $0x38] sm:$0x1]  ;;  %v3380_v21 = vrot.slane %v3378_v52, 4  ;;  %v3852_v22 = vld [vmem:[#allocation2 + $0xa0] sm:$0xf] }
 0x1c7   : > { %2161 = vst.msk [vmem:[#allocation3 + $0x70] sm:$0xf] %vm2132_vm1, %v2093_v0  ;;  %v2848_v53 = vrot.slane %v2737_v48, 5  ;;  %v2846_v62 = vsel %vm5169_vm14, %v4515_v13, %v2845_v5  ;;  %v4523_v0 = vrot.slane %v2759_v40, 9 }
 0x1c8   : > { %v2095_v51 = vpop.permute.xlu1 %2094  ;;  %3737 = vrot.lane.b32.xlu0 %v3606_v10, %s4640_s30  ;;  %v4611_v32 = vld [vmem:[#allocation3 + $0x38] sm:$0xff]   ;;  %v2847_v10 = vrot.slane %v2845_v5, 4 }
 0x1c9   : > { %2162 = vst.msk [vmem:[#allocation3 + $0x74] sm:$0xf] %vm2132_vm1, %v2095_v51  ;;  %v4294_v27 = vsel %vm4268_vm7, %v4611_v32, 0  ;;  %v2903_v51 = vrot.slane %v2901_v58, 4  ;;  %v3573_v32 = vshll.u32 %v3290_v17, 16  ;;  %v2902_v19 = vsel %vm5169_vm14, %v4523_v0, %v2901_v58 }
 0x1ca   : > { %3739 = vrot.lane.b32.xlu1 %v3616_v57, %s4640_s30  ;;  %v2622_v38 = vpop.permute.xlu0 %2621  ;;  %v2500_v57 = vsel %vm4812_vm11, %v2495_v39, %v2499_v47  ;;  %v2849_v12 = vsel %vm5169_vm14, %v2847_v10, %v2848_v53  ;;  %v3087_v39 = vld [vmem:[#allocation2 + $0xa0] sm:$0xf]  ;;  %v3829_v58 = vld [vmem:[#allocation2 + $0x44] sm:$0x1] }
 0x1cb   : > { %2706 = vst.msk [vmem:[#allocation3 + $0x30] sm:$0xf] %vm2693_vm2, %v2622_v38  ;;  %v3383_v38 = vrot.slane %v3381_v14, 5  ;;  %v2905_v18 = vsel %vm5169_vm14, %v2903_v51, %v2904_v35  ;;  %v2195_v0 = vld [vmem:[#allocation2 + $0x84] sm:$0xf] }
 0x1cc   : > { %v2624_v61 = vpop.permute.xlu1 %2623  ;;  %v4610_v26 = vld [vmem:[#allocation3 + $0x78] sm:$0xff]   ;;  %4042 = vrot.lane.b32.xlu0 %v3945_v7, %s4641_s6  ;;  %v3387_v7 = vshll.u32 %v3267_v59, 16 }
 0x1cd   : > { %2707 = vst.msk [vmem:[#allocation3 + $0x34] sm:$0xf] %vm2693_vm2, %v2624_v61  ;;  %4583 = vmatprep.subr.msk.bf16.mxu0 %vm4268_vm7, %v4610_v26  ;;  %v3268_v26 = vld [vmem:[#allocation2 + $0x44] sm:$0x1]  ;;  %v3384_v24 = vor.u32 %v3383_v38, %v3380_v21  ;;  %v2173_v38 = vld [vmem:[#allocation2 + $0x2c] sm:$0x1] }
 0x1ce   : > { %4044 = vrot.lane.b32.xlu1 %v3948_v15, %s4641_s6  ;;  %v2654_v2 = vpop.permute.xlu0 %2653  ;;  %4566 = vmatpush3.bf16.xpose.msra.mxu0 %v4294_v27  ;;  %v3391_v15 = vshrl.u32 %v3267_v59, 16  ;;  %v3389_v63 = vrot.slane %v3387_v7, 5  ;;  %v5743_v27 = vrot.slane %v3579_v6, 5  ;;  %v3397_v36 = vshll.u32 %v3268_v26, 16 }
 0x1cf   : > { %2722 = vst.msk [vmem:[#allocation3 + $0x70] sm:$0xf] %vm2693_vm2, %v2654_v2  ;;  %v3292_v2 = vld [vmem:[#allocation2 + $0xa4] sm:$0x1]  ;;  %v3385_v5 = vrot.slane %v3384_v24, 4  ;;  %v3940_v7 = vrot.slane %v3829_v58, 5 }
 0x1d0   : > { %v2656_v37 = vpop.permute.xlu1 %2655  ;;  %4074 = vrot.lane.b32.xlu0 %v4001_v25, %s4641_s6  ;;  %v3393_v23 = vrot.slane %v3391_v15, 4  ;;  %v3575_v25 = vrot.slane %v3573_v32, 5  ;;  %v3589_v56 = vshll.u32 %v3292_v2, 16  ;;  %v3399_v48 = vrot.slane %v3397_v36, 5 }
 0x1d1   : > { %2723 = vst.msk [vmem:[#allocation3 + $0x74] sm:$0xf] %vm2693_vm2, %v2656_v37  ;;  %v3390_v40 = vsel %vm4812_vm11, %v3385_v5, %v3389_v63  ;;  %v3993_v15 = vrot.slane %v3852_v22, 5  ;;  %v2454_v6 = vshrl.u32 %v2195_v0, 16 }
 0x1d2   : > { %4076 = vrot.lane.b32.xlu1 %v4004_v20, %s4641_s6  ;;  %v2959_v16 = vpop.permute.xlu0 %2958  ;;  %v3585_v20 = vrot.slane %v3583_v9, 4  ;;  %v3394_v42 = vor.u32 %v3393_v23, %v3389_v63  ;;  %v3576_v37 = vor.u32 %v3575_v25, %v3572_v4  ;;  %v3591_v53 = vrot.slane %v3589_v56, 5 }
 0x1d3   : > { %3043 = vst.msk [vmem:[#allocation3 + $0x30] sm:$0xf] %vm3030_vm3, %v2959_v16  ;;  %v3828_v16 = vld [vmem:[#allocation2 + $0x40] sm:$0xf]  ;;  %v2457_v9 = vshll.u32 %v2195_v0, 16  ;;  %v2456_v24 = vrot.slane %v2454_v6, 4 }
 0x1d4   : > { %v2961_v49 = vpop.permute.xlu1 %2960  ;;  %2609 = vrot.lane.b32.xlu0 %v2298_v44, %s4637_s27  ;;  %v3586_v44 = vor.u32 %v3585_v20, %v5743_v27  ;;  %v3395_v47 = vrot.slane %v3394_v42, 4  ;;  %v3577_v13 = vrot.slane %v3576_v37, 4 }
 0x1d5   : > { %3044 = vst.msk [vmem:[#allocation3 + $0x34] sm:$0xf] %vm3030_vm3, %v2961_v49  ;;  %v2171_v49 = vld [vmem:[#allocation2 + $0x24] sm:$0xf]  ;;  %v2459_v2 = vrot.slane %v2457_v9, 5 }
 0x1d6   : > { %2611 = vrot.lane.b32.xlu1 %v2308_v55, %s4637_s27  ;;  %v2991_v54 = vpop.permute.xlu0 %2990  ;;  %v3587_v10 = vrot.slane %v3586_v44, 4  ;;  %v2265_v60 = vshll.u32 %v2171_v49, 16  ;;  %v3582_v14 = vsel %vm4812_vm11, %v3577_v13, %v5743_v27  ;;  %v3995_v27 = vrot.slane %v3993_v15, 4  ;;  %v2197_v44 = vld [vmem:[#allocation2 + $0x8c] sm:$0x1] }
 0x1d7   : > { %3059 = vst.msk [vmem:[#allocation3 + $0x70] sm:$0xf] %vm3030_vm3, %v2991_v54  ;;  %v3827_v54 = vld [vmem:[#allocation2 + $0x3c] sm:$0xe]  ;;  %v2733_v13 = vld [vmem:[#allocation2 + $0x28] sm:$0xf] }
 0x1d8   : > { %v2993_v46 = vpop.permute.xlu1 %2992  ;;  %2641 = vrot.lane.b32.xlu0 %v2490_v50, %s4637_s27  ;;  %v2172_v50 = vld [vmem:[#allocation2 + $0x28] sm:$0xf]  ;;  %v4531_v1 = vrot.slane %v3827_v54, 9  ;;  %v3592_v51 = vsel %vm4812_vm11, %v3587_v10, %v3591_v53  ;;  %v2267_v32 = vrot.slane %v2265_v60, 5  ;;  %v2838_v58 = vrot.slane %v2733_v13, 5 }
 0x1d9   : > { %3060 = vst.msk [vmem:[#allocation3 + $0x74] sm:$0xf] %vm3030_vm3, %v2993_v46  ;;  %v2262_v46 = vshrl.u32 %v2171_v49, 16  ;;  %v2271_v17 = vshll.u32 %v2172_v50, 16  ;;  %v3287_v9 = vld [vmem:[#allocation2 + $0x90] sm:$0xf] }
 0x1da   : > { %2643 = vrot.lane.b32.xlu1 %v2500_v57, %s4637_s27  ;;  %v3153_v3 = vpop.permute.xlu0 %3152  ;;  %v3937_v57 = vrot.slane %v3828_v16, 5 }
 0x1db   : > { %3237 = vst.msk [vmem:[#allocation3 + $0x30] sm:$0xf] %vm3224_vm4, %v3153_v3  ;;  %v2196_v3 = vld [vmem:[#allocation2 + $0x88] sm:$0xf]  ;;  %v2264_v11 = vrot.slane %v2262_v46, 4  ;;  %v5768_v21 = vrot.slane %v2271_v17, 5 }
 0x1dc   : > { %v3155_v33 = vpop.permute.xlu1 %3154  ;;  %2946 = vrot.lane.b32.xlu0 %v2846_v62, %s4638_s28  ;;  %v3400_v62 = vsel %vm4812_vm11, %v3395_v47, %v3399_v48  ;;  %v3939_v35 = vrot.slane %v3937_v57, 4  ;;  %v2467_v63 = vshrl.u32 %v2196_v3, 16  ;;  %v3938_v26 = vsel %vm5169_vm14, %v4531_v1, %v3937_v57 }
 0x1dd   : > { %3238 = vst.msk [vmem:[#allocation3 + $0x34] sm:$0xf] %vm3224_vm4, %v3155_v33  ;;  %v3851_v33 = vld [vmem:[#allocation2 + $0x9c] sm:$0xe]  ;;  %v2268_v20 = vor.u32 %v2267_v32, %v2264_v11  ;;  %v2758_v11 = vld [vmem:[#allocation2 + $0x8c] sm:$0x1] }
 0x1de   : > { %2948 = vrot.lane.b32.xlu1 %v2849_v12, %s4638_s28  ;;  %v3185_v30 = vpop.permute.xlu0 %3184  ;;  %v2275_v12 = vshrl.u32 %v2172_v50, 16  ;;  %v3941_v4 = vsel %vm5169_vm14, %v3939_v35, %v3940_v7  ;;  %v4539_v25 = vrot.slane %v3851_v33, 9  ;;  %v2756_v35 = vld [vmem:[#allocation2 + $0x84] sm:$0xe]  ;;  %v3264_v32 = vld [vmem:[#allocation2 + $0x34] sm:$0xf] }
 0x1df   : > { %3253 = vst.msk [vmem:[#allocation3 + $0x70] sm:$0xf] %vm3224_vm4, %v3185_v30  ;;  %v2269_v5 = vrot.slane %v2268_v20, 4  ;;  %v3549_v20 = vshll.u32 %v3287_v9, 16 }
 0x1e0   : > { %v3187_v61 = vpop.permute.xlu1 %3186  ;;  %2978 = vrot.lane.b32.xlu0 %v2902_v19, %s4638_s28  ;;  %v2277_v30 = vrot.slane %v2275_v12, 4  ;;  %v3994_v56 = vsel %vm5169_vm14, %v4539_v25, %v3993_v15  ;;  %v2757_v12 = vld [vmem:[#allocation2 + $0x88] sm:$0xf]  ;;  %v3263_v15 = vld [vmem:[#allocation2 + $0x30] sm:$0xf] }
 0x1e1   : > { %3254 = vst.msk [vmem:[#allocation3 + $0x74] sm:$0xf] %vm3224_vm4, %v3187_v61  ;;  %v3853_v61 = vld [vmem:[#allocation2 + $0xa4] sm:$0x1]  ;;  %v2274_v54 = vsel %vm4812_vm11, %v2269_v5, %v5768_v21  ;;  %v2894_v7 = vrot.slane %v2757_v12, 5  ;;  %v3551_v5 = vrot.slane %v3549_v20, 5 }
 0x1e2   : > { %2980 = vrot.lane.b32.xlu1 %v2905_v18, %s4638_s28  ;;  %v3714_v29 = vpop.permute.xlu0 %3713  ;;  %v2463_v18 = vshll.u32 %v2196_v3, 16  ;;  %v2278_v42 = vor.u32 %v2277_v30, %v5768_v21  ;;  %v4522_v21 = vrot.slane %v2756_v35, 9  ;;  %v3357_v30 = vshll.u32 %v3263_v15, 16 }
 0x1e3   : > { %3798 = vst.msk [vmem:[#allocation3 + $0x30] sm:$0xf] %vm3785_vm5, %v3714_v29 }
 0x1e4   : > { %v3716_v41 = vpop.permute.xlu1 %3715  ;;  %3140 = vrot.lane.b32.xlu0 %v3070_v28, %s4639_s29  ;;  %v2281_v28 = vshll.u32 %v2173_v38, 16  ;;  %v2465_v36 = vrot.slane %v2463_v18, 5  ;;  %v2279_v48 = vrot.slane %v2278_v42, 4  ;;  %v3354_v38 = vshrl.u32 %v3263_v15, 16  ;;  %v3288_v18 = vld [vmem:[#allocation2 + $0x94] sm:$0xf] }
 0x1e5   : > { %3799 = vst.msk [vmem:[#allocation3 + $0x34] sm:$0xf] %vm3785_vm5, %v3716_v41  ;;  %v2469_v41 = vrot.slane %v2467_v63, 4  ;;  %v3849_v15 = vld [vmem:[#allocation2 + $0x94] sm:$0xf] }
 0x1e6   : > { %3142 = vrot.lane.b32.xlu1 %v3071_v34, %s4639_s29  ;;  %v3746_v55 = vpop.permute.xlu0 %3745  ;;  %v3996_v34 = vrot.slane %v3853_v61, 5  ;;  %v2283_v16 = vrot.slane %v2281_v28, 5  ;;  %v2897_v61 = vrot.slane %v2758_v11, 5  ;;  %v3555_v28 = vshll.u32 %v3288_v18, 16 }
 0x1e7   : > { %3814 = vst.msk [vmem:[#allocation3 + $0x70] sm:$0xf] %vm3785_vm5, %v3746_v55  ;;  %v2460_v55 = vor.u32 %v2459_v2, %v2456_v24  ;;  %v2470_v49 = vor.u32 %v2469_v41, %v2465_v36  ;;  %v3559_v24 = vshrl.u32 %v3288_v18, 16  ;;  %v2895_v2 = vsel %vm5169_vm14, %v4522_v21, %v2894_v7  ;;  %v2192_v21 = vld [vmem:[#allocation2 + $0x78] sm:$0xf] }
 0x1e8   : > { %v3748_v8 = vpop.permute.xlu1 %3747  ;;  %3172 = vrot.lane.b32.xlu0 %v3086_v45, %s4639_s29  ;;  %v3997_v47 = vsel %vm5169_vm14, %v3995_v27, %v3996_v34  ;;  %v2284_v46 = vsel %vm4812_vm11, %v2279_v48, %v2283_v16  ;;  %v3546_v27 = vshrl.u32 %v3287_v9, 16  ;;  %v3359_v34 = vrot.slane %v3357_v30, 5  ;;  %v3289_v48 = vld [vmem:[#allocation2 + $0x98] sm:$0x1] }
 0x1e9   : > { %3815 = vst.msk [vmem:[#allocation3 + $0x74] sm:$0xf] %vm3785_vm5, %v3748_v8  ;;  %v2473_v8 = vshll.u32 %v2197_v44, 16  ;;  %v2461_v57 = vrot.slane %v2460_v55, 4  ;;  %v2471_v60 = vrot.slane %v2470_v49, 4  ;;  %v5825_v16 = vrot.slane %v3555_v28, 5 }
 0x1ea   : > { %3174 = vrot.lane.b32.xlu1 %v3087_v39, %s4639_s29  ;;  %v4051_v59 = vpop.permute.xlu0 %4050  ;;  %v3561_v55 = vrot.slane %v3559_v24, 4  ;;  %v2430_v28 = vshrl.u32 %v2192_v21, 16  ;;  %v2433_v24 = vshll.u32 %v2192_v21, 16 }
 0x1eb   : > { %4135 = vst.msk [vmem:[#allocation3 + $0x30] sm:$0xf] %vm4122_vm6, %v4051_v59  ;;  %v2475_v59 = vrot.slane %v2473_v8, 5  ;;  %v3069_v8 = vld [vmem:[#allocation2 + $0x34] sm:$0xf] }
 0x1ec   : > { %v4053_v52 = vpop.permute.xlu1 %4052  ;;  %3701 = vrot.lane.b32.xlu0 %v3390_v40, %s4640_s30  ;;  %v2732_v40 = vld [vmem:[#allocation2 + $0x24] sm:$0xe] }
 0x1ed   : > { %4136 = vst.msk [vmem:[#allocation3 + $0x34] sm:$0xf] %vm4122_vm6, %v4053_v52  ;;  %v4514_v0 = vrot.slane %v2732_v40, 9  ;;  %v2466_v52 = vsel %vm4812_vm11, %v2461_v57, %v2465_v36  ;;  %v3565_v57 = vshll.u32 %v3289_v48, 16  ;;  %v3084_v40 = vld [vmem:[#allocation2 + $0x90] sm:$0xf] }
 0x1ee   : > { %3703 = vrot.lane.b32.xlu1 %v3400_v62, %s4640_s30  ;;  %v4083_v19 = vpop.permute.xlu0 %4082  ;;  %v2734_v62 = vld [vmem:[#allocation2 + $0x2c] sm:$0x1]  ;;  %v2435_v48 = vrot.slane %v2433_v24, 5  ;;  %v3284_v24 = vld [vmem:[#allocation2 + $0x84] sm:$0xf] }
 0x1ef   : > { %4151 = vst.msk [vmem:[#allocation3 + $0x70] sm:$0xf] %vm4122_vm6, %v4083_v19  ;;  %v2841_v1 = vrot.slane %v2734_v62, 5  ;;  %v2839_v6 = vsel %vm5169_vm14, %v4514_v0, %v2838_v58 }
 0x1f0   : > { %v4085_v23 = vpop.permute.xlu1 %4084  ;;  %3733 = vrot.lane.b32.xlu0 %v3582_v14, %s4640_s30  ;;  %v2840_v14 = vrot.slane %v2838_v58, 4 }
 0x1f1   : > { %4152 = vst.msk [vmem:[#allocation3 + $0x74] sm:$0xf] %vm4122_vm6, %v4085_v23  ;;  %v2896_v23 = vrot.slane %v2894_v7, 4  ;;  %v3826_v7 = vld [vmem:[#allocation2 + $0x38] sm:$0x1] }
 0x1f2   : > { %3735 = vrot.lane.b32.xlu1 %v3592_v51, %s4640_s30  ;;  %v2089_v29 = vpop.permute.xlu0 %2088  ;;  %v2476_v51 = vsel %vm4812_vm11, %v2471_v60, %v2475_v59  ;;  %v2842_v19 = vsel %vm5169_vm14, %v2840_v14, %v2841_v1  ;;  %v3085_v60 = vld [vmem:[#allocation2 + $0x94] sm:$0xf]  ;;  %v3567_v1 = vrot.slane %v3565_v57, 5 }
 0x1f3   : > { %2159 = vst.msk [vmem:[#allocation3 + $0x68] sm:$0xf] %vm2132_vm1, %v2089_v29  ;;  %v3356_v29 = vrot.slane %v3354_v38, 4  ;;  %v2898_v36 = vsel %vm5169_vm14, %v2896_v23, %v2897_v61 }
 0x1f4   : > { %v2091_v37 = vpop.permute.xlu1 %2090  ;;  %4038 = vrot.lane.b32.xlu0 %v3938_v26, %s4641_s6  ;;  %v4613_v45 = vld [vmem:[#allocation3 + $0x30] sm:$0xff]   ;;  %v3363_v26 = vshll.u32 %v3264_v32, 16 }
 0x1f5   : > { %2160 = vst.msk [vmem:[#allocation3 + $0x6c] sm:$0xf] %vm2132_vm1, %v2091_v37  ;;  %v4291_v53 = vsel %vm4268_vm7, %v4613_v45, 0  ;;  %v3548_v45 = vrot.slane %v3546_v27, 4 }
 0x1f6   : > { %4040 = vrot.lane.b32.xlu1 %v3941_v4, %s4641_s6  ;;  %v2618_v39 = vpop.permute.xlu0 %2617  ;;  %v3367_v4 = vshrl.u32 %v3264_v32, 16  ;;  %v3365_v41 = vrot.slane %v3363_v26, 5  ;;  %v3933_v26 = vrot.slane %v3826_v7, 5 }
 0x1f7   : > { %2704 = vst.msk [vmem:[#allocation3 + $0x28] sm:$0xf] %vm2693_vm2, %v2618_v39  ;;  %v3068_v39 = vld [vmem:[#allocation2 + $0x30] sm:$0xf] }
 0x1f8   : > { %v2620_v50 = vpop.permute.xlu1 %2619  ;;  %v4612_v10 = vld [vmem:[#allocation3 + $0x70] sm:$0xff]   ;;  %4070 = vrot.lane.b32.xlu0 %v3994_v56, %s4641_s6  ;;  %v3369_v37 = vrot.slane %v3367_v4, 4  ;;  %v3265_v56 = vld [vmem:[#allocation2 + $0x38] sm:$0x1]  ;;  %v3986_v4 = vrot.slane %v3849_v15, 5 }
 0x1f9   : > { %2705 = vst.msk [vmem:[#allocation3 + $0x2c] sm:$0xf] %vm2693_vm2, %v2620_v50  ;;  %4584 = vmatprep.subr.msk.bf16.mxu0 %vm4268_vm7, %v4612_v10  ;;  %v3373_v50 = vshll.u32 %v3265_v56, 16 }
 0x1fa   : > { %4072 = vrot.lane.b32.xlu1 %v3997_v47, %s4641_s6  ;;  %v2650_v22 = vpop.permute.xlu0 %2649  ;;  %4568 = vmatpush3.bf16.xpose.msra.mxu0 %v4291_v53  ;;  %v3360_v47 = vor.u32 %v3359_v34, %v3356_v29  ;;  %v3370_v13 = vor.u32 %v3369_v37, %v3365_v41  ;;  %v3552_v53 = vor.u32 %v3551_v5, %v3548_v45  ;;  %v2170_v34 = vld [vmem:[#allocation2 + $0x20] sm:$0x1] }
 0x1fb   : > { %2720 = vst.msk [vmem:[#allocation3 + $0x68] sm:$0xf] %vm2693_vm2, %v2650_v22  ;;  %v3825_v22 = vld [vmem:[#allocation2 + $0x34] sm:$0xf]  ;;  %v3375_v62 = vrot.slane %v3373_v50, 5 }
 0x1fc   : > { %v2652_v17 = vpop.permute.xlu1 %2651  ;;  %2605 = vrot.lane.b32.xlu0 %v2274_v54, %s4637_s27  ;;  %v3562_v54 = vor.u32 %v3561_v55, %v5825_v16  ;;  %v3361_v58 = vrot.slane %v3360_v47, 4  ;;  %v3371_v59 = vrot.slane %v3370_v13, 4  ;;  %v3553_v0 = vrot.slane %v3552_v53, 4 }
 0x1fd   : > { %2721 = vst.msk [vmem:[#allocation3 + $0x6c] sm:$0xf] %vm2693_vm2, %v2652_v17  ;;  %v2168_v17 = vld [vmem:[#allocation2 + $0x18] sm:$0xf]  ;;  %v2432_v47 = vrot.slane %v2430_v28, 4 }
 0x1fe   : > { %2607 = vrot.lane.b32.xlu1 %v2284_v46, %s4637_s27  ;;  %v2955_v3 = vpop.permute.xlu0 %2954  ;;  %v3563_v14 = vrot.slane %v3562_v54, 4  ;;  %v3366_v35 = vsel %vm4812_vm11, %v3361_v58, %v3365_v41  ;;  %v2241_v11 = vshll.u32 %v2168_v17, 16  ;;  %v3558_v30 = vsel %vm4812_vm11, %v3553_v0, %v5825_v16  ;;  %v2194_v54 = vld [vmem:[#allocation2 + $0x80] sm:$0x1] }
 0x1ff   : > { %3041 = vst.msk [vmem:[#allocation3 + $0x28] sm:$0xf] %vm3030_vm3, %v2955_v3  ;;  %v3824_v3 = vld [vmem:[#allocation2 + $0x30] sm:$0xe]  ;;  %v3988_v16 = vrot.slane %v3986_v4, 4 }
 0x200   : > { %v2957_v33 = vpop.permute.xlu1 %2956  ;;  %2637 = vrot.lane.b32.xlu0 %v2466_v52, %s4637_s27  ;;  %v2169_v52 = vld [vmem:[#allocation2 + $0x1c] sm:$0xf]  ;;  %v4530_v18 = vrot.slane %v3824_v3, 9  ;;  %v3568_v23 = vsel %vm4812_vm11, %v3563_v14, %v3567_v1  ;;  %v2243_v20 = vrot.slane %v2241_v11, 5  ;;  %v2729_v3 = vld [vmem:[#allocation2 + $0x18] sm:$0xe] }
 0x201   : > { %3042 = vst.msk [vmem:[#allocation3 + $0x2c] sm:$0xf] %vm3030_vm3, %v2957_v33  ;;  %v2238_v33 = vshrl.u32 %v2168_v17, 16  ;;  %v2247_v9 = vshll.u32 %v2169_v52, 16  ;;  %v2449_v17 = vshll.u32 %v2194_v54, 16 }
 0x202   : > { %2639 = vrot.lane.b32.xlu1 %v2476_v51, %s4637_s27  ;;  %v2987_v63 = vpop.permute.xlu0 %2986  ;;  %v3930_v51 = vrot.slane %v3825_v22, 5  ;;  %v2436_v22 = vor.u32 %v2435_v48, %v2432_v47  ;;  %v2731_v11 = vld [vmem:[#allocation2 + $0x20] sm:$0x1] }
 0x203   : > { %3057 = vst.msk [vmem:[#allocation3 + $0x68] sm:$0xf] %vm3030_vm3, %v2987_v63  ;;  %v2193_v63 = vld [vmem:[#allocation2 + $0x7c] sm:$0xf]  ;;  %v2240_v27 = vrot.slane %v2238_v33, 4  ;;  %v2249_v29 = vrot.slane %v2247_v9, 5 }
 0x204   : > { %v2989_v25 = vpop.permute.xlu1 %2988  ;;  %2942 = vrot.lane.b32.xlu0 %v2839_v6, %s4638_s28  ;;  %v3376_v6 = vsel %vm4812_vm11, %v3371_v59, %v3375_v62  ;;  %v3932_v61 = vrot.slane %v3930_v51, 4  ;;  %v2443_v41 = vshrl.u32 %v2193_v63, 16  ;;  %v3931_v56 = vsel %vm5169_vm14, %v4530_v18, %v3930_v51  ;;  %v2754_v9 = vld [vmem:[#allocation2 + $0x7c] sm:$0xf] }
 0x205   : > { %3058 = vst.msk [vmem:[#allocation3 + $0x6c] sm:$0xf] %vm3030_vm3, %v2989_v25  ;;  %v3848_v25 = vld [vmem:[#allocation2 + $0x90] sm:$0xe]  ;;  %v2244_v55 = vor.u32 %v2243_v20, %v2240_v27  ;;  %v2437_v1 = vrot.slane %v2436_v22, 4  ;;  %v2451_v33 = vrot.slane %v2449_v17, 5 }
 0x206   : > { %2944 = vrot.lane.b32.xlu1 %v2842_v19, %s4638_s28  ;;  %v3149_v42 = vpop.permute.xlu0 %3148  ;;  %v2251_v19 = vshrl.u32 %v2169_v52, 16  ;;  %v3934_v45 = vsel %vm5169_vm14, %v3932_v61, %v3933_v26  ;;  %v4538_v5 = vrot.slane %v3848_v25, 9  ;;  %v2834_v18 = vrot.slane %v2731_v11, 5  ;;  %v2753_v61 = vld [vmem:[#allocation2 + $0x78] sm:$0xe] }
 0x207   : > { %3235 = vst.msk [vmem:[#allocation3 + $0x28] sm:$0xf] %vm3224_vm4, %v3149_v42  ;;  %v2887_v26 = vrot.slane %v2754_v9, 5  ;;  %v2755_v27 = vld [vmem:[#allocation2 + $0x80] sm:$0x1] }
 0x208   : > { %v3151_v44 = vpop.permute.xlu1 %3150  ;;  %2974 = vrot.lane.b32.xlu0 %v2895_v2, %s4638_s28  ;;  %v2253_v42 = vrot.slane %v2251_v19, 4  ;;  %v3987_v57 = vsel %vm5169_vm14, %v4538_v5, %v3986_v4  ;;  %v4513_v19 = vrot.slane %v2729_v3, 9  ;;  %v3260_v4 = vld [vmem:[#allocation2 + $0x24] sm:$0xf]  ;;  %v3261_v20 = vld [vmem:[#allocation2 + $0x28] sm:$0xf] }
 0x209   : > { %3236 = vst.msk [vmem:[#allocation3 + $0x2c] sm:$0xf] %vm3224_vm4, %v3151_v44  ;;  %v3850_v44 = vld [vmem:[#allocation2 + $0x98] sm:$0x1]  ;;  %v3083_v11 = vld [vmem:[#allocation2 + $0x88] sm:$0xf] }
 0x20a   : > { %2976 = vrot.lane.b32.xlu1 %v2898_v36, %s4638_s28  ;;  %v3181_v49 = vpop.permute.xlu0 %3180  ;;  %v2439_v36 = vshll.u32 %v2193_v63, 16  ;;  %v2254_v13 = vor.u32 %v2253_v42, %v2249_v29  ;;  %v3333_v42 = vshll.u32 %v3260_v4, 16  ;;  %v2165_v9 = vld [vmem:[#allocation2 + $0xc] sm:$0xf] }
 0x20b   : > { %3251 = vst.msk [vmem:[#allocation3 + $0x68] sm:$0xf] %vm3224_vm4, %v3181_v49 }
 0x20c   : > { %v3183_v10 = vpop.permute.xlu1 %3182  ;;  %3136 = vrot.lane.b32.xlu0 %v3068_v39, %s4639_s29  ;;  %v2257_v39 = vshll.u32 %v2170_v34, 16  ;;  %v2441_v50 = vrot.slane %v2439_v36, 5  ;;  %v2255_v59 = vrot.slane %v2254_v13, 4  ;;  %v3330_v34 = vshrl.u32 %v3260_v4, 16  ;;  %v3285_v36 = vld [vmem:[#allocation2 + $0x88] sm:$0xf] }
 0x20d   : > { %3252 = vst.msk [vmem:[#allocation3 + $0x6c] sm:$0xf] %vm3224_vm4, %v3183_v10  ;;  %v2445_v10 = vrot.slane %v2443_v41, 4  ;;  %v3535_v47 = vshrl.u32 %v3285_v36, 16  ;;  %v3846_v4 = vld [vmem:[#allocation2 + $0x88] sm:$0xf] }
 0x20e   : > { %3138 = vrot.lane.b32.xlu1 %v3069_v8, %s4639_s29  ;;  %v3710_v46 = vpop.permute.xlu0 %3709  ;;  %v3989_v8 = vrot.slane %v3850_v44, 5  ;;  %v2259_v58 = vrot.slane %v2257_v39, 5  ;;  %v2890_v44 = vrot.slane %v2755_v27, 5  ;;  %v3531_v39 = vshll.u32 %v3285_v36, 16 }
 0x20f   : > { %3796 = vst.msk [vmem:[#allocation3 + $0x28] sm:$0xf] %vm3785_vm5, %v3710_v46  ;;  %v2446_v62 = vor.u32 %v2445_v10, %v2441_v50  ;;  %v2217_v27 = vshll.u32 %v2165_v9, 16 }
 0x210   : > { %v3712_v12 = vpop.permute.xlu1 %3711  ;;  %3168 = vrot.lane.b32.xlu0 %v3084_v40, %s4639_s29  ;;  %v2245_v40 = vrot.slane %v2244_v55, 4  ;;  %v2260_v7 = vsel %vm4812_vm11, %v2255_v59, %v2259_v58  ;;  %v3525_v55 = vshll.u32 %v3284_v24, 16  ;;  %v5903_v22 = vrot.slane %v3531_v39, 5 }
 0x211   : > { %3797 = vst.msk [vmem:[#allocation3 + $0x2c] sm:$0xf] %vm3785_vm5, %v3712_v12  ;;  %v2730_v12 = vld [vmem:[#allocation2 + $0x1c] sm:$0xf]  ;;  %v2447_v15 = vrot.slane %v2446_v62, 4 }
 0x212   : > { %3170 = vrot.lane.b32.xlu1 %v3085_v60, %s4639_s29  ;;  %v3742_v32 = vpop.permute.xlu0 %3741  ;;  %v3990_v60 = vsel %vm5169_vm14, %v3988_v16, %v3989_v8  ;;  %v2250_v52 = vsel %vm4812_vm11, %v2245_v40, %v2249_v29  ;;  %v2831_v51 = vrot.slane %v2730_v12, 5  ;;  %v4521_v29 = vrot.slane %v2753_v61, 9  ;;  %v3286_v62 = vld [vmem:[#allocation2 + $0x8c] sm:$0x1]  ;;  %v3067_v12 = vld [vmem:[#allocation2 + $0x28] sm:$0xf] }
 0x213   : > { %3812 = vst.msk [vmem:[#allocation3 + $0x68] sm:$0xf] %vm3785_vm5, %v3742_v32  ;;  %v3522_v16 = vshrl.u32 %v3284_v24, 16  ;;  %v3335_v8 = vrot.slane %v3333_v42, 5  ;;  %v3527_v58 = vrot.slane %v3525_v55, 5  ;;  %v2219_v55 = vrot.slane %v2217_v27, 5 }
 0x214   : > { %v3744_v38 = vpop.permute.xlu1 %3743  ;;  %3697 = vrot.lane.b32.xlu0 %v3366_v35, %s4640_s30  ;;  %v2832_v28 = vsel %vm5169_vm14, %v4513_v19, %v2831_v51  ;;  %v2888_v48 = vsel %vm5169_vm14, %v4521_v29, %v2887_v26  ;;  %v2189_v29 = vld [vmem:[#allocation2 + $0x6c] sm:$0xf] }
 0x215   : > { %3813 = vst.msk [vmem:[#allocation3 + $0x6c] sm:$0xf] %vm3785_vm5, %v3744_v38  ;;  %v2442_v38 = vsel %vm4812_vm11, %v2437_v1, %v2441_v50  ;;  %v3524_v40 = vrot.slane %v3522_v16, 4  ;;  %v2406_v39 = vshrl.u32 %v2189_v29, 16 }
 0x216   : > { %3699 = vrot.lane.b32.xlu1 %v3376_v6, %s4640_s30  ;;  %v4047_v2 = vpop.permute.xlu0 %4046 }
 0x217   : > { %4133 = vst.msk [vmem:[#allocation3 + $0x28] sm:$0xf] %vm4122_vm6, %v4047_v2  ;;  %v3528_v1 = vor.u32 %v3527_v58, %v3524_v40 }
 0x218   : > { %v4049_v37 = vpop.permute.xlu1 %4048  ;;  %3729 = vrot.lane.b32.xlu0 %v3558_v30, %s4640_s30  ;;  %v2833_v30 = vrot.slane %v2831_v51, 4  ;;  %v3541_v51 = vshll.u32 %v3286_v62, 16 }
 0x219   : > { %4134 = vst.msk [vmem:[#allocation3 + $0x2c] sm:$0xf] %vm4122_vm6, %v4049_v37  ;;  %v2889_v37 = vrot.slane %v2887_v26, 4  ;;  %v3823_v26 = vld [vmem:[#allocation2 + $0x2c] sm:$0x1] }
 0x21a   : > { %3731 = vrot.lane.b32.xlu1 %v3568_v23, %s4640_s30  ;;  %v4079_v49 = vpop.permute.xlu0 %4078  ;;  %v2452_v23 = vsel %vm4812_vm11, %v2447_v15, %v2451_v33  ;;  %v2835_v2 = vsel %vm5169_vm14, %v2833_v30, %v2834_v18  ;;  %v3822_v15 = vld [vmem:[#allocation2 + $0x28] sm:$0xf]  ;;  %v3543_v18 = vrot.slane %v3541_v51, 5 }
 0x21b   : > { %4149 = vst.msk [vmem:[#allocation3 + $0x68] sm:$0xf] %vm4122_vm6, %v4079_v49  ;;  %v3332_v49 = vrot.slane %v3330_v34, 4  ;;  %v2891_v50 = vsel %vm5169_vm14, %v2889_v37, %v2890_v44 }
 0x21c   : > { %v4081_v53 = vpop.permute.xlu1 %4080  ;;  %4034 = vrot.lane.b32.xlu0 %v3931_v56, %s4641_s6  ;;  %v3339_v56 = vshll.u32 %v3261_v20, 16 }
 0x21d   : > { %4150 = vst.msk [vmem:[#allocation3 + $0x6c] sm:$0xf] %vm4122_vm6, %v4081_v53  ;;  %v3336_v59 = vor.u32 %v3335_v8, %v3332_v49  ;;  %v3847_v49 = vld [vmem:[#allocation2 + $0x8c] sm:$0x1] }
 0x21e   : > { %4036 = vrot.lane.b32.xlu1 %v3934_v45, %s4641_s6  ;;  %v2614_v46 = vpop.permute.xlu0 %2613  ;;  %v3343_v45 = vshrl.u32 %v3261_v20, 16  ;;  %v3341_v10 = vrot.slane %v3339_v56, 5  ;;  %v3926_v56 = vrot.slane %v3823_v26, 5 }
 0x21f   : > { %2702 = vst.msk [vmem:[#allocation3 + $0x20] sm:$0xf] %vm2693_vm2, %v2614_v46  ;;  %v3537_v46 = vrot.slane %v3535_v47, 4  ;;  %v2409_v47 = vshll.u32 %v2189_v29, 16 }
 0x220   : > { %v2616_v0 = vpop.permute.xlu1 %2615  ;;  %4066 = vrot.lane.b32.xlu0 %v3987_v57, %s4641_s6  ;;  %v4615_v14 = vld [vmem:[#allocation3 + $0x28] sm:$0xff]   ;;  %v3345_v53 = vrot.slane %v3343_v45, 4  ;;  %v3262_v57 = vld [vmem:[#allocation2 + $0x2c] sm:$0x1]  ;;  %v3979_v45 = vrot.slane %v3846_v4, 5 }
 0x221   : > { %2703 = vst.msk [vmem:[#allocation3 + $0x24] sm:$0xf] %vm2693_vm2, %v2616_v0  ;;  %v4288_v21 = vsel %vm4268_vm7, %v4615_v14, 0  ;;  %v3538_v3 = vor.u32 %v3537_v46, %v5903_v22  ;;  %v3982_v46 = vrot.slane %v3847_v49, 5  ;;  %v2411_v62 = vrot.slane %v2409_v47, 5 }
 0x222   : > { %4068 = vrot.lane.b32.xlu1 %v3990_v60, %s4641_s6  ;;  %v2646_v35 = vpop.permute.xlu0 %2645  ;;  %v3066_v60 = vld [vmem:[#allocation2 + $0x24] sm:$0xf]  ;;  %v3346_v0 = vor.u32 %v3345_v53, %v3341_v10 }
 0x223   : > { %2718 = vst.msk [vmem:[#allocation3 + $0x60] sm:$0xf] %vm2693_vm2, %v2646_v35  ;;  %v3082_v35 = vld [vmem:[#allocation2 + $0x84] sm:$0xf]  ;;  %v3539_v30 = vrot.slane %v3538_v3, 4 }
 0x224   : > { %v2648_v32 = vpop.permute.xlu1 %2647  ;;  %v4614_v6 = vld [vmem:[#allocation3 + $0x68] sm:$0xff]   ;;  %2601 = vrot.lane.b32.xlu0 %v2250_v52, %s4637_s27  ;;  %v3349_v52 = vshll.u32 %v3262_v57, 16 }
 0x225   : > { %2719 = vst.msk [vmem:[#allocation3 + $0x64] sm:$0xf] %vm2693_vm2, %v2648_v32  ;;  %4585 = vmatprep.subr.msk.bf16.mxu0 %vm4268_vm7, %v4614_v6  ;;  %v3347_v32 = vrot.slane %v3346_v0, 4  ;;  %v3544_v37 = vsel %vm4812_vm11, %v3539_v30, %v3543_v18 }
 0x226   : > { %2603 = vrot.lane.b32.xlu1 %v2260_v7, %s4637_s27  ;;  %v2951_v63 = vpop.permute.xlu0 %2950  ;;  %4570 = vmatpush3.bf16.xpose.msra.mxu0 %v4288_v21  ;;  %v3337_v7 = vrot.slane %v3336_v59, 4  ;;  %v3351_v6 = vrot.slane %v3349_v52, 5  ;;  %v3529_v21 = vrot.slane %v3528_v1, 4  ;;  %v2408_v59 = vrot.slane %v2406_v39, 4 }
 0x227   : > { %3039 = vst.msk [vmem:[#allocation3 + $0x20] sm:$0xf] %vm3030_vm3, %v2951_v63  ;;  %v3821_v63 = vld [vmem:[#allocation2 + $0x24] sm:$0xe] }
 0x228   : > { %v2953_v25 = vpop.permute.xlu1 %2952  ;;  %2633 = vrot.lane.b32.xlu0 %v2442_v38, %s4637_s27  ;;  %v2166_v38 = vld [vmem:[#allocation2 + $0x10] sm:$0xf]  ;;  %v3342_v61 = vsel %vm4812_vm11, %v3337_v7, %v3341_v10  ;;  %v3534_v42 = vsel %vm4812_vm11, %v3529_v21, %v5903_v22  ;;  %v4529_v36 = vrot.slane %v3821_v63, 9  ;;  %v3981_v22 = vrot.slane %v3979_v45, 4 }
 0x229   : > { %3040 = vst.msk [vmem:[#allocation3 + $0x24] sm:$0xf] %vm3030_vm3, %v2953_v25  ;;  %v2214_v25 = vshrl.u32 %v2165_v9, 16  ;;  %v2223_v24 = vshll.u32 %v2166_v38, 16  ;;  %v2412_v7 = vor.u32 %v2411_v62, %v2408_v59  ;;  %v2727_v21 = vld [vmem:[#allocation2 + $0x10] sm:$0xf] }
 0x22a   : > { %2635 = vrot.lane.b32.xlu1 %v2452_v23, %s4637_s27  ;;  %v2983_v41 = vpop.permute.xlu0 %2982  ;;  %v3923_v23 = vrot.slane %v3822_v15, 5  ;;  %v2824_v27 = vrot.slane %v2727_v21, 5 }
 0x22b   : > { %3055 = vst.msk [vmem:[#allocation3 + $0x60] sm:$0xf] %vm3030_vm3, %v2983_v41  ;;  %v2190_v41 = vld [vmem:[#allocation2 + $0x70] sm:$0xf]  ;;  %v2216_v16 = vrot.slane %v2214_v25, 4  ;;  %v2225_v8 = vrot.slane %v2223_v24, 5 }
 0x22c   : > { %v2985_v5 = vpop.permute.xlu1 %2984  ;;  %2938 = vrot.lane.b32.xlu0 %v2832_v28, %s4638_s28  ;;  %v3352_v28 = vsel %vm4812_vm11, %v3347_v32, %v3351_v6  ;;  %v3925_v44 = vrot.slane %v3923_v23, 4  ;;  %v2419_v10 = vshrl.u32 %v2190_v41, 16  ;;  %v3924_v57 = vsel %vm5169_vm14, %v4529_v36, %v3923_v23  ;;  %v2751_v23 = vld [vmem:[#allocation2 + $0x70] sm:$0xf]  ;;  %v2726_v25 = vld [vmem:[#allocation2 + $0xc] sm:$0xe] }
 0x22d   : > { %3056 = vst.msk [vmem:[#allocation3 + $0x64] sm:$0xf] %vm3030_vm3, %v2985_v5  ;;  %v3845_v5 = vld [vmem:[#allocation2 + $0x84] sm:$0xe]  ;;  %v2413_v18 = vrot.slane %v2412_v7, 4 }
 0x22e   : > { %2940 = vrot.lane.b32.xlu1 %v2835_v2, %s4638_s28  ;;  %v3145_v13 = vpop.permute.xlu0 %3144  ;;  %v2227_v2 = vshrl.u32 %v2166_v38, 16  ;;  %v3927_v40 = vsel %vm5169_vm14, %v3925_v44, %v3926_v56  ;;  %v4537_v58 = vrot.slane %v3845_v5, 9  ;;  %v2421_v1 = vrot.slane %v2419_v10, 4  ;;  %v2728_v24 = vld [vmem:[#allocation2 + $0x14] sm:$0x1] }
 0x22f   : > { %3233 = vst.msk [vmem:[#allocation3 + $0x20] sm:$0xf] %vm3224_vm4, %v3145_v13  ;;  %v2750_v36 = vld [vmem:[#allocation2 + $0x6c] sm:$0xe]  ;;  %v2826_v56 = vrot.slane %v2824_v27, 4 }
 0x230   : > { %v3147_v54 = vpop.permute.xlu1 %3146  ;;  %2970 = vrot.lane.b32.xlu0 %v2888_v48, %s4638_s28  ;;  %v2229_v13 = vrot.slane %v2227_v2, 4  ;;  %v3980_v51 = vsel %vm5169_vm14, %v4537_v58, %v3979_v45  ;;  %v2880_v2 = vrot.slane %v2751_v23, 5  ;;  %v2827_v45 = vrot.slane %v2728_v24, 5  ;;  %v3257_v5 = vld [vmem:[#allocation2 + $0x18] sm:$0xf] }
 0x231   : > { %3234 = vst.msk [vmem:[#allocation3 + $0x24] sm:$0xf] %vm3224_vm4, %v3147_v54  ;;  %v2167_v54 = vld [vmem:[#allocation2 + $0x14] sm:$0x1]  ;;  %v4520_v39 = vrot.slane %v2750_v36, 9 }
 0x232   : > { %2972 = vrot.lane.b32.xlu1 %v2891_v50, %s4638_s28  ;;  %v3177_v17 = vpop.permute.xlu0 %3176  ;;  %v2415_v50 = vshll.u32 %v2190_v41, 16  ;;  %v2233_v0 = vshll.u32 %v2167_v54, 16  ;;  %v2752_v41 = vld [vmem:[#allocation2 + $0x74] sm:$0x1]  ;;  %v2882_v47 = vrot.slane %v2880_v2, 4  ;;  %v2828_v10 = vsel %vm5169_vm14, %v2826_v56, %v2827_v45 }
 0x233   : > { %3249 = vst.msk [vmem:[#allocation3 + $0x60] sm:$0xf] %vm3224_vm4, %v3177_v17  ;;  %v3282_v58 = vld [vmem:[#allocation2 + $0x7c] sm:$0xf]  ;;  %v3820_v45 = vld [vmem:[#allocation2 + $0x20] sm:$0x1] }
 0x234   : > { %v3179_v14 = vpop.permute.xlu1 %3178  ;;  %3132 = vrot.lane.b32.xlu0 %v3066_v60, %s4639_s29  ;;  %v2220_v60 = vor.u32 %v2219_v55, %v2216_v16  ;;  %v2417_v52 = vrot.slane %v2415_v50, 5  ;;  %v2235_v6 = vrot.slane %v2233_v0, 5  ;;  %v3258_v55 = vld [vmem:[#allocation2 + $0x1c] sm:$0xf] }
 0x235   : > { %3250 = vst.msk [vmem:[#allocation3 + $0x64] sm:$0xf] %vm3224_vm4, %v3179_v14  ;;  %v2191_v14 = vld [vmem:[#allocation2 + $0x74] sm:$0x1]  ;;  %v3319_v54 = vshrl.u32 %v3258_v55, 16 }
 0x236   : > { %3134 = vrot.lane.b32.xlu1 %v3067_v12, %s4639_s29  ;;  %v3706_v33 = vpop.permute.xlu0 %3705  ;;  %v2230_v12 = vor.u32 %v2229_v13, %v2225_v8  ;;  %v2425_v15 = vshll.u32 %v2191_v14, 16  ;;  %v2422_v9 = vor.u32 %v2421_v1, %v2417_v52  ;;  %v3309_v13 = vshll.u32 %v3257_v5, 16  ;;  %v3819_v24 = vld [vmem:[#allocation2 + $0x1c] sm:$0xf] }
 0x237   : > { %3794 = vst.msk [vmem:[#allocation3 + $0x20] sm:$0xf] %vm3785_vm5, %v3706_v33  ;;  %v3507_v14 = vshll.u32 %v3282_v58, 16  ;;  %v3511_v1 = vshrl.u32 %v3282_v58, 16 }
 0x238   : > { %v3708_v19 = vpop.permute.xlu1 %3707  ;;  %3164 = vrot.lane.b32.xlu0 %v3082_v35, %s4639_s29  ;;  %v2221_v35 = vrot.slane %v2220_v60, 4  ;;  %v2231_v32 = vrot.slane %v2230_v12, 4  ;;  %v2427_v63 = vrot.slane %v2425_v15, 5  ;;  %v2423_v4 = vrot.slane %v2422_v9, 4 }
 0x239   : > { %3795 = vst.msk [vmem:[#allocation3 + $0x24] sm:$0xf] %vm3785_vm5, %v3708_v19  ;;  %v3311_v59 = vrot.slane %v3309_v13, 5  ;;  %v3513_v21 = vrot.slane %v3511_v1, 4  ;;  %v4361_v1 = vld [vmem:[%s6115_s2] sm:$0xf] }
 0x23a   : > { %3166 = vrot.lane.b32.xlu1 %v3083_v11, %s4639_s29  ;;  %v3738_v20 = vpop.permute.xlu0 %3737  ;;  %v3983_v11 = vsel %vm5169_vm14, %v3981_v22, %v3982_v46  ;;  %v2226_v38 = vsel %vm4812_vm11, %v2221_v35, %v2225_v8  ;;  %v2236_v26 = vsel %vm4812_vm11, %v2231_v32, %v2235_v6  ;;  %v2428_v44 = vsel %vm4812_vm11, %v2423_v4, %v2427_v63  ;;  %v3064_v35 = vld [vmem:[#allocation2 + $0x18] sm:$0xf]  ;;  %v3065_v32 = vld [vmem:[#allocation2 + $0x1c] sm:$0xf] }
 0x23b   : > { %3810 = vst.msk [vmem:[#allocation3 + $0x60] sm:$0xf] %vm3785_vm5, %v3738_v20  ;;  %v3306_v8 = vshrl.u32 %v3257_v5, 16  ;;  %v2881_v22 = vsel %vm5169_vm14, %v4520_v39, %v2880_v2  ;;  %v3843_v5 = vld [vmem:[#allocation2 + $0x7c] sm:$0xf] }
 0x23c   : > { %v3740_v34 = vpop.permute.xlu1 %3739  ;;  %3693 = vrot.lane.b32.xlu0 %v3342_v61, %s4640_s30  ;;  %v3972_v13 = vrot.slane %v3843_v5, 5 }
 0x23d   : > { %3811 = vst.msk [vmem:[#allocation3 + $0x64] sm:$0xf] %vm3785_vm5, %v3740_v34  ;;  %v2418_v34 = vsel %vm4812_vm11, %v2413_v18, %v2417_v52  ;;  %v3308_v60 = vrot.slane %v3306_v8, 4  ;;  %v3321_v52 = vrot.slane %v3319_v54, 4  ;;  %v3080_v18 = vld [vmem:[#allocation2 + $0x78] sm:$0xf] }
 0x23e   : > { %3695 = vrot.lane.b32.xlu1 %v3352_v28, %s4640_s30  ;;  %v4043_v48 = vpop.permute.xlu0 %4042  ;;  %v3842_v8 = vld [vmem:[#allocation2 + $0x78] sm:$0xe] }
 0x23f   : > { %4131 = vst.msk [vmem:[#allocation3 + $0x20] sm:$0xf] %vm4122_vm6, %v4043_v48  ;;  %v2883_v48 = vrot.slane %v2752_v41, 5  ;;  %v3312_v7 = vor.u32 %v3311_v59, %v3308_v60  ;;  %v4536_v54 = vrot.slane %v3842_v8, 9 }
 0x240   : > { %v4045_v53 = vpop.permute.xlu1 %4044  ;;  %3725 = vrot.lane.b32.xlu0 %v3534_v42, %s4640_s30  ;;  %v4512_v42 = vrot.slane %v2726_v25, 9 }
 0x241   : > { %4132 = vst.msk [vmem:[#allocation3 + $0x24] sm:$0xf] %vm4122_vm6, %v4045_v53  ;;  %v3315_v53 = vshll.u32 %v3258_v55, 16  ;;  %v2884_v46 = vsel %vm5169_vm14, %v2882_v47, %v2883_v48  ;;  %v3313_v63 = vrot.slane %v3312_v7, 4 }
 0x242   : > { %3727 = vrot.lane.b32.xlu1 %v3544_v37, %s4640_s30  ;;  %v4075_v17 = vpop.permute.xlu0 %4074  ;;  %v2825_v49 = vsel %vm5169_vm14, %v4512_v42, %v2824_v27 }
 0x243   : > { %4147 = vst.msk [vmem:[#allocation3 + $0x60] sm:$0xf] %vm4122_vm6, %v4075_v17  ;;  %v3317_v0 = vrot.slane %v3315_v53, 5 }
 0x244   : > { %v4077_v3 = vpop.permute.xlu1 %4076  ;;  %4030 = vrot.lane.b32.xlu0 %v3924_v57, %s4641_s6  ;;  %v3281_v57 = vld [vmem:[#allocation2 + $0x78] sm:$0xf] }
 0x245   : > { %4148 = vst.msk [vmem:[#allocation3 + $0x64] sm:$0xf] %vm4122_vm6, %v4077_v3  ;;  %v3498_v62 = vshrl.u32 %v3281_v57, 16  ;;  %v3501_v17 = vshll.u32 %v3281_v57, 16  ;;  %v3322_v6 = vor.u32 %v3321_v52, %v3317_v0  ;;  %v3318_v2 = vsel %vm4812_vm11, %v3313_v63, %v3317_v0 }
 0x246   : > { %4032 = vrot.lane.b32.xlu1 %v3927_v40, %s4641_s6  ;;  %v2610_v33 = vpop.permute.xlu0 %2609 }
 0x247   : > { %2700 = vst.msk [vmem:[#allocation3 + $0x18] sm:$0xf] %vm2693_vm2, %v2610_v33  ;;  %v3500_v15 = vrot.slane %v3498_v62, 4  ;;  %v3503_v33 = vrot.slane %v3501_v17, 5  ;;  %v3323_v4 = vrot.slane %v3322_v6, 4 }
 0x248   : > { %v2612_v19 = vpop.permute.xlu1 %2611  ;;  %4062 = vrot.lane.b32.xlu0 %v3980_v51, %s4641_s6  ;;  %v4617_v30 = vld [vmem:[#allocation3 + $0x20] sm:$0xff]   ;;  %v3259_v51 = vld [vmem:[#allocation2 + $0x20] sm:$0x1] }
 0x249   : > { %2701 = vst.msk [vmem:[#allocation3 + $0x1c] sm:$0xf] %vm2693_vm2, %v2612_v19  ;;  %v4285_v29 = vsel %vm4268_vm7, %v4617_v30, 0  ;;  %v3325_v9 = vshll.u32 %v3259_v51, 16  ;;  %v3509_v19 = vrot.slane %v3507_v14, 5  ;;  %v3504_v23 = vor.u32 %v3503_v33, %v3500_v15 }
 0x24a   : > { %4064 = vrot.lane.b32.xlu1 %v3983_v11, %s4641_s6  ;;  %v2642_v61 = vpop.permute.xlu0 %2641  ;;  %v3283_v30 = vld [vmem:[#allocation2 + $0x80] sm:$0x1] }
 0x24b   : > { %2716 = vst.msk [vmem:[#allocation3 + $0x58] sm:$0xf] %vm2693_vm2, %v2642_v61  ;;  %v3327_v25 = vrot.slane %v3325_v9, 5  ;;  %v3514_v27 = vor.u32 %v3513_v21, %v3509_v19  ;;  %v6021_v62 = vld [vmem:[%s6114_s1] sm:$0x3] }
 0x24c   : > { %v2644_v20 = vpop.permute.xlu1 %2643  ;;  %v4616_v28 = vld [vmem:[#allocation3 + $0x60] sm:$0xff]   ;;  %2597 = vrot.lane.b32.xlu0 %v2226_v38, %s4637_s27  ;;  %4581 = vmatprep.mubr.msk.bf16.mxu0 %vm4268_vm7, %v6021_v62  ;;  %v4379_v15 = vld [vmem:[%s6117_s4] sm:$0xf] }
 0x24d   : > { %2717 = vst.msk [vmem:[#allocation3 + $0x5c] sm:$0xf] %vm2693_vm2, %v2644_v20  ;;  %4586 = vmatprep.subr.msk.bf16.mxu0 %vm4268_vm7, %v4616_v28  ;;  %v3517_v20 = vshll.u32 %v3283_v30, 16  ;;  %v3328_v42 = vsel %vm4812_vm11, %v3323_v4, %v3327_v25  ;;  %v3515_v36 = vrot.slane %v3514_v27, 4 }
 0x24e   : > { %2599 = vrot.lane.b32.xlu1 %v2236_v26, %s4637_s27  ;;  %v2947_v37 = vpop.permute.xlu0 %2946  ;;  %4572 = vmatpush3.bf16.xpose.msra.mxu0 %v4285_v29  ;;  %v3081_v26 = vld [vmem:[#allocation2 + $0x7c] sm:$0xf]  ;;  %v3505_v29 = vrot.slane %v3504_v23, 4 }
 0x24f   : > { %3037 = vst.msk [vmem:[#allocation3 + $0x18] sm:$0xf] %vm3030_vm3, %v2947_v37  ;;  %v3519_v41 = vrot.slane %v3517_v20, 5  ;;  %v3818_v37 = vld [vmem:[#allocation2 + $0x18] sm:$0xe] }
 0x250   : > { %v2949_v16 = vpop.permute.xlu1 %2948  ;;  %2629 = vrot.lane.b32.xlu0 %v2418_v34, %s4637_s27  ;;  %v4528_v55 = vrot.slane %v3818_v37, 9 }
 0x251   : > { %3038 = vst.msk [vmem:[#allocation3 + $0x1c] sm:$0xf] %vm3030_vm3, %v2949_v16  ;;  %v3510_v16 = vsel %vm4812_vm11, %v3505_v29, %v3509_v19  ;;  %v3520_v47 = vsel %vm4812_vm11, %v3515_v36, %v3519_v41 }
 0x252   : > { %2631 = vrot.lane.b32.xlu1 %v2428_v44, %s4637_s27  ;;  %v2979_v50 = vpop.permute.xlu0 %2978  ;;  %v3916_v44 = vrot.slane %v3819_v24, 5 }
 0x253   : > { %3053 = vst.msk [vmem:[#allocation3 + $0x58] sm:$0xf] %vm3030_vm3, %v2979_v50 }
 0x254   : > { %v2981_v40 = vpop.permute.xlu1 %2980  ;;  %2934 = vrot.lane.b32.xlu0 %v2825_v49, %s4638_s28  ;;  %v3918_v48 = vrot.slane %v3916_v44, 4  ;;  %v3919_v49 = vrot.slane %v3820_v45, 5  ;;  %v3917_v53 = vsel %vm5169_vm14, %v4528_v55, %v3916_v44 }
 0x255   : > { %3054 = vst.msk [vmem:[#allocation3 + $0x5c] sm:$0xf] %vm3030_vm3, %v2981_v40  ;;  %v3974_v40 = vrot.slane %v3972_v13, 4 }
 0x256   : > { %2936 = vrot.lane.b32.xlu1 %v2828_v10, %s4638_s28  ;;  %v3141_v12 = vpop.permute.xlu0 %3140  ;;  %v3844_v10 = vld [vmem:[#allocation2 + $0x80] sm:$0x1]  ;;  %v3920_v57 = vsel %vm5169_vm14, %v3918_v48, %v3919_v49 }
 0x257   : > { %3231 = vst.msk [vmem:[#allocation3 + $0x18] sm:$0xf] %vm3224_vm4, %v3141_v12  ;;  %v3975_v58 = vrot.slane %v3844_v10, 5 }
 0x258   : > { %v3143_v3 = vpop.permute.xlu1 %3142  ;;  %2966 = vrot.lane.b32.xlu0 %v2881_v22, %s4638_s28 }
 0x259   : > { %3232 = vst.msk [vmem:[#allocation3 + $0x1c] sm:$0xf] %vm3224_vm4, %v3143_v3  ;;  %v3976_v59 = vsel %vm5169_vm14, %v3974_v40, %v3975_v58  ;;  %v4369_v3 = vld [vmem:[%s6116_s3] sm:$0xf] }
 0x25a   : > { %2968 = vrot.lane.b32.xlu1 %v2884_v46, %s4638_s28  ;;  %v3173_v11 = vpop.permute.xlu0 %3172  ;;  %v3973_v46 = vsel %vm5169_vm14, %v4536_v54, %v3972_v13 }
 0x25b   : > { %3247 = vst.msk [vmem:[#allocation3 + $0x58] sm:$0xf] %vm3224_vm4, %v3173_v11 }
 0x25c   : > { %v3175_v38 = vpop.permute.xlu1 %3174  ;;  %3128 = vrot.lane.b32.xlu0 %v3064_v35, %s4639_s29  ;;  %v4642_v35 = vmov 0  }
 0x25d   : > { %3248 = vst.msk [vmem:[#allocation3 + $0x5c] sm:$0xf] %vm3224_vm4, %v3175_v38  ;;  %4609 = vset.pattern.permute.xlu1 %v4642_v35  ;;  %4608 = vset.pattern.permute.xlu0 %v4642_v35 }
 0x25e   : > { %3130 = vrot.lane.b32.xlu1 %v3065_v32, %s4639_s29  ;;  %v3702_v61 = vpop.permute.xlu0 %3701 }
 0x25f   : > { %3792 = vst.msk [vmem:[#allocation3 + $0x18] sm:$0xf] %vm3785_vm5, %v3702_v61 }
 0x260   : > { %v3704_v28 = vpop.permute.xlu1 %3703  ;;  %3160 = vrot.lane.b32.xlu0 %v3080_v18, %s4639_s29 }
 0x261   : > { %3793 = vst.msk [vmem:[#allocation3 + $0x1c] sm:$0xf] %vm3785_vm5, %v3704_v28 }
 0x262   : > { %3162 = vrot.lane.b32.xlu1 %v3081_v26, %s4639_s29  ;;  %v3734_v34 = vpop.permute.xlu0 %3733 }
 0x263   : > { %3808 = vst.msk [vmem:[#allocation3 + $0x58] sm:$0xf] %vm3785_vm5, %v3734_v34 }
 0x264   : > { %v3736_v56 = vpop.permute.xlu1 %3735  ;;  %3689 = vrot.lane.b32.xlu0 %v3318_v2, %s4640_s30 }
 0x265   : > { %3809 = vst.msk [vmem:[#allocation3 + $0x5c] sm:$0xf] %vm3785_vm5, %v3736_v56 }
 0x266   : > { %3691 = vrot.lane.b32.xlu1 %v3328_v42, %s4640_s30  ;;  %v4039_v39 = vpop.permute.xlu0 %4038 }
 0x267   : > { %4129 = vst.msk [vmem:[#allocation3 + $0x18] sm:$0xf] %vm4122_vm6, %v4039_v39 }
 0x268   : > { %v4041_v50 = vpop.permute.xlu1 %4040  ;;  %3721 = vrot.lane.b32.xlu0 %v3510_v16, %s4640_s30 }
 0x269   : > { %4130 = vst.msk [vmem:[#allocation3 + $0x1c] sm:$0xf] %vm4122_vm6, %v4041_v50 }
 0x26a   : > { %3723 = vrot.lane.b32.xlu1 %v3520_v47, %s4640_s30  ;;  %v4071_v43 = vpop.permute.xlu0 %4070 }
 0x26b   : > { %4145 = vst.msk [vmem:[#allocation3 + $0x58] sm:$0xf] %vm4122_vm6, %v4071_v43 }
 0x26c   : > { %v4073_v22 = vpop.permute.xlu1 %4072  ;;  %4026 = vrot.lane.b32.xlu0 %v3917_v53, %s4641_s6 }
 0x26d   : > { %4146 = vst.msk [vmem:[#allocation3 + $0x5c] sm:$0xf] %vm4122_vm6, %v4073_v22 }
 0x26e   : > { %4028 = vrot.lane.b32.xlu1 %v3920_v57, %s4641_s6  ;;  %v2606_v60 = vpop.permute.xlu0 %2605 }
 0x26f   : > { %2698 = vst.msk [vmem:[#allocation3 + $0x10] sm:$0xf] %vm2693_vm2, %v2606_v60 }
 0x270   : > { %v2608_v17 = vpop.permute.xlu1 %2607  ;;  %4058 = vrot.lane.b32.xlu0 %v3973_v46, %s4641_s6  ;;  %v4619_v12 = vld [vmem:[#allocation3 + $0x18] sm:$0xff]  }
 0x271   : > { %2699 = vst.msk [vmem:[#allocation3 + $0x14] sm:$0xf] %vm2693_vm2, %v2608_v17  ;;  %v4282_v14 = vsel %vm4268_vm7, %v4619_v12, 0 }
 0x272   : > { %4060 = vrot.lane.b32.xlu1 %v3976_v59, %s4641_s6  ;;  %v2638_v31 = vpop.permute.xlu0 %2637 }
 0x273   : > { %2714 = vst.msk [vmem:[#allocation3 + $0x50] sm:$0xf] %vm2693_vm2, %v2638_v31 }
 0x274   : > { %v2640_v0 = vpop.permute.xlu1 %2639  ;;  %v4618_v52 = vld [vmem:[#allocation3 + $0x58] sm:$0xff]   ;;  %4364 = vperm.xlu0 %4608, %v4361_v1  }
 0x275   : > { %2715 = vst.msk [vmem:[#allocation3 + $0x54] sm:$0xf] %vm2693_vm2, %v2640_v0  ;;  %4587 = vmatprep.subr.msk.bf16.mxu0 %vm4268_vm7, %v4618_v52 }
 0x276   : > { %v2943_v51 = vpop.permute.xlu0 %2942  ;;  %4574 = vmatpush3.bf16.xpose.msra.mxu0 %v4282_v14  ;;  %4372 = vperm.xlu1 %4609, %v4369_v3  }
 0x277   : > { %3035 = vst.msk [vmem:[#allocation3 + $0x10] sm:$0xf] %vm3030_vm3, %v2943_v51 }
 0x278   : > { %v2945_v7 = vpop.permute.xlu1 %2944 }
 0x279   : > { %3036 = vst.msk [vmem:[#allocation3 + $0x14] sm:$0xf] %vm3030_vm3, %v2945_v7 }
 0x27a   : > { %v2975_v33 = vpop.permute.xlu0 %2974  ;;  %4384 = vperm.xlu1 %4609, %v4379_v15  }
 0x27b   : > { %3051 = vst.msk [vmem:[#allocation3 + $0x50] sm:$0xf] %vm3030_vm3, %v2975_v33 }
 0x27c   : > { %v2977_v11 = vpop.permute.xlu1 %2976 }
 0x27d   : > { %3052 = vst.msk [vmem:[#allocation3 + $0x54] sm:$0xf] %vm3030_vm3, %v2977_v11 }
 0x27e   : > { %v3137_v32 = vpop.permute.xlu0 %3136 }
 0x27f   : > { %3229 = vst.msk [vmem:[#allocation3 + $0x10] sm:$0xf] %vm3224_vm4, %v3137_v32 }
 0x280   : > { %v3139_v6 = vpop.permute.xlu1 %3138 }
 0x281   : > { %3230 = vst.msk [vmem:[#allocation3 + $0x14] sm:$0xf] %vm3224_vm4, %v3139_v6 }
 0x282   : > { %v3169_v9 = vpop.permute.xlu0 %3168 }
 0x283   : > { %3245 = vst.msk [vmem:[#allocation3 + $0x50] sm:$0xf] %vm3224_vm4, %v3169_v9 }
 0x284   : > { %v3171_v19 = vpop.permute.xlu1 %3170 }
 0x285   : > { %3246 = vst.msk [vmem:[#allocation3 + $0x54] sm:$0xf] %vm3224_vm4, %v3171_v19 }
 0x286   : > { %v3698_v21 = vpop.permute.xlu0 %3697 }
 0x287   : > { %3790 = vst.msk [vmem:[#allocation3 + $0x10] sm:$0xf] %vm3785_vm5, %v3698_v21 }
 0x288   : > { %v3700_v38 = vpop.permute.xlu1 %3699 }
 0x289   : > { %3791 = vst.msk [vmem:[#allocation3 + $0x14] sm:$0xf] %vm3785_vm5, %v3700_v38 }
 0x28a   : > { %v3730_v30 = vpop.permute.xlu0 %3729 }
 0x28b   : > { %3806 = vst.msk [vmem:[#allocation3 + $0x50] sm:$0xf] %vm3785_vm5, %v3730_v30 }
 0x28c   : > { %v3732_v18 = vpop.permute.xlu1 %3731 }
 0x28d   : > { %3807 = vst.msk [vmem:[#allocation3 + $0x54] sm:$0xf] %vm3785_vm5, %v3732_v18 }
 0x28e   : > { %v4035_v63 = vpop.permute.xlu0 %4034 }
 0x28f   : > { %4127 = vst.msk [vmem:[#allocation3 + $0x10] sm:$0xf] %vm4122_vm6, %v4035_v63 }
 0x290   : > { %v4037_v23 = vpop.permute.xlu1 %4036 }
 0x291   : > { %4128 = vst.msk [vmem:[#allocation3 + $0x14] sm:$0xf] %vm4122_vm6, %v4037_v23 }
 0x292   : > { %v4067_v61 = vpop.permute.xlu0 %4066 }
 0x293   : > { %4143 = vst.msk [vmem:[#allocation3 + $0x50] sm:$0xf] %vm4122_vm6, %v4067_v61 }
 0x294   : > { %v4069_v26 = vpop.permute.xlu1 %4068 }
 0x295   : > { %4144 = vst.msk [vmem:[#allocation3 + $0x54] sm:$0xf] %vm4122_vm6, %v4069_v26 }
 0x296   : > { %v2602_v4 = vpop.permute.xlu0 %2601 }
 0x297   : > { %2696 = vst.msk [vmem:[#allocation3 + $0x8] sm:$0xf] %vm2693_vm2, %v2602_v4 }
 0x298   : > { %v2604_v25 = vpop.permute.xlu1 %2603  ;;  %v4621_v27 = vld [vmem:[#allocation3 + $0x10] sm:$0xff]  }
 0x299   : > { %2697 = vst.msk [vmem:[#allocation3 + $0xc] sm:$0xf] %vm2693_vm2, %v2604_v25  ;;  %v4279_v2 = vsel %vm4268_vm7, %v4621_v27, 0 }
 0x29a   : > { %v2634_v20 = vpop.permute.xlu0 %2633 }
 0x29b   : > { %2712 = vst.msk [vmem:[#allocation3 + $0x48] sm:$0xf] %vm2693_vm2, %v2634_v20 }
 0x29c   : > { %v2636_v28 = vpop.permute.xlu1 %2635  ;;  %v4620_v24 = vld [vmem:[#allocation3 + $0x50] sm:$0xff]  }
 0x29d   : > { %2713 = vst.msk [vmem:[#allocation3 + $0x4c] sm:$0xf] %vm2693_vm2, %v2636_v28  ;;  %4588 = vmatprep.subr.msk.bf16.mxu0 %vm4268_vm7, %v4620_v24 }
 0x29e   : > { %v2939_v29 = vpop.permute.xlu0 %2938  ;;  %4576 = vmatpush3.bf16.xpose.msra.mxu0 %v4279_v2 }
 0x29f   : > { %3033 = vst.msk [vmem:[#allocation3 + $0x8] sm:$0xf] %vm3030_vm3, %v2939_v29 }
 0x2a0   : > { %v2941_v34 = vpop.permute.xlu1 %2940 }
 0x2a1   : > { %3034 = vst.msk [vmem:[#allocation3 + $0xc] sm:$0xf] %vm3030_vm3, %v2941_v34 }
 0x2a2   : > { %v2971_v42 = vpop.permute.xlu0 %2970 }
 0x2a3   : > { %3049 = vst.msk [vmem:[#allocation3 + $0x48] sm:$0xf] %vm3030_vm3, %v2971_v42 }
 0x2a4   : > { %v2973_v36 = vpop.permute.xlu1 %2972 }
 0x2a5   : > { %3050 = vst.msk [vmem:[#allocation3 + $0x4c] sm:$0xf] %vm3030_vm3, %v2973_v36 }
 0x2a6   : > { %v3133_v41 = vpop.permute.xlu0 %3132 }
 0x2a7   : > { %3227 = vst.msk [vmem:[#allocation3 + $0x8] sm:$0xf] %vm3224_vm4, %v3133_v41 }
 0x2a8   : > { %v3135_v37 = vpop.permute.xlu1 %3134 }
 0x2a9   : > { %3228 = vst.msk [vmem:[#allocation3 + $0xc] sm:$0xf] %vm3224_vm4, %v3135_v37 }
 0x2aa   : > { %v3165_v44 = vpop.permute.xlu0 %3164 }
 0x2ab   : > { %3243 = vst.msk [vmem:[#allocation3 + $0x48] sm:$0xf] %vm3224_vm4, %v3165_v44 }
 0x2ac   : > { %v3167_v56 = vpop.permute.xlu1 %3166 }
 0x2ad   : > { %3244 = vst.msk [vmem:[#allocation3 + $0x4c] sm:$0xf] %vm3224_vm4, %v3167_v56 }
 0x2ae   : > { %v3694_v45 = vpop.permute.xlu0 %3693 }
 0x2af   : > { %3788 = vst.msk [vmem:[#allocation3 + $0x8] sm:$0xf] %vm3785_vm5, %v3694_v45 }
 0x2b0   : > { %v3696_v5 = vpop.permute.xlu1 %3695 }
 0x2b1   : > { %3789 = vst.msk [vmem:[#allocation3 + $0xc] sm:$0xf] %vm3785_vm5, %v3696_v5 }
 0x2b2   : > { %v3726_v16 = vpop.permute.xlu0 %3725 }
 0x2b3   : > { %3804 = vst.msk [vmem:[#allocation3 + $0x48] sm:$0xf] %vm3785_vm5, %v3726_v16 }
 0x2b4   : > { %v3728_v55 = vpop.permute.xlu1 %3727 }
 0x2b5   : > { %3805 = vst.msk [vmem:[#allocation3 + $0x4c] sm:$0xf] %vm3785_vm5, %v3728_v55 }
 0x2b6   : > { %v4031_v39 = vpop.permute.xlu0 %4030 }
 0x2b7   : > { %4125 = vst.msk [vmem:[#allocation3 + $0x8] sm:$0xf] %vm4122_vm6, %v4031_v39 }
 0x2b8   : > { %v4033_v47 = vpop.permute.xlu1 %4032 }
 0x2b9   : > { %4126 = vst.msk [vmem:[#allocation3 + $0xc] sm:$0xf] %vm4122_vm6, %v4033_v47 }
 0x2ba   : > { %v4063_v48 = vpop.permute.xlu0 %4062 }
 0x2bb   : > { %4141 = vst.msk [vmem:[#allocation3 + $0x48] sm:$0xf] %vm4122_vm6, %v4063_v48 }
 0x2bc   : > { %v4065_v49 = vpop.permute.xlu1 %4064 }
 0x2bd   : > { %4142 = vst.msk [vmem:[#allocation3 + $0x4c] sm:$0xf] %vm4122_vm6, %v4065_v49 }
 0x2be   : > { %v2598_v8 = vpop.permute.xlu0 %2597 }
 0x2bf   : > { %2694 = vst.msk [vmem:[#allocation3] sm:$0xf] %vm2693_vm2, %v2598_v8 }
 0x2c0   : > { %v2600_v13 = vpop.permute.xlu1 %2599  ;;  %v4623_v50 = vld [vmem:[#allocation3 + $0x8] sm:$0xff]  }
 0x2c1   : > { %2695 = vst.msk [vmem:[#allocation3 + $0x4] sm:$0xf] %vm2693_vm2, %v2600_v13  ;;  %v4276_v43 = vsel %vm4268_vm7, %v4623_v50, 0 }
 0x2c2   : > { %v2630_v10 = vpop.permute.xlu0 %2629 }
 0x2c3   : > { %2710 = vst.msk [vmem:[#allocation3 + $0x40] sm:$0xf] %vm2693_vm2, %v2630_v10 }
 0x2c4   : > { %v2632_v53 = vpop.permute.xlu1 %2631  ;;  %v4622_v54 = vld [vmem:[#allocation3 + $0x48] sm:$0xff]  }
 0x2c5   : > { %2711 = vst.msk [vmem:[#allocation3 + $0x44] sm:$0xf] %vm2693_vm2, %v2632_v53  ;;  %4589 = vmatprep.subr.msk.bf16.mxu0 %vm4268_vm7, %v4622_v54 }
 0x2c6   : > { %v2935_v57 = vpop.permute.xlu0 %2934  ;;  %4578 = vmatpush3.bf16.xpose.msra.mxu0 %v4276_v43 }
 0x2c7   : > { %3031 = vst.msk [vmem:[#allocation3] sm:$0xf] %vm3030_vm3, %v2935_v57 }
 0x2c8   : > { %v2937_v40 = vpop.permute.xlu1 %2936 }
 0x2c9   : > { %3032 = vst.msk [vmem:[#allocation3 + $0x4] sm:$0xf] %vm3030_vm3, %v2937_v40 }
 0x2ca   : > { %v2967_v58 = vpop.permute.xlu0 %2966 }
 0x2cb   : > { %3047 = vst.msk [vmem:[#allocation3 + $0x40] sm:$0xf] %vm3030_vm3, %v2967_v58 }
 0x2cc   : > { %v2969_v22 = vpop.permute.xlu1 %2968 }
 0x2cd   : > { %3048 = vst.msk [vmem:[#allocation3 + $0x44] sm:$0xf] %vm3030_vm3, %v2969_v22 }
 0x2ce   : > { %v3129_v46 = vpop.permute.xlu0 %3128 }
 0x2cf   : > { %3225 = vst.msk [vmem:[#allocation3] sm:$0xf] %vm3224_vm4, %v3129_v46 }
 0x2d0   : > { %v3131_v60 = vpop.permute.xlu1 %3130 }
 0x2d1   : > { %3226 = vst.msk [vmem:[#allocation3 + $0x4] sm:$0xf] %vm3224_vm4, %v3131_v60 }
 0x2d2   : > { %v3161_v59 = vpop.permute.xlu0 %3160 }
 0x2d3   : > { %3241 = vst.msk [vmem:[#allocation3 + $0x40] sm:$0xf] %vm3224_vm4, %v3161_v59 }
 0x2d4   : > { %v3163_v17 = vpop.permute.xlu1 %3162 }
 0x2d5   : > { %3242 = vst.msk [vmem:[#allocation3 + $0x44] sm:$0xf] %vm3224_vm4, %v3163_v17 }
 0x2d6   : > { %v3690_v12 = vpop.permute.xlu0 %3689 }
 0x2d7   : > { %3786 = vst.msk [vmem:[#allocation3] sm:$0xf] %vm3785_vm5, %v3690_v12 }
 0x2d8   : > { %v3692_v31 = vpop.permute.xlu1 %3691 }
 0x2d9   : > { %3787 = vst.msk [vmem:[#allocation3 + $0x4] sm:$0xf] %vm3785_vm5, %v3692_v31 }
 0x2da   : > { %v3722_v0 = vpop.permute.xlu0 %3721 }
 0x2db   : > { %3802 = vst.msk [vmem:[#allocation3 + $0x40] sm:$0xf] %vm3785_vm5, %v3722_v0 }
 0x2dc   : > { %v3724_v52 = vpop.permute.xlu1 %3723 }
 0x2dd   : > { %3803 = vst.msk [vmem:[#allocation3 + $0x44] sm:$0xf] %vm3785_vm5, %v3724_v52 }
 0x2de   : > { %v4027_v14 = vpop.permute.xlu0 %4026 }
 0x2df   : > { %4123 = vst.msk [vmem:[#allocation3] sm:$0xf] %vm4122_vm6, %v4027_v14 }
 0x2e0   : > { %v4029_v1 = vpop.permute.xlu1 %4028 }
 0x2e1   : > { %4124 = vst.msk [vmem:[#allocation3 + $0x4] sm:$0xf] %vm4122_vm6, %v4029_v1 }
 0x2e2   : > { %v4059_v3 = vpop.permute.xlu0 %4058 }
 0x2e3   : > { %4139 = vst.msk [vmem:[#allocation3 + $0x40] sm:$0xf] %vm4122_vm6, %v4059_v3 }
 0x2e4   : > { %v4061_v51 = vpop.permute.xlu1 %4060 }
 0x2e5   : > { %4140 = vst.msk [vmem:[#allocation3 + $0x44] sm:$0xf] %vm4122_vm6, %v4061_v51 }
 0x2e8   : > { %v4625_v35 = vld [vmem:[#allocation3] sm:$0xff]  }
 0x2e9   : > { %v4273_v15 = vsel %vm4268_vm7, %v4625_v35, 0 }
 0x2ec   : > { %v4624_v7 = vld [vmem:[#allocation3 + $0x40] sm:$0xff]  }
 0x2ed   : > { %4590 = vmatprep.subr.msk.bf16.mxu0 %vm4268_vm7, %v4624_v7 }
 0x2ee   : > { %4580 = vmatpush3.bf16.xpose.msra.mxu0 %v4273_v15 }
 0x2ef   : > { %v4365_v33 = vpop.permute.xlu0 %4364 }
 0x2f1   : > { %v4373_v11 = vpop.permute.xlu1 %4372 }
 0x2f5   : > { %4582 = vmatmul.mubr.msk.bf16.vlgmr.msra.gmra.mxu0 %vm4268_vm7, %v6021_v62  ;;  %v4385_v63 = vpop.permute.xlu1 %4384 }
 0x3b5   : > { %v4354_v32 = vpop.f32.mrf.mxu0 }
 0x3b6   : > { %v4367_v6 = vmul.f32 %v4365_v33, %v4354_v32 }
 0x3b7   : > { %v4356_v9 = vpop.f32.mrf.mxu0 }
 0x3b8   : > { %v4375_v19 = vadd.f32 %v4373_v11, %v4367_v6  ;;  %v4368_v21 = vmul.f32 %v4365_v33, %v4356_v9 }
 0x3b9   : > { %v4358_v38 = vpop.f32.mrf.mxu0 }
 0x3ba   : > { %v4376_v30 = vadd.f32 %v4373_v11, %v4368_v21  ;;  %v4380_v18 = vmin.f32 %v4375_v19, 0.0  ;;  %v4377_v4 = vmax.f32 %v4375_v19, 0.0 }
 0x3bb   : > { %v4359_v23 = vpop.f32.mrf.mxu0 }
 0x3bc   : > { %v4381_v61 = vmin.f32 %v4376_v30, 0.0  ;;  %v4387_v26 = vmul.f32 %v4385_v63, %v4380_v18  ;;  %v4378_v25 = vmax.f32 %v4376_v30, 0.0 }
 0x3be   : > { %v4388_v27 = vmul.f32 %v4385_v63, %v4381_v61  ;;  %v4389_v20 = vadd.f32 %v4387_v26, %v4377_v4 }
 0x3c0   : > { %v4390_v62 = vadd.f32 %v4388_v27, %v4378_v25 }
 0x3c2   : > { %v4393_v28 = vcombine.low %v4389_v20, %v4390_v62 }
 0x3c4   : > { %4395 = vst [vmem:[%s224_s20] sm:$0xff] %v4393_v28 }
 0x3c5 PF: > { %s15_s18 = sadd.s32 1, %s4632_s18  }
 0x3c6   : > { %p12_p4 = scmp.ge.s32.totalorder %s15_s18, 4  }
 0x3c8   :  { %14 = sbr.rel (!%p12_p4) target bundleno = 1 (0x1), region = 73 }

</bundles_post_ra>
